<compile_context>
chip_gen: v7x
topology: tpu7x:2x2x1
jax: 0.10.0
libtpu: 0.0.40
codegen_flags: <defaults>
</compile_context>

<pallas_src>
import functools
import math

import jax
import jax.numpy as jnp
import numpy as np
from jax.experimental import pallas as pl
from jax.experimental.pallas import tpu as pltpu

BN_EPS = 1e-5
C_OUT = 64          # real output channels of the stem
CPAD = 128          # lane-dense channel padding used inside the kernel
K1P = 32            # conv1 im2col K (= 3*3*3 = 27) padded up


# ------------------------------ Pallas kernel -------------------------------

def _stem_kernel(p1_ref, w1_ref, b1_ref, w2_ref, b2_ref, w3_ref, b3_ref,
                 o_ref, a_scr, mp_scr, *, M1, Wo1, Hp, Wp, PADR):
    """Fused stem for one batch sample (grid axis = batch).

    a_scr  : (2*PADR + M1, CPAD) f32 zero-padded flat activation (row = oh*Wo1+ow)
    mp_scr : (Hp, Wo1, CPAD)     f32 pre-decimation maxpool buffer
    """
    f32 = jnp.float32

    # Row masks for the W boundary of 3x3 taps: output row r has ow = r % Wo1.
    # A (kw==0) tap is invalid at ow==0, a (kw==2) tap at ow==Wo1-1.
    ow = jax.lax.broadcasted_iota(jnp.int32, (M1, 1), 0) % Wo1
    not_first = (ow != 0).astype(f32)
    not_last = (ow != Wo1 - 1).astype(f32)

    # ---- conv1: (M1, K) patches @ folded weights, + bias + ReLU (MXU) -------
    x = jnp.dot(p1_ref[0], w1_ref[...], preferred_element_type=f32)
    x = jnp.maximum(x + b1_ref[...], 0.0)

    a_scr[...] = jnp.zeros_like(a_scr)            # zero the halo rows (and body)
    a_scr[pl.ds(PADR, M1), :] = x

    # ---- conv2 / conv3(+bn1): 9 shifted-view tap matmuls over the scratch ---
    def conv3x3(w_ref, b_ref):
        acc = jnp.zeros((M1, CPAD), f32)
        for kh in range(3):
            for kw in range(3):
                off = (kh - 1) * Wo1 + (kw - 1)
                tap = a_scr[pl.ds(PADR + off, M1), :]
                if kw == 0:
                    tap = tap * not_first
                elif kw == 2:
                    tap = tap * not_last
                acc = acc + jnp.dot(tap.astype(jnp.bfloat16),
                                    w_ref[kh * 3 + kw],
                                    preferred_element_type=f32)
        return jnp.maximum(acc + b_ref[...], 0.0)

    x = conv3x3(w2_ref, b2_ref)
    a_scr[pl.ds(PADR, M1), :] = x
    x = conv3x3(w3_ref, b3_ref)                   # conv3 + bn1 + act1, f32
    a_scr[pl.ds(PADR, M1), :] = x                 # reused for the maxpool shifts

    # ---- maxpool 3x3, stride 2, pad 1 (inputs >= 0, so 0 acts like -inf) ----
    left = a_scr[pl.ds(PADR - 1, M1), :] * not_first      # value at (oh, ow-1)
    right = a_scr[pl.ds(PADR + 1, M1), :] * not_last      # value at (oh, ow+1)
    wmax = jnp.maximum(x, jnp.maximum(left, right))       # 3-tap max along W
    wmax = wmax.reshape(Hp, 2, Wo1, CPAD)                 # split rows 2ph / 2ph+1
    ev = wmax[:, 0]                                       # row 2ph
    od = wmax[:, 1]                                       # row 2ph + 1
    od_up = jnp.concatenate(
        [jnp.zeros((1, Wo1, CPAD), f32), od[:Hp - 1]], axis=0)   # row 2ph - 1
    mp_scr[...] = jnp.maximum(ev, jnp.maximum(od, od_up))        # (Hp, Wo1, CPAD)
    # keep even columns (stride-2 decimation along W) -> lane-dense output block
    o_ref[0] = mp_scr[:, pl.ds(0, Wp, 2), :]


# ------------------------------- JAX wrapper --------------------------------

def _conv1_patches(x_nhwc):
    """im2col for the tiny 3-channel stride-2 stem conv (one XLA fusion)."""
    N, H, W, C = x_nhwc.shape
    xp = jnp.pad(x_nhwc, ((0, 0), (1, 1), (1, 1), (0, 0)))
    Ho, Wo = (H + 2 - 3) // 2 + 1, (W + 2 - 3) // 2 + 1
    cols = []
    for kh in range(3):
        for kw in range(3):
            cols.append(xp[:, kh:kh + 2 * Ho:2, kw:kw + 2 * Wo:2, :])
    p = jnp.stack(cols, axis=3).reshape(N, Ho * Wo, 9 * C)
    p = jnp.pad(p, ((0, 0), (0, 0), (0, K1P - 9 * C)))
    return p.astype(jnp.bfloat16), Ho, Wo


def resnet50vd_small_forward(x_nchw, kparams):
    """Forward of ResNet50vd_samll with idx=0 (deep stem + maxpool). NCHW in/out."""
    N = x_nchw.shape[0]
    x = jnp.transpose(x_nchw, (0, 2, 3, 1)).astype(jnp.float32)   # NHWC
    p1, Ho1, Wo1 = _conv1_patches(x)
    M1 = Ho1 * Wo1
    assert Ho1 % 2 == 0 and Wo1 % 2 == 0, "even post-conv1 spatial dims expected"
    Hp, Wp = Ho1 // 2, Wo1 // 2                   # maxpool(3, s=2, p=1) output
    PADR = -(-(Wo1 + 1) // 8) * 8                 # halo rows (>= Wo1+1, mult of 8)
    # Per-sample activations must fit VMEM (true up to ~224x224 inputs).
    # TODO(synk): add spatial tiling of the grid for larger resolutions.
    assert (2 * PADR + M1) * CPAD * 4 < 8 * 1024 * 1024

    kernel = functools.partial(_stem_kernel, M1=M1, Wo1=Wo1,
                               Hp=Hp, Wp=Wp, PADR=PADR)
    y = pl.pallas_call(
        kernel,
        out_shape=jax.ShapeDtypeStruct((N, Hp, Wp, CPAD), jnp.float32),
        grid=(N,),
        in_specs=[
            pl.BlockSpec((1, M1, K1P), lambda n: (n, 0, 0)),       # conv1 patches
            pl.BlockSpec((K1P, CPAD), lambda n: (0, 0)),           # w1 (folded)
            pl.BlockSpec((1, CPAD), lambda n: (0, 0)),             # b1
            pl.BlockSpec((9, CPAD, CPAD), lambda n: (0, 0, 0)),    # w2 per tap
            pl.BlockSpec((1, CPAD), lambda n: (0, 0)),             # b2
            pl.BlockSpec((9, CPAD, CPAD), lambda n: (0, 0, 0)),    # w3 per tap
            pl.BlockSpec((1, CPAD), lambda n: (0, 0)),             # b3
        ],
        out_specs=pl.BlockSpec((1, Hp, Wp, CPAD), lambda n: (n, 0, 0, 0)),
        scratch_shapes=[
            pltpu.VMEM((2 * PADR + M1, CPAD), jnp.float32),  # padded activations
            pltpu.VMEM((Hp, Wo1, CPAD), jnp.float32),        # pre-decimation pool
        ],
        compiler_params=pltpu.CompilerParams(
            dimension_semantics=("parallel",)),               # v7x megacore: batch
    )(p1, kparams["w1"], kparams["b1"], kparams["w2"], kparams["b2"],
      kparams["w3"], kparams["b3"])
    y = y[..., :C_OUT]                                   # drop channel padding
    return jnp.transpose(y, (0, 3, 1, 2))                # back to NCHW


# ------------------------------ parameters ----------------------------------

def init_raw_params(key):
    """Deterministic params mirroring ResNet.init_weights: conv kaiming_normal
    (fan_out, relu); BN gamma=1, beta=0, running_mean=0, running_var=1."""
    def kaiming(k, cout, cin, ksz):
        std = math.sqrt(2.0 / (cout * ksz * ksz))
        return std * jax.random.normal(k, (cout, cin, ksz, ksz), jnp.float32)

    def bn(c):
        return dict(gamma=jnp.ones((c,), jnp.float32),
                    beta=jnp.zeros((c,), jnp.float32),
                    mean=jnp.zeros((c,), jnp.float32),
                    var=jnp.ones((c,), jnp.float32))

    k1, k2, k3 = jax.random.split(key, 3)
    return dict(w1=kaiming(k1, 32, 3, 3), bn1=bn(32),
                w2=kaiming(k2, 32, 32, 3), bn2=bn(32),
                w3=kaiming(k3, 64, 32, 3), bn3=bn(64))


def _fold_bn(bn, eps=BN_EPS):
    scale = bn["gamma"] / jnp.sqrt(bn["var"] + eps)
    bias = bn["beta"] - bn["mean"] * scale
    return scale, bias


def prepare_params(raw):
    """Fold BN scales into the conv weights (in f32), zero-pad channels to
    CPAD=128 for lane-dense layout, cast MXU operands to bf16."""
    def pad2(a, rows, cols):
        return jnp.pad(a, ((0, rows - a.shape[0]), (0, cols - a.shape[1])))

    def bias_vec(b):
        return jnp.pad(b, (0, CPAD - b.shape[0])).reshape(1, CPAD).astype(jnp.float32)

    s1, b1 = _fold_bn(raw["bn1"])
    s2, b2 = _fold_bn(raw["bn2"])
    s3, b3 = _fold_bn(raw["bn3"])

    # conv1: OIHW -> (kh*kw*cin, cout) matching the wrapper im2col tap order.
    cout1, cin1 = raw["w1"].shape[:2]
    w1 = jnp.transpose(raw["w1"], (2, 3, 1, 0)).reshape(9 * cin1, cout1)
    w1 = pad2(w1 * s1[None, :], K1P, CPAD).astype(jnp.bfloat16)

    def per_tap(w_oihw, scale):
        taps = []
        for kh in range(3):
            for kw in range(3):
                t = w_oihw[:, :, kh, kw].T * scale[None, :]      # (cin, cout)
                taps.append(pad2(t, CPAD, CPAD))
        return jnp.stack(taps, axis=0).astype(jnp.bfloat16)

    return dict(w1=w1, b1=bias_vec(b1),
                w2=per_tap(raw["w2"], s2), b2=bias_vec(b2),
                w3=per_tap(raw["w3"], s3), b3=bias_vec(b3))


# --------------------------- reference (plain JAX) ---------------------------

def _reference_forward(x_nchw, raw):
    """XLA reference with the same quantization points as the kernel
    (bf16 conv operands, f32 accumulation / bias / ReLU / maxpool)."""
    def conv(x, w_oihw, scale, stride):
        w = (w_oihw * scale[:, None, None, None]).astype(jnp.bfloat16)
        return jax.lax.conv_general_dilated(
            x.astype(jnp.bfloat16), w, (stride, stride), ((1, 1), (1, 1)),
            dimension_numbers=("NCHW", "OIHW", "NCHW"),
            preferred_element_type=jnp.float32)

    s1, b1 = _fold_bn(raw["bn1"])
    s2, b2 = _fold_bn(raw["bn2"])
    s3, b3 = _fold_bn(raw["bn3"])
    x = x_nchw.astype(jnp.float32)
    x = jnp.maximum(conv(x, raw["w1"], s1, 2) + b1[None, :, None, None], 0.0)
    x = jnp.maximum(conv(x, raw["w2"], s2, 1) + b2[None, :, None, None], 0.0)
    x = jnp.maximum(conv(x, raw["w3"], s3, 1) + b3[None, :, None, None], 0.0)
    return jax.lax.reduce_window(
        x, -jnp.inf, jax.lax.max, (1, 1, 3, 3), (1, 1, 2, 2),
        ((0, 0), (0, 0), (1, 1), (1, 1)))


# ----------------------------------- main ------------------------------------

if __name__ == "__main__":
    key = jax.random.PRNGKey(0)
    k_x, k_p = jax.random.split(key)

    # Input: NCHW, in_chans=3 (as the stem expects), small spatial.
    x = jax.random.normal(k_x, (2, 3, 32, 32), jnp.float32)
    raw = init_raw_params(k_p)
    kparams = prepare_params(raw)

    fwd = jax.jit(resnet50vd_small_forward)
    out = jax.block_until_ready(fwd(x, kparams))
    assert out.shape == (2, 64, 8, 8), out.shape

    ref = jax.block_until_ready(_reference_forward(x, raw))
    np.testing.assert_allclose(np.asarray(out), np.asarray(ref),
                               rtol=2e-2, atol=2e-2)

    print("KERNEL_OK")
</pallas_src>

<mosaic_0001>
module attributes {stable_mosaic.version = 11 : i64} {
  func.func @_stem_kernel(%arg0: i32, %arg1: memref<1x256x32xbf16, #tpu.memory_space<vmem>>, %arg2: memref<32x128xbf16, #tpu.memory_space<vmem>>, %arg3: memref<1x128xf32, #tpu.memory_space<vmem>>, %arg4: memref<9x128x128xbf16, #tpu.memory_space<vmem>>, %arg5: memref<1x128xf32, #tpu.memory_space<vmem>>, %arg6: memref<9x128x128xbf16, #tpu.memory_space<vmem>>, %arg7: memref<1x128xf32, #tpu.memory_space<vmem>>, %arg8: memref<1x8x8x128xf32, #tpu.memory_space<vmem>>, %arg9: memref<304x128xf32, #tpu.memory_space<vmem>>, %arg10: memref<8x16x128xf32, #tpu.memory_space<vmem>>) attributes {dimension_semantics = [#tpu.dimension_semantics<parallel>], iteration_bounds = array<i64: 2>, scalar_prefetch = 0 : i64, scratch_operands = 2 : i64, tpu.core_type = #tpu.core_type<tc>, window_params = [{transform_indices = @transform_0, window_bounds = array<i64: 1, 256, 32>}, {pipeline_mode = #tpu.pipeline_mode<synchronous>, transform_indices = @transform_1, window_bounds = array<i64: 32, 128>}, {pipeline_mode = #tpu.pipeline_mode<synchronous>, transform_indices = @transform_2, window_bounds = array<i64: 1, 128>}, {pipeline_mode = #tpu.pipeline_mode<synchronous>, transform_indices = @transform_3, window_bounds = array<i64: 9, 128, 128>}, {pipeline_mode = #tpu.pipeline_mode<synchronous>, transform_indices = @transform_4, window_bounds = array<i64: 1, 128>}, {pipeline_mode = #tpu.pipeline_mode<synchronous>, transform_indices = @transform_5, window_bounds = array<i64: 9, 128, 128>}, {pipeline_mode = #tpu.pipeline_mode<synchronous>, transform_indices = @transform_6, window_bounds = array<i64: 1, 128>}, {transform_indices = @transform_7, window_bounds = array<i64: 1, 8, 8, 128>}]} {
    %0 = tpu.iota {dimensions = array<i32: 0>} : vector<256x1xi32>
    %c16_i32 = arith.constant 16 : i32
    %c0_i32 = arith.constant 0 : i32
    %1 = arith.cmpi eq, %c16_i32, %c0_i32 : i32
    %c1_i32 = arith.constant 1 : i32
    %2 = arith.select %1, %c1_i32, %c16_i32 : i32
    %3 = vector.broadcast %2 : i32 to vector<256x1xi32>
    %4 = arith.remsi %0, %3 : vector<256x1xi32>
    %c0_i32_0 = arith.constant 0 : i32
    %5 = vector.broadcast %c0_i32_0 : i32 to vector<256x1xi32>
    %6 = arith.cmpi ne, %4, %5 : vector<256x1xi32>
    %c0_i32_1 = arith.constant 0 : i32
    %7 = vector.broadcast %c0_i32_1 : i32 to vector<256x1xi32>
    %8 = arith.cmpi slt, %4, %7 : vector<256x1xi32>
    %c0_i32_2 = arith.constant 0 : i32
    %9 = arith.cmpi slt, %2, %c0_i32_2 : i32
    %10 = vector.broadcast %9 : i1 to vector<256x1xi1>
    %11 = vector.broadcast %10 : vector<256x1xi1> to vector<256x1xi1>
    %12 = arith.xori %8, %11 : vector<256x1xi1>
    %13 = arith.andi %12, %6 : vector<256x1xi1>
    %14 = vector.broadcast %2 : i32 to vector<256x1xi32>
    %15 = arith.addi %4, %14 : vector<256x1xi32>
    %16 = arith.select %13, %15, %4 : vector<256x1xi1>, vector<256x1xi32>
    %c0_i32_3 = arith.constant 0 : i32
    %17 = vector.broadcast %c0_i32_3 : i32 to vector<256x1xi32>
    %18 = arith.cmpi ne, %16, %17 : vector<256x1xi32>
    %19 = arith.extui %18 : vector<256x1xi1> to vector<256x1xi32>
    %20 = arith.sitofp %19 : vector<256x1xi32> to vector<256x1xf32>
    %c15_i32 = arith.constant 15 : i32
    %21 = vector.broadcast %c15_i32 : i32 to vector<256x1xi32>
    %22 = arith.cmpi ne, %16, %21 : vector<256x1xi32>
    %23 = arith.extui %22 : vector<256x1xi1> to vector<256x1xi32>
    %24 = arith.sitofp %23 : vector<256x1xi32> to vector<256x1xf32>
    %c0 = arith.constant 0 : index
    %c0_4 = arith.constant 0 : index
    %c0_5 = arith.constant 0 : index
    %25 = vector.load %arg1[%c0, %c0_4, %c0_5] : memref<1x256x32xbf16, #tpu.memory_space<vmem>>, vector<1x256x32xbf16>
    %26 = vector.shape_cast %25 : vector<1x256x32xbf16> to vector<256x32xbf16>
    %c0_6 = arith.constant 0 : index
    %c0_7 = arith.constant 0 : index
    %27 = vector.load %arg2[%c0_6, %c0_7] : memref<32x128xbf16, #tpu.memory_space<vmem>>, vector<32x128xbf16>
    %cst = arith.constant dense<0.000000e+00> : vector<256x128xf32>
    %28 = tpu.matmul %26, %27, %cst {dimension_numbers = #tpu.dot_dimension_numbers<[1], [0], [0], [1], [0, 0, 1, 1], [], []>} : vector<256x32xbf16>, vector<32x128xbf16>, vector<256x128xf32> -> vector<256x128xf32>
    %c0_8 = arith.constant 0 : index
    %c0_9 = arith.constant 0 : index
    %29 = vector.load %arg3[%c0_8, %c0_9] : memref<1x128xf32, #tpu.memory_space<vmem>>, vector<1x128xf32>
    %30 = vector.broadcast %29 : vector<1x128xf32> to vector<256x128xf32>
    %31 = arith.addf %28, %30 : vector<256x128xf32>
    %cst_10 = arith.constant 0.000000e+00 : f32
    %32 = vector.broadcast %cst_10 : f32 to vector<256x128xf32>
    %33 = arith.maximumf %31, %32 : vector<256x128xf32>
    %cst_11 = arith.constant 0.000000e+00 : f32
    %34 = vector.broadcast %cst_11 : f32 to vector<304x128xf32>
    %c0_12 = arith.constant 0 : index
    %c0_13 = arith.constant 0 : index
    %35 = vector.load %arg9[%c0_12, %c0_13] : memref<304x128xf32, #tpu.memory_space<vmem>>, vector<304x128xf32>
    tpu.vector_store %arg9[%c0_12, %c0_13], %34 {strides = array<i32>} : memref<304x128xf32, #tpu.memory_space<vmem>>, vector<304x128xf32>,
    %c24 = arith.constant 24 : index
    %c0_14 = arith.constant 0 : index
    %36 = vector.load %arg9[%c24, %c0_14] : memref<304x128xf32, #tpu.memory_space<vmem>>, vector<256x128xf32>
    tpu.vector_store %arg9[%c24, %c0_14], %33 {strides = array<i32>} : memref<304x128xf32, #tpu.memory_space<vmem>>, vector<256x128xf32>,
    %cst_15 = arith.constant 0.000000e+00 : f32
    %37 = vector.broadcast %cst_15 : f32 to vector<256x128xf32>
    %c7 = arith.constant 7 : index
    %c0_16 = arith.constant 0 : index
    %38 = vector.load %arg9[%c7, %c0_16] : memref<304x128xf32, #tpu.memory_space<vmem>>, vector<256x128xf32>
    %39 = vector.broadcast %20 : vector<256x1xf32> to vector<256x128xf32>
    %40 = arith.mulf %38, %39 : vector<256x128xf32>
    %41 = arith.truncf %40 : vector<256x128xf32> to vector<256x128xbf16>
    %c0_17 = arith.constant 0 : index
    %c0_18 = arith.constant 0 : index
    %c0_19 = arith.constant 0 : index
    %42 = vector.load %arg4[%c0_17, %c0_18, %c0_19] : memref<9x128x128xbf16, #tpu.memory_space<vmem>>, vector<1x128x128xbf16>
    %43 = vector.shape_cast %42 : vector<1x128x128xbf16> to vector<128x128xbf16>
    %cst_20 = arith.constant dense<0.000000e+00> : vector<256x128xf32>
    %44 = tpu.matmul %41, %43, %cst_20 {dimension_numbers = #tpu.dot_dimension_numbers<[1], [0], [0], [1], [0, 0, 1, 1], [], []>} : vector<256x128xbf16>, vector<128x128xbf16>, vector<256x128xf32> -> vector<256x128xf32>
    %45 = arith.addf %37, %44 : vector<256x128xf32>
    %c8 = arith.constant 8 : index
    %c0_21 = arith.constant 0 : index
    %46 = vector.load %arg9[%c8, %c0_21] : memref<304x128xf32, #tpu.memory_space<vmem>>, vector<256x128xf32>
    %47 = arith.truncf %46 : vector<256x128xf32> to vector<256x128xbf16>
    %c1 = arith.constant 1 : index
    %c0_22 = arith.constant 0 : index
    %c0_23 = arith.constant 0 : index
    %48 = vector.load %arg4[%c1, %c0_22, %c0_23] : memref<9x128x128xbf16, #tpu.memory_space<vmem>>, vector<1x128x128xbf16>
    %49 = vector.shape_cast %48 : vector<1x128x128xbf16> to vector<128x128xbf16>
    %cst_24 = arith.constant dense<0.000000e+00> : vector<256x128xf32>
    %50 = tpu.matmul %47, %49, %cst_24 {dimension_numbers = #tpu.dot_dimension_numbers<[1], [0], [0], [1], [0, 0, 1, 1], [], []>} : vector<256x128xbf16>, vector<128x128xbf16>, vector<256x128xf32> -> vector<256x128xf32>
    %51 = arith.addf %45, %50 : vector<256x128xf32>
    %c9 = arith.constant 9 : index
    %c0_25 = arith.constant 0 : index
    %52 = vector.load %arg9[%c9, %c0_25] : memref<304x128xf32, #tpu.memory_space<vmem>>, vector<256x128xf32>
    %53 = vector.broadcast %24 : vector<256x1xf32> to vector<256x128xf32>
    %54 = arith.mulf %52, %53 : vector<256x128xf32>
    %55 = arith.truncf %54 : vector<256x128xf32> to vector<256x128xbf16>
    %c2 = arith.constant 2 : index
    %c0_26 = arith.constant 0 : index
    %c0_27 = arith.constant 0 : index
    %56 = vector.load %arg4[%c2, %c0_26, %c0_27] : memref<9x128x128xbf16, #tpu.memory_space<vmem>>, vector<1x128x128xbf16>
    %57 = vector.shape_cast %56 : vector<1x128x128xbf16> to vector<128x128xbf16>
    %cst_28 = arith.constant dense<0.000000e+00> : vector<256x128xf32>
    %58 = tpu.matmul %55, %57, %cst_28 {dimension_numbers = #tpu.dot_dimension_numbers<[1], [0], [0], [1], [0, 0, 1, 1], [], []>} : vector<256x128xbf16>, vector<128x128xbf16>, vector<256x128xf32> -> vector<256x128xf32>
    %59 = arith.addf %51, %58 : vector<256x128xf32>
    %c23 = arith.constant 23 : index
    %c0_29 = arith.constant 0 : index
    %60 = vector.load %arg9[%c23, %c0_29] : memref<304x128xf32, #tpu.memory_space<vmem>>, vector<256x128xf32>
    %61 = vector.broadcast %20 : vector<256x1xf32> to vector<256x128xf32>
    %62 = arith.mulf %60, %61 : vector<256x128xf32>
    %63 = arith.truncf %62 : vector<256x128xf32> to vector<256x128xbf16>
    %c3 = arith.constant 3 : index
    %c0_30 = arith.constant 0 : index
    %c0_31 = arith.constant 0 : index
    %64 = vector.load %arg4[%c3, %c0_30, %c0_31] : memref<9x128x128xbf16, #tpu.memory_space<vmem>>, vector<1x128x128xbf16>
    %65 = vector.shape_cast %64 : vector<1x128x128xbf16> to vector<128x128xbf16>
    %cst_32 = arith.constant dense<0.000000e+00> : vector<256x128xf32>
    %66 = tpu.matmul %63, %65, %cst_32 {dimension_numbers = #tpu.dot_dimension_numbers<[1], [0], [0], [1], [0, 0, 1, 1], [], []>} : vector<256x128xbf16>, vector<128x128xbf16>, vector<256x128xf32> -> vector<256x128xf32>
    %67 = arith.addf %59, %66 : vector<256x128xf32>
    %c24_33 = arith.constant 24 : index
    %c0_34 = arith.constant 0 : index
    %68 = vector.load %arg9[%c24_33, %c0_34] : memref<304x128xf32, #tpu.memory_space<vmem>>, vector<256x128xf32>
    %69 = arith.truncf %68 : vector<256x128xf32> to vector<256x128xbf16>
    %c4 = arith.constant 4 : index
    %c0_35 = arith.constant 0 : index
    %c0_36 = arith.constant 0 : index
    %70 = vector.load %arg4[%c4, %c0_35, %c0_36] : memref<9x128x128xbf16, #tpu.memory_space<vmem>>, vector<1x128x128xbf16>
    %71 = vector.shape_cast %70 : vector<1x128x128xbf16> to vector<128x128xbf16>
    %cst_37 = arith.constant dense<0.000000e+00> : vector<256x128xf32>
    %72 = tpu.matmul %69, %71, %cst_37 {dimension_numbers = #tpu.dot_dimension_numbers<[1], [0], [0], [1], [0, 0, 1, 1], [], []>} : vector<256x128xbf16>, vector<128x128xbf16>, vector<256x128xf32> -> vector<256x128xf32>
    %73 = arith.addf %67, %72 : vector<256x128xf32>
    %c25 = arith.constant 25 : index
    %c0_38 = arith.constant 0 : index
    %74 = vector.load %arg9[%c25, %c0_38] : memref<304x128xf32, #tpu.memory_space<vmem>>, vector<256x128xf32>
    %75 = vector.broadcast %24 : vector<256x1xf32> to vector<256x128xf32>
    %76 = arith.mulf %74, %75 : vector<256x128xf32>
    %77 = arith.truncf %76 : vector<256x128xf32> to vector<256x128xbf16>
    %c5 = arith.constant 5 : index
    %c0_39 = arith.constant 0 : index
    %c0_40 = arith.constant 0 : index
    %78 = vector.load %arg4[%c5, %c0_39, %c0_40] : memref<9x128x128xbf16, #tpu.memory_space<vmem>>, vector<1x128x128xbf16>
    %79 = vector.shape_cast %78 : vector<1x128x128xbf16> to vector<128x128xbf16>
    %cst_41 = arith.constant dense<0.000000e+00> : vector<256x128xf32>
    %80 = tpu.matmul %77, %79, %cst_41 {dimension_numbers = #tpu.dot_dimension_numbers<[1], [0], [0], [1], [0, 0, 1, 1], [], []>} : vector<256x128xbf16>, vector<128x128xbf16>, vector<256x128xf32> -> vector<256x128xf32>
    %81 = arith.addf %73, %80 : vector<256x128xf32>
    %c39 = arith.constant 39 : index
    %c0_42 = arith.constant 0 : index
    %82 = vector.load %arg9[%c39, %c0_42] : memref<304x128xf32, #tpu.memory_space<vmem>>, vector<256x128xf32>
    %83 = vector.broadcast %20 : vector<256x1xf32> to vector<256x128xf32>
    %84 = arith.mulf %82, %83 : vector<256x128xf32>
    %85 = arith.truncf %84 : vector<256x128xf32> to vector<256x128xbf16>
    %c6 = arith.constant 6 : index
    %c0_43 = arith.constant 0 : index
    %c0_44 = arith.constant 0 : index
    %86 = vector.load %arg4[%c6, %c0_43, %c0_44] : memref<9x128x128xbf16, #tpu.memory_space<vmem>>, vector<1x128x128xbf16>
    %87 = vector.shape_cast %86 : vector<1x128x128xbf16> to vector<128x128xbf16>
    %cst_45 = arith.constant dense<0.000000e+00> : vector<256x128xf32>
    %88 = tpu.matmul %85, %87, %cst_45 {dimension_numbers = #tpu.dot_dimension_numbers<[1], [0], [0], [1], [0, 0, 1, 1], [], []>} : vector<256x128xbf16>, vector<128x128xbf16>, vector<256x128xf32> -> vector<256x128xf32>
    %89 = arith.addf %81, %88 : vector<256x128xf32>
    %c40 = arith.constant 40 : index
    %c0_46 = arith.constant 0 : index
    %90 = vector.load %arg9[%c40, %c0_46] : memref<304x128xf32, #tpu.memory_space<vmem>>, vector<256x128xf32>
    %91 = arith.truncf %90 : vector<256x128xf32> to vector<256x128xbf16>
    %c7_47 = arith.constant 7 : index
    %c0_48 = arith.constant 0 : index
    %c0_49 = arith.constant 0 : index
    %92 = vector.load %arg4[%c7_47, %c0_48, %c0_49] : memref<9x128x128xbf16, #tpu.memory_space<vmem>>, vector<1x128x128xbf16>
    %93 = vector.shape_cast %92 : vector<1x128x128xbf16> to vector<128x128xbf16>
    %cst_50 = arith.constant dense<0.000000e+00> : vector<256x128xf32>
    %94 = tpu.matmul %91, %93, %cst_50 {dimension_numbers = #tpu.dot_dimension_numbers<[1], [0], [0], [1], [0, 0, 1, 1], [], []>} : vector<256x128xbf16>, vector<128x128xbf16>, vector<256x128xf32> -> vector<256x128xf32>
    %95 = arith.addf %89, %94 : vector<256x128xf32>
    %c41 = arith.constant 41 : index
    %c0_51 = arith.constant 0 : index
    %96 = vector.load %arg9[%c41, %c0_51] : memref<304x128xf32, #tpu.memory_space<vmem>>, vector<256x128xf32>
    %97 = vector.broadcast %24 : vector<256x1xf32> to vector<256x128xf32>
    %98 = arith.mulf %96, %97 : vector<256x128xf32>
    %99 = arith.truncf %98 : vector<256x128xf32> to vector<256x128xbf16>
    %c8_52 = arith.constant 8 : index
    %c0_53 = arith.constant 0 : index
    %c0_54 = arith.constant 0 : index
    %100 = vector.load %arg4[%c8_52, %c0_53, %c0_54] : memref<9x128x128xbf16, #tpu.memory_space<vmem>>, vector<1x128x128xbf16>
    %101 = vector.shape_cast %100 : vector<1x128x128xbf16> to vector<128x128xbf16>
    %cst_55 = arith.constant dense<0.000000e+00> : vector<256x128xf32>
    %102 = tpu.matmul %99, %101, %cst_55 {dimension_numbers = #tpu.dot_dimension_numbers<[1], [0], [0], [1], [0, 0, 1, 1], [], []>} : vector<256x128xbf16>, vector<128x128xbf16>, vector<256x128xf32> -> vector<256x128xf32>
    %103 = arith.addf %95, %102 : vector<256x128xf32>
    %c0_56 = arith.constant 0 : index
    %c0_57 = arith.constant 0 : index
    %104 = vector.load %arg5[%c0_56, %c0_57] : memref<1x128xf32, #tpu.memory_space<vmem>>, vector<1x128xf32>
    %105 = vector.broadcast %104 : vector<1x128xf32> to vector<256x128xf32>
    %106 = arith.addf %103, %105 : vector<256x128xf32>
    %cst_58 = arith.constant 0.000000e+00 : f32
    %107 = vector.broadcast %cst_58 : f32 to vector<256x128xf32>
    %108 = arith.maximumf %106, %107 : vector<256x128xf32>
    %c24_59 = arith.constant 24 : index
    %c0_60 = arith.constant 0 : index
    %109 = vector.load %arg9[%c24_59, %c0_60] : memref<304x128xf32, #tpu.memory_space<vmem>>, vector<256x128xf32>
    tpu.vector_store %arg9[%c24_59, %c0_60], %108 {strides = array<i32>} : memref<304x128xf32, #tpu.memory_space<vmem>>, vector<256x128xf32>,
    %cst_61 = arith.constant 0.000000e+00 : f32
    %110 = vector.broadcast %cst_61 : f32 to vector<256x128xf32>
    %c7_62 = arith.constant 7 : index
    %c0_63 = arith.constant 0 : index
    %111 = vector.load %arg9[%c7_62, %c0_63] : memref<304x128xf32, #tpu.memory_space<vmem>>, vector<256x128xf32>
    %112 = vector.broadcast %20 : vector<256x1xf32> to vector<256x128xf32>
    %113 = arith.mulf %111, %112 : vector<256x128xf32>
    %114 = arith.truncf %113 : vector<256x128xf32> to vector<256x128xbf16>
    %c0_64 = arith.constant 0 : index
    %c0_65 = arith.constant 0 : index
    %c0_66 = arith.constant 0 : index
    %115 = vector.load %arg6[%c0_64, %c0_65, %c0_66] : memref<9x128x128xbf16, #tpu.memory_space<vmem>>, vector<1x128x128xbf16>
    %116 = vector.shape_cast %115 : vector<1x128x128xbf16> to vector<128x128xbf16>
    %cst_67 = arith.constant dense<0.000000e+00> : vector<256x128xf32>
    %117 = tpu.matmul %114, %116, %cst_67 {dimension_numbers = #tpu.dot_dimension_numbers<[1], [0], [0], [1], [0, 0, 1, 1], [], []>} : vector<256x128xbf16>, vector<128x128xbf16>, vector<256x128xf32> -> vector<256x128xf32>
    %118 = arith.addf %110, %117 : vector<256x128xf32>
    %c8_68 = arith.constant 8 : index
    %c0_69 = arith.constant 0 : index
    %119 = vector.load %arg9[%c8_68, %c0_69] : memref<304x128xf32, #tpu.memory_space<vmem>>, vector<256x128xf32>
    %120 = arith.truncf %119 : vector<256x128xf32> to vector<256x128xbf16>
    %c1_70 = arith.constant 1 : index
    %c0_71 = arith.constant 0 : index
    %c0_72 = arith.constant 0 : index
    %121 = vector.load %arg6[%c1_70, %c0_71, %c0_72] : memref<9x128x128xbf16, #tpu.memory_space<vmem>>, vector<1x128x128xbf16>
    %122 = vector.shape_cast %121 : vector<1x128x128xbf16> to vector<128x128xbf16>
    %cst_73 = arith.constant dense<0.000000e+00> : vector<256x128xf32>
    %123 = tpu.matmul %120, %122, %cst_73 {dimension_numbers = #tpu.dot_dimension_numbers<[1], [0], [0], [1], [0, 0, 1, 1], [], []>} : vector<256x128xbf16>, vector<128x128xbf16>, vector<256x128xf32> -> vector<256x128xf32>
    %124 = arith.addf %118, %123 : vector<256x128xf32>
    %c9_74 = arith.constant 9 : index
    %c0_75 = arith.constant 0 : index
    %125 = vector.load %arg9[%c9_74, %c0_75] : memref<304x128xf32, #tpu.memory_space<vmem>>, vector<256x128xf32>
    %126 = vector.broadcast %24 : vector<256x1xf32> to vector<256x128xf32>
    %127 = arith.mulf %125, %126 : vector<256x128xf32>
    %128 = arith.truncf %127 : vector<256x128xf32> to vector<256x128xbf16>
    %c2_76 = arith.constant 2 : index
    %c0_77 = arith.constant 0 : index
    %c0_78 = arith.constant 0 : index
    %129 = vector.load %arg6[%c2_76, %c0_77, %c0_78] : memref<9x128x128xbf16, #tpu.memory_space<vmem>>, vector<1x128x128xbf16>
    %130 = vector.shape_cast %129 : vector<1x128x128xbf16> to vector<128x128xbf16>
    %cst_79 = arith.constant dense<0.000000e+00> : vector<256x128xf32>
    %131 = tpu.matmul %128, %130, %cst_79 {dimension_numbers = #tpu.dot_dimension_numbers<[1], [0], [0], [1], [0, 0, 1, 1], [], []>} : vector<256x128xbf16>, vector<128x128xbf16>, vector<256x128xf32> -> vector<256x128xf32>
    %132 = arith.addf %124, %131 : vector<256x128xf32>
    %c23_80 = arith.constant 23 : index
    %c0_81 = arith.constant 0 : index
    %133 = vector.load %arg9[%c23_80, %c0_81] : memref<304x128xf32, #tpu.memory_space<vmem>>, vector<256x128xf32>
    %134 = vector.broadcast %20 : vector<256x1xf32> to vector<256x128xf32>
    %135 = arith.mulf %133, %134 : vector<256x128xf32>
    %136 = arith.truncf %135 : vector<256x128xf32> to vector<256x128xbf16>
    %c3_82 = arith.constant 3 : index
    %c0_83 = arith.constant 0 : index
    %c0_84 = arith.constant 0 : index
    %137 = vector.load %arg6[%c3_82, %c0_83, %c0_84] : memref<9x128x128xbf16, #tpu.memory_space<vmem>>, vector<1x128x128xbf16>
    %138 = vector.shape_cast %137 : vector<1x128x128xbf16> to vector<128x128xbf16>
    %cst_85 = arith.constant dense<0.000000e+00> : vector<256x128xf32>
    %139 = tpu.matmul %136, %138, %cst_85 {dimension_numbers = #tpu.dot_dimension_numbers<[1], [0], [0], [1], [0, 0, 1, 1], [], []>} : vector<256x128xbf16>, vector<128x128xbf16>, vector<256x128xf32> -> vector<256x128xf32>
    %140 = arith.addf %132, %139 : vector<256x128xf32>
    %c24_86 = arith.constant 24 : index
    %c0_87 = arith.constant 0 : index
    %141 = vector.load %arg9[%c24_86, %c0_87] : memref<304x128xf32, #tpu.memory_space<vmem>>, vector<256x128xf32>
    %142 = arith.truncf %141 : vector<256x128xf32> to vector<256x128xbf16>
    %c4_88 = arith.constant 4 : index
    %c0_89 = arith.constant 0 : index
    %c0_90 = arith.constant 0 : index
    %143 = vector.load %arg6[%c4_88, %c0_89, %c0_90] : memref<9x128x128xbf16, #tpu.memory_space<vmem>>, vector<1x128x128xbf16>
    %144 = vector.shape_cast %143 : vector<1x128x128xbf16> to vector<128x128xbf16>
    %cst_91 = arith.constant dense<0.000000e+00> : vector<256x128xf32>
    %145 = tpu.matmul %142, %144, %cst_91 {dimension_numbers = #tpu.dot_dimension_numbers<[1], [0], [0], [1], [0, 0, 1, 1], [], []>} : vector<256x128xbf16>, vector<128x128xbf16>, vector<256x128xf32> -> vector<256x128xf32>
    %146 = arith.addf %140, %145 : vector<256x128xf32>
    %c25_92 = arith.constant 25 : index
    %c0_93 = arith.constant 0 : index
    %147 = vector.load %arg9[%c25_92, %c0_93] : memref<304x128xf32, #tpu.memory_space<vmem>>, vector<256x128xf32>
    %148 = vector.broadcast %24 : vector<256x1xf32> to vector<256x128xf32>
    %149 = arith.mulf %147, %148 : vector<256x128xf32>
    %150 = arith.truncf %149 : vector<256x128xf32> to vector<256x128xbf16>
    %c5_94 = arith.constant 5 : index
    %c0_95 = arith.constant 0 : index
    %c0_96 = arith.constant 0 : index
    %151 = vector.load %arg6[%c5_94, %c0_95, %c0_96] : memref<9x128x128xbf16, #tpu.memory_space<vmem>>, vector<1x128x128xbf16>
    %152 = vector.shape_cast %151 : vector<1x128x128xbf16> to vector<128x128xbf16>
    %cst_97 = arith.constant dense<0.000000e+00> : vector<256x128xf32>
    %153 = tpu.matmul %150, %152, %cst_97 {dimension_numbers = #tpu.dot_dimension_numbers<[1], [0], [0], [1], [0, 0, 1, 1], [], []>} : vector<256x128xbf16>, vector<128x128xbf16>, vector<256x128xf32> -> vector<256x128xf32>
    %154 = arith.addf %146, %153 : vector<256x128xf32>
    %c39_98 = arith.constant 39 : index
    %c0_99 = arith.constant 0 : index
    %155 = vector.load %arg9[%c39_98, %c0_99] : memref<304x128xf32, #tpu.memory_space<vmem>>, vector<256x128xf32>
    %156 = vector.broadcast %20 : vector<256x1xf32> to vector<256x128xf32>
    %157 = arith.mulf %155, %156 : vector<256x128xf32>
    %158 = arith.truncf %157 : vector<256x128xf32> to vector<256x128xbf16>
    %c6_100 = arith.constant 6 : index
    %c0_101 = arith.constant 0 : index
    %c0_102 = arith.constant 0 : index
    %159 = vector.load %arg6[%c6_100, %c0_101, %c0_102] : memref<9x128x128xbf16, #tpu.memory_space<vmem>>, vector<1x128x128xbf16>
    %160 = vector.shape_cast %159 : vector<1x128x128xbf16> to vector<128x128xbf16>
    %cst_103 = arith.constant dense<0.000000e+00> : vector<256x128xf32>
    %161 = tpu.matmul %158, %160, %cst_103 {dimension_numbers = #tpu.dot_dimension_numbers<[1], [0], [0], [1], [0, 0, 1, 1], [], []>} : vector<256x128xbf16>, vector<128x128xbf16>, vector<256x128xf32> -> vector<256x128xf32>
    %162 = arith.addf %154, %161 : vector<256x128xf32>
    %c40_104 = arith.constant 40 : index
    %c0_105 = arith.constant 0 : index
    %163 = vector.load %arg9[%c40_104, %c0_105] : memref<304x128xf32, #tpu.memory_space<vmem>>, vector<256x128xf32>
    %164 = arith.truncf %163 : vector<256x128xf32> to vector<256x128xbf16>
    %c7_106 = arith.constant 7 : index
    %c0_107 = arith.constant 0 : index
    %c0_108 = arith.constant 0 : index
    %165 = vector.load %arg6[%c7_106, %c0_107, %c0_108] : memref<9x128x128xbf16, #tpu.memory_space<vmem>>, vector<1x128x128xbf16>
    %166 = vector.shape_cast %165 : vector<1x128x128xbf16> to vector<128x128xbf16>
    %cst_109 = arith.constant dense<0.000000e+00> : vector<256x128xf32>
    %167 = tpu.matmul %164, %166, %cst_109 {dimension_numbers = #tpu.dot_dimension_numbers<[1], [0], [0], [1], [0, 0, 1, 1], [], []>} : vector<256x128xbf16>, vector<128x128xbf16>, vector<256x128xf32> -> vector<256x128xf32>
    %168 = arith.addf %162, %167 : vector<256x128xf32>
    %c41_110 = arith.constant 41 : index
    %c0_111 = arith.constant 0 : index
    %169 = vector.load %arg9[%c41_110, %c0_111] : memref<304x128xf32, #tpu.memory_space<vmem>>, vector<256x128xf32>
    %170 = vector.broadcast %24 : vector<256x1xf32> to vector<256x128xf32>
    %171 = arith.mulf %169, %170 : vector<256x128xf32>
    %172 = arith.truncf %171 : vector<256x128xf32> to vector<256x128xbf16>
    %c8_112 = arith.constant 8 : index
    %c0_113 = arith.constant 0 : index
    %c0_114 = arith.constant 0 : index
    %173 = vector.load %arg6[%c8_112, %c0_113, %c0_114] : memref<9x128x128xbf16, #tpu.memory_space<vmem>>, vector<1x128x128xbf16>
    %174 = vector.shape_cast %173 : vector<1x128x128xbf16> to vector<128x128xbf16>
    %cst_115 = arith.constant dense<0.000000e+00> : vector<256x128xf32>
    %175 = tpu.matmul %172, %174, %cst_115 {dimension_numbers = #tpu.dot_dimension_numbers<[1], [0], [0], [1], [0, 0, 1, 1], [], []>} : vector<256x128xbf16>, vector<128x128xbf16>, vector<256x128xf32> -> vector<256x128xf32>
    %176 = arith.addf %168, %175 : vector<256x128xf32>
    %c0_116 = arith.constant 0 : index
    %c0_117 = arith.constant 0 : index
    %177 = vector.load %arg7[%c0_116, %c0_117] : memref<1x128xf32, #tpu.memory_space<vmem>>, vector<1x128xf32>
    %178 = vector.broadcast %177 : vector<1x128xf32> to vector<256x128xf32>
    %179 = arith.addf %176, %178 : vector<256x128xf32>
    %cst_118 = arith.constant 0.000000e+00 : f32
    %180 = vector.broadcast %cst_118 : f32 to vector<256x128xf32>
    %181 = arith.maximumf %179, %180 : vector<256x128xf32>
    %c24_119 = arith.constant 24 : index
    %c0_120 = arith.constant 0 : index
    %182 = vector.load %arg9[%c24_119, %c0_120] : memref<304x128xf32, #tpu.memory_space<vmem>>, vector<256x128xf32>
    tpu.vector_store %arg9[%c24_119, %c0_120], %181 {strides = array<i32>} : memref<304x128xf32, #tpu.memory_space<vmem>>, vector<256x128xf32>,
    %c23_121 = arith.constant 23 : index
    %c0_122 = arith.constant 0 : index
    %183 = vector.load %arg9[%c23_121, %c0_122] : memref<304x128xf32, #tpu.memory_space<vmem>>, vector<256x128xf32>
    %184 = vector.broadcast %20 : vector<256x1xf32> to vector<256x128xf32>
    %185 = arith.mulf %183, %184 : vector<256x128xf32>
    %c25_123 = arith.constant 25 : index
    %c0_124 = arith.constant 0 : index
    %186 = vector.load %arg9[%c25_123, %c0_124] : memref<304x128xf32, #tpu.memory_space<vmem>>, vector<256x128xf32>
    %187 = vector.broadcast %24 : vector<256x1xf32> to vector<256x128xf32>
    %188 = arith.mulf %186, %187 : vector<256x128xf32>
    %189 = arith.maximumf %185, %188 : vector<256x128xf32>
    %190 = arith.maximumf %181, %189 : vector<256x128xf32>
    %191 = vector.shape_cast %190 : vector<256x128xf32> to vector<8x2x16x128xf32>
    %192 = vector.extract_strided_slice %191 {offsets = [0, 0, 0, 0], sizes = [8, 1, 16, 128], strides = [1, 1, 1, 1]} : vector<8x2x16x128xf32> to vector<8x1x16x128xf32>
    %193 = vector.shape_cast %192 : vector<8x1x16x128xf32> to vector<8x16x128xf32>
    %194 = vector.extract_strided_slice %191 {offsets = [0, 1, 0, 0], sizes = [8, 1, 16, 128], strides = [1, 1, 1, 1]} : vector<8x2x16x128xf32> to vector<8x1x16x128xf32>
    %195 = vector.shape_cast %194 : vector<8x1x16x128xf32> to vector<8x16x128xf32>
    %cst_125 = arith.constant 0.000000e+00 : f32
    %196 = vector.broadcast %cst_125 : f32 to vector<1x16x128xf32>
    %197 = vector.extract_strided_slice %195 {offsets = [0, 0, 0], sizes = [7, 16, 128], strides = [1, 1, 1]} : vector<8x16x128xf32> to vector<7x16x128xf32>
    %198 = tpu.concatenate %196, %197 in 0 : vector<1x16x128xf32>, vector<7x16x128xf32> -> vector<8x16x128xf32>
    %199 = arith.maximumf %195, %198 : vector<8x16x128xf32>
    %200 = arith.maximumf %193, %199 : vector<8x16x128xf32>
    %c0_126 = arith.constant 0 : index
    %c0_127 = arith.constant 0 : index
    %c0_128 = arith.constant 0 : index
    %201 = vector.load %arg10[%c0_126, %c0_127, %c0_128] : memref<8x16x128xf32, #tpu.memory_space<vmem>>, vector<8x16x128xf32>
    tpu.vector_store %arg10[%c0_126, %c0_127, %c0_128], %200 {strides = array<i32>} : memref<8x16x128xf32, #tpu.memory_space<vmem>>, vector<8x16x128xf32>,
    %c0_129 = arith.constant 0 : index
    %c0_130 = arith.constant 0 : index
    %c0_131 = arith.constant 0 : index
    %202 = tpu.strided_load %arg10[%c0_129, %c0_130, %c0_131] {strides = array<i32: 1, 2, 1>} : memref<8x16x128xf32, #tpu.memory_space<vmem>>, vector<8x8x128xf32>
    %c0_132 = arith.constant 0 : index
    %c0_133 = arith.constant 0 : index
    %c0_134 = arith.constant 0 : index
    %c0_135 = arith.constant 0 : index
    %203 = vector.load %arg8[%c0_132, %c0_133, %c0_134, %c0_135] : memref<1x8x8x128xf32, #tpu.memory_space<vmem>>, vector<1x8x8x128xf32>
    %204 = vector.shape_cast %203 : vector<1x8x8x128xf32> to vector<8x8x128xf32>
    %205 = vector.shape_cast %202 : vector<8x8x128xf32> to vector<1x8x8x128xf32>
    tpu.vector_store %arg8[%c0_132, %c0_133, %c0_134, %c0_135], %205 {strides = array<i32>} : memref<1x8x8x128xf32, #tpu.memory_space<vmem>>, vector<1x8x8x128xf32>,
    return
  }
  func.func @transform_0(%arg0: i32) -> (i32, i32, i32) {
    %c0_i32 = arith.constant 0 : i32
    %c0_i32_0 = arith.constant 0 : i32
    %c0_i32_1 = arith.constant 0 : i32
    return %arg0, %c0_i32, %c0_i32_0 : i32, i32, i32
  }
  func.func @transform_1(%arg0: i32) -> (i32, i32) {
    %c0_i32 = arith.constant 0 : i32
    %c0_i32_0 = arith.constant 0 : i32
    %c0_i32_1 = arith.constant 0 : i32
    return %c0_i32, %c0_i32_0 : i32, i32
  }
  func.func @transform_2(%arg0: i32) -> (i32, i32) {
    %c0_i32 = arith.constant 0 : i32
    %c0_i32_0 = arith.constant 0 : i32
    %c0_i32_1 = arith.constant 0 : i32
    return %c0_i32, %c0_i32_0 : i32, i32
  }
  func.func @transform_3(%arg0: i32) -> (i32, i32, i32) {
    %c0_i32 = arith.constant 0 : i32
    %c0_i32_0 = arith.constant 0 : i32
    %c0_i32_1 = arith.constant 0 : i32
    %c0_i32_2 = arith.constant 0 : i32
    return %c0_i32, %c0_i32_0, %c0_i32_1 : i32, i32, i32
  }
  func.func @transform_4(%arg0: i32) -> (i32, i32) {
    %c0_i32 = arith.constant 0 : i32
    %c0_i32_0 = arith.constant 0 : i32
    %c0_i32_1 = arith.constant 0 : i32
    return %c0_i32, %c0_i32_0 : i32, i32
  }
  func.func @transform_5(%arg0: i32) -> (i32, i32, i32) {
    %c0_i32 = arith.constant 0 : i32
    %c0_i32_0 = arith.constant 0 : i32
    %c0_i32_1 = arith.constant 0 : i32
    %c0_i32_2 = arith.constant 0 : i32
    return %c0_i32, %c0_i32_0, %c0_i32_1 : i32, i32, i32
  }
  func.func @transform_6(%arg0: i32) -> (i32, i32) {
    %c0_i32 = arith.constant 0 : i32
    %c0_i32_0 = arith.constant 0 : i32
    %c0_i32_1 = arith.constant 0 : i32
    return %c0_i32, %c0_i32_0 : i32, i32
  }
  func.func @transform_7(%arg0: i32) -> (i32, i32, i32, i32) {
    %c0_i32 = arith.constant 0 : i32
    %c0_i32_0 = arith.constant 0 : i32
    %c0_i32_1 = arith.constant 0 : i32
    %c0_i32_2 = arith.constant 0 : i32
    return %arg0, %c0_i32, %c0_i32_0, %c0_i32_1 : i32, i32, i32, i32
  }
}

</mosaic_0001>

<bundles_post_ra>
// kernel: resnet50vd_small_forward.1
= control target key start
LH: loop header
LB: loop body
LE: loop exit
PB: predicated region body
PF: predicated region fallthrough
CT: control target
= control target key end

     0   :  { %s10194_s24 = smov 0   ;;  %s12063_s0 = inlined_call_operand.vmem [shape: bf16[2,256,32], index: 0, kind: input, shape index: {}]   ;;  %s12064_s1 = inlined_call_operand.vmem [shape: bf16[32,128], index: 1, kind: input, shape index: {}]   ;;  %s12065_s2 = inlined_call_operand.vmem [shape: f32[1,128], index: 2, kind: input, shape index: {}]   ;;  %s12066_s3 = inlined_call_operand.vmem [shape: bf16[9,128,128], index: 3, kind: input, shape index: {}]   ;;  %s12067_s4 = inlined_call_operand.vmem [shape: f32[1,128], index: 4, kind: input, shape index: {}]   ;;  %s12068_s5 = inlined_call_operand.vmem [shape: bf16[9,128,128], index: 5, kind: input, shape index: {}]   ;;  %s12069_s6 = inlined_call_operand.vmem [shape: f32[1,128], index: 6, kind: input, shape index: {}]   ;;  %s12070_s7 = inlined_call_operand.vmem [shape: f32[2,8,8,128], index: 7, kind: output, shape index: {}]  }
   0x1 LB: > { %s7622_s25 = sadd.s32 4294967295, %s10150_s24   ;;  %p7626_p0 = scmp.ge.s32.totalorder %s10150_s24, 1  ;;  %s10150_s24 = sphi %s10194_s24, %s17_s24  }
   0x2   : > { %p237_p1 = scmp.lt.s32.totalorder %s10150_s24, 3 }
   0x4   : > { %p238_p2 = pnand %p7626_p0, %p237_p1 }
   0x6   : > { %241 = sbr.rel (%p238_p2) target bundleno = 1790 (0x6fe), region = 48 }
   0xd   : > { %v9979_v0 = vld [vmem:[%s12064_s1] sm:$0xff]   ;;  %p269_p3 = scmp.lt.s32.totalorder %s7622_s25, 1  ;;  %v9980_v1 = vld [vmem:[%s12064_s1 + $0x8] sm:$0xff]   ;;  %v10152_v3 = vmov 0.0   ;;  %vm1024_vm0 = vcmask 261120   ;;  %v9999_v13 = vld [vmem:[%s12066_s3 + $0x50] sm:$0xff]  }
   0xe   : > { %8554 = vmatprep.subr.bf16.mxu0 %v9979_v0  ;;  %9454 = vmatprep.subr.bf16.mxu1 %v9979_v0  ;;  %v9997_v2 = vld [vmem:[%s12066_s3 + $0x40] sm:$0xff]   ;;  %1266 = vst [vmem:[#allocation2] sm:$0xff] %v10152_v3  ;;  %1267 = vst [vmem:[#allocation2 + $0x8] sm:$0xff] %v10152_v3  ;;  %v9998_v7 = vld [vmem:[%s12066_s3 + $0x48] sm:$0xff]   ;;  %v10153_v27 = vmov 0.0|0.0  }
   0xf   : > { %s12337_s25 = smov (!%p269_p3, %s7622_s25), 1  ;;  %8555 = vmatpush3.bf16.msra.mxu0 %v9979_v0  ;;  %9456 = vmatpush3.bf16.msra.mxu1 %v9979_v0  ;;  %1268 = vst [vmem:[#allocation2 + $0x10] sm:$0xff] %v10152_v3  ;;  %1301 = vst [vmem:[#allocation2 + $0x118] sm:$0xff] %v10152_v3  ;;  %v10000_v15 = vld [vmem:[%s12066_s3 + $0x58] sm:$0xff]   ;;  %v10001_v23 = vld [vmem:[%s12066_s3 + $0x60] sm:$0xff]  }
  0x10   : > { %8556 = vmatprep.subr.bf16.mxu0 %v9980_v1  ;;  %s8102_s30 = sshll.u32 %s12337_s25, 7  ;;  %9455 = vmatprep.subr.bf16.mxu1 %v9980_v1  ;;  %1302 = vst [vmem:[#allocation2 + $0x120] sm:$0xff] %v10152_v3  ;;  %1303 = vst [vmem:[#allocation2 + $0x128] sm:$0xff] %v10152_v3  ;;  %v10002_v24 = vld [vmem:[%s12066_s3 + $0x68] sm:$0xff]   ;;  %v10003_v25 = vld [vmem:[%s12066_s3 + $0x70] sm:$0xff]   ;;  %s8103_s11 = sshll.u32 %s12337_s25, 6 }
  0x11   : > { %s10217_s12 = scalar_lea.vmem %s12063_s0, %s8102_s30  ;;  %v10004_v26 = vld [vmem:[%s12066_s3 + $0x78] sm:$0xff]   ;;  %v10005_v28 = vld [vmem:[%s12066_s3] sm:$0xff]   ;;  %v10006_v51 = vld [vmem:[%s12066_s3 + $0x8] sm:$0xff]   ;;  %s11897_s13 = scalar_lea.vmem %s12070_s7, %s8103_s11 }
  0x12   : > { %v9981_v4 = vld [vmem:[%s10217_s12] sm:$0xff]   ;;  %v9982_v5 = vld [vmem:[%s10217_s12 + $0x8] sm:$0xff]   ;;  %v9983_v6 = vld [vmem:[%s10217_s12 + $0x10] sm:$0xff]  }
  0x13   : > { %8557 = vmatpush3.bf16.msra.mxu0 %v9980_v1  ;;  %9457 = vmatpush3.bf16.msra.mxu1 %v9980_v1  ;;  %v9987_v8 = vld [vmem:[%s10217_s12 + $0x40] sm:$0xff]   ;;  %v9988_v9 = vld [vmem:[%s10217_s12 + $0x48] sm:$0xff]   ;;  %v9984_v10 = vld [vmem:[%s10217_s12 + $0x18] sm:$0xff]  }
  0x14   : > { %8558 = vmatprep.mubr.msk.bf16.mxu0 %vm1024_vm0, %v9981_v4  ;;  %8590 = vmatprep.subr.bf16.mxu1 %v9997_v2  ;;  %v9985_v11 = vld [vmem:[%s10217_s12 + $0x20] sm:$0xff]   ;;  %v9991_v12 = vld [vmem:[%s10217_s12 + $0x50] sm:$0xff]   ;;  %v9992_v14 = vld [vmem:[%s10217_s12 + $0x58] sm:$0xff]  }
  0x15   : > { %8574 = vmatprep.mubr.msk.bf16.mxu1 %vm1024_vm0, %v9987_v8  ;;  %v9986_v16 = vld [vmem:[%s10217_s12 + $0x28] sm:$0xff]   ;;  %v9993_v17 = vld [vmem:[%s10217_s12 + $0x60] sm:$0xff]   ;;  %v9989_v18 = vld [vmem:[%s10217_s12 + $0x30] sm:$0xff]  }
  0x16   : > { %8559 = vmatmul.mubr.msk.bf16.vlgmr.msra.gmra.mrb[0].mxu0 %vm1024_vm0, %v9982_v5  ;;  %8575 = vmatmul.mubr.msk.bf16.vlgmr.msra.gmra.mrb[0].mxu1 %vm1024_vm0, %v9988_v9  ;;  %v9994_v19 = vld [vmem:[%s10217_s12 + $0x68] sm:$0xff]   ;;  %v9995_v20 = vld [vmem:[%s10217_s12 + $0x70] sm:$0xff]   ;;  %v9990_v21 = vld [vmem:[%s10217_s12 + $0x38] sm:$0xff]  }
  0x17   : > { %8562 = vmatprep.mubr.msk.bf16.mxu0 %vm1024_vm0, %v9983_v6  ;;  %8591 = vmatpush3.bf16.msra.mxu1 %v9997_v2  ;;  %v9996_v22 = vld [vmem:[%s10217_s12 + $0x78] sm:$0xff]   ;;  %v10278_v29 = vld [vmem:[%s12065_s2] ss:$0 sm:$0xff]  ;;  %v10007_v3 = vld [vmem:[%s12066_s3 + $0x10] sm:$0xff]  }
  0x18   : > { %8592 = vmatprep.subr.bf16.mxu1 %v9998_v7  ;;  %8578 = vmatprep.mubr.msk.bf16.mxu1 %vm1024_vm0, %v9991_v12 }
  0x1b   : > { %8593 = vmatpush3.bf16.msra.mxu1 %v9998_v7 }
  0x1c   : > { %8594 = vmatprep.subr.bf16.mxu1 %v9999_v13 }
  0x1e   : > { %8563 = vmatmul.mubr.msk.bf16.gmra.mrb[4].mxu0 %vm1024_vm0, %v9984_v10  ;;  %8579 = vmatmul.mubr.msk.bf16.gmra.mrb[4].mxu1 %vm1024_vm0, %v9992_v14 }
  0x1f   : > { %8566 = vmatprep.mubr.msk.bf16.mxu0 %vm1024_vm0, %v9985_v11  ;;  %8582 = vmatprep.mubr.msk.bf16.mxu1 %vm1024_vm0, %v9993_v17 }
  0x20   : > { %8595 = vmatpush3.bf16.msra.mxu1 %v9999_v13 }
  0x21   : > { %8596 = vmatprep.subr.bf16.mxu1 %v10000_v15 }
  0x24   : > { %8597 = vmatpush3.bf16.msra.mxu1 %v10000_v15 }
  0x25   : > { %8598 = vmatprep.subr.bf16.mxu1 %v10001_v23 }
  0x26   : > { %8567 = vmatmul.mubr.msk.bf16.gmra.mrb[8].mxu0 %vm1024_vm0, %v9986_v16  ;;  %8583 = vmatmul.mubr.msk.bf16.gmra.mrb[8].mxu1 %vm1024_vm0, %v9994_v19  ;;  %v10008_v19 = vld [vmem:[%s12066_s3 + $0x18] sm:$0xff]  }
  0x27   : > { %8570 = vmatprep.mubr.msk.bf16.mxu0 %vm1024_vm0, %v9989_v18  ;;  %8586 = vmatprep.mubr.msk.bf16.mxu1 %vm1024_vm0, %v9995_v20 }
  0x28   : > { %8599 = vmatpush3.bf16.msra.mxu1 %v10001_v23 }
  0x29   : > { %8600 = vmatprep.subr.bf16.mxu1 %v10002_v24 }
  0x2c   : > { %8601 = vmatpush3.bf16.msra.mxu1 %v10002_v24 }
  0x2d   : > { %8602 = vmatprep.subr.bf16.mxu1 %v10003_v25 }
  0x2e   : > { %8571 = vmatmul.mubr.msk.bf16.gmra.mrb[12].mxu0 %vm1024_vm0, %v9990_v21  ;;  %8587 = vmatmul.mubr.msk.bf16.gmra.mrb[12].mxu1 %vm1024_vm0, %v9996_v22 }
  0x2f   : > { %8606 = vmatprep.mubr.bf16.mxu1 %v10153_v27 }
  0x30   : > { %8603 = vmatpush3.bf16.msra.mxu1 %v10003_v25 }
  0x31   : > { %8604 = vmatprep.subr.bf16.mxu1 %v10004_v26 }
  0x34   : > { %8605 = vmatpush3.bf16.msra.mxu1 %v10004_v26 }
  0x35   : > { %8638 = vmatprep.subr.bf16.mxu1 %v10005_v28 }
  0xe9   : > { %v8560_v30 = vpop.f32.mrb[0].mxu0  ;;  %v8576_v41 = vpop.f32.mrb[0].mxu1 }
  0xea   : > { %v1116_v31 = vadd.f32 %v8560_v30, %v10278_v29  ;;  %v1107_v32 = vpop.f32.mrb[1].mxu0  ;;  %v1180_v43 = vadd.f32 %v8576_v41, %v10278_v29  ;;  %v1171_v44 = vpop.f32.mrb[1].mxu1 }
  0xeb   : > { %v1108_v33 = vadd.f32 %v10278_v29, %v1107_v32  ;;  %v8561_v34 = vpop.f32.mrb[2].mxu0  ;;  %v1172_v46 = vadd.f32 %v10278_v29, %v1171_v44  ;;  %v8577_v47 = vpop.f32.mrb[2].mxu1 }
  0xec   : > { %v1236_v35 = vmax.f32 %v1116_v31, 0.0  ;;  %v1119_v36 = vadd.f32 %v8561_v34, %v10278_v29  ;;  %v1110_v37 = vpop.f32.mrb[3].mxu0  ;;  %v1252_v50 = vmax.f32 %v1180_v43, 0.0  ;;  %v1183_v52 = vadd.f32 %v8577_v47, %v10278_v29  ;;  %v1174_v53 = vpop.f32.mrb[3].mxu1  ;;  %v10009_v34 = vld [vmem:[%s12066_s3 + $0x20] sm:$0xff]  }
  0xed   : > { %v1234_v38 = vmax.f32 %v1108_v33, 0.0  ;;  %v1111_v39 = vadd.f32 %v10278_v29, %v1110_v37  ;;  %v1250_v56 = vmax.f32 %v1172_v46, 0.0  ;;  %v1175_v57 = vadd.f32 %v10278_v29, %v1174_v53 }
  0xee   : > { %1306 = vst [vmem:[#allocation2 + $0x28] sm:$0xff] %v1236_v35  ;;  %v1237_v40 = vmax.f32 %v1119_v36, 0.0  ;;  %1322 = vst [vmem:[#allocation2 + $0xa8] sm:$0xff] %v1252_v50  ;;  %v1253_v60 = vmax.f32 %v1183_v52, 0.0 }
  0xef   : > { %1304 = vst [vmem:[#allocation2 + $0x18] sm:$0xff] %v1234_v38  ;;  %v1235_v42 = vmax.f32 %v1111_v39, 0.0  ;;  %1320 = vst [vmem:[#allocation2 + $0x98] sm:$0xff] %v1250_v56  ;;  %v1251_v0 = vmax.f32 %v1175_v57, 0.0 }
  0xf0   : > { %1307 = vst [vmem:[#allocation2 + $0x30] sm:$0xff] %v1237_v40  ;;  %v1466_v45 = vpack.c.bf16 %v1237_v40, %v1236_v35  ;;  %1323 = vst [vmem:[#allocation2 + $0xb0] sm:$0xff] %v1253_v60  ;;  %v10298_v4 = vpack.c.bf16 %v1253_v60, %v1252_v50  ;;  %v10010_v50 = vld [vmem:[%s12066_s3 + $0x28] sm:$0xff]  }
  0xf1   : > { %1305 = vst [vmem:[#allocation2 + $0x20] sm:$0xff] %v1235_v42  ;;  %v8564_v48 = vpop.f32.mrb[4].mxu0  ;;  %v1465_v49 = vpack.c.bf16 %v1235_v42, %v1234_v38  ;;  %1321 = vst [vmem:[#allocation2 + $0xa0] sm:$0xff] %v1251_v0  ;;  %v8580_v6 = vpop.f32.mrb[4].mxu1  ;;  %v10300_v7 = vpack.c.bf16 %v1251_v0, %v1250_v56  ;;  %v10011_v0 = vld [vmem:[%s12066_s3 + $0x30] sm:$0xff]  }
  0xf2   : > { %v1132_v54 = vadd.f32 %v8564_v48, %v10278_v29  ;;  %v1123_v55 = vpop.f32.mrb[5].mxu0  ;;  %v1196_v9 = vadd.f32 %v8580_v6, %v10278_v29  ;;  %v1187_v10 = vpop.f32.mrb[5].mxu1 }
  0xf3   : > { %v1124_v58 = vadd.f32 %v10278_v29, %v1123_v55  ;;  %v8565_v59 = vpop.f32.mrb[6].mxu0  ;;  %8607 = vmatmul.mubr.bf16.vlgmr.msra.gmra.mrb[16].mxu1 %v1465_v49  ;;  %v1188_v12 = vadd.f32 %v10278_v29, %v1187_v10  ;;  %v8581_v13 = vpop.f32.mrb[6].mxu1 }
  0xf4   : > { %v1240_v61 = vmax.f32 %v1132_v54, 0.0  ;;  %v1135_v62 = vadd.f32 %v8565_v59, %v10278_v29  ;;  %v1126_v63 = vpop.f32.mrb[7].mxu0  ;;  %8639 = vmatpush3.bf16.msra.mxu1 %v10005_v28  ;;  %8610 = vmatprep.mubr.bf16.mxu1 %v1466_v45  ;;  %v1256_v16 = vmax.f32 %v1196_v9, 0.0  ;;  %v1199_v17 = vadd.f32 %v8581_v13, %v10278_v29  ;;  %v1190_v18 = vpop.f32.mrb[7].mxu1 }
  0xf5   : > { %v1238_v1 = vmax.f32 %v1124_v58, 0.0  ;;  %v1127_v2 = vadd.f32 %v10278_v29, %v1126_v63  ;;  %8640 = vmatprep.subr.bf16.mxu1 %v10006_v51  ;;  %v1254_v22 = vmax.f32 %v1188_v12, 0.0  ;;  %v1191_v23 = vadd.f32 %v10278_v29, %v1190_v18 }
  0xf6   : > { %1310 = vst [vmem:[#allocation2 + $0x48] sm:$0xff] %v1240_v61  ;;  %v1241_v5 = vmax.f32 %v1135_v62, 0.0  ;;  %1326 = vst [vmem:[#allocation2 + $0xc8] sm:$0xff] %v1256_v16  ;;  %v1257_v26 = vmax.f32 %v1199_v17, 0.0  ;;  %v10012_v17 = vld [vmem:[%s12066_s3 + $0x38] sm:$0xff]  }
  0xf7   : > { %1308 = vst [vmem:[#allocation2 + $0x38] sm:$0xff] %v1238_v1  ;;  %v1239_v8 = vmax.f32 %v1127_v2, 0.0  ;;  %1324 = vst [vmem:[#allocation2 + $0xb8] sm:$0xff] %v1254_v22  ;;  %v1255_v31 = vmax.f32 %v1191_v23, 0.0 }
  0xf8   : > { %1311 = vst [vmem:[#allocation2 + $0x50] sm:$0xff] %v1241_v5  ;;  %8641 = vmatpush3.bf16.msra.mxu1 %v10006_v51  ;;  %v1468_v11 = vpack.c.bf16 %v1241_v5, %v1240_v61  ;;  %1327 = vst [vmem:[#allocation2 + $0xd0] sm:$0xff] %v1257_v26  ;;  %v10316_v35 = vpack.c.bf16 %v1257_v26, %v1256_v16 }
  0xf9   : > { %1309 = vst [vmem:[#allocation2 + $0x40] sm:$0xff] %v1239_v8  ;;  %v8568_v14 = vpop.f32.mrb[8].mxu0  ;;  %v1467_v15 = vpack.c.bf16 %v1239_v8, %v1238_v1  ;;  %8642 = vmatprep.subr.bf16.mxu1 %v10007_v3  ;;  %1325 = vst [vmem:[#allocation2 + $0xc0] sm:$0xff] %v1255_v31  ;;  %v8584_v37 = vpop.f32.mrb[8].mxu1  ;;  %v10318_v38 = vpack.c.bf16 %v1255_v31, %v1254_v22  ;;  %v10013_v22 = vld [vmem:[%s12066_s3 + $0x80] sm:$0xff]  }
  0xfa   : > { %v1148_v20 = vadd.f32 %v8568_v14, %v10278_v29  ;;  %v1139_v21 = vpop.f32.mrb[9].mxu0  ;;  %v1212_v40 = vadd.f32 %v8584_v37, %v10278_v29  ;;  %v1203_v41 = vpop.f32.mrb[9].mxu1 }
  0xfb   : > { %v1140_v24 = vadd.f32 %v10278_v29, %v1139_v21  ;;  %v8569_v25 = vpop.f32.mrb[10].mxu0  ;;  %8611 = vmatmul.mubr.bf16.gmra.mrb[20].mxu1 %v1467_v15  ;;  %v1204_v43 = vadd.f32 %v10278_v29, %v1203_v41  ;;  %v8585_v44 = vpop.f32.mrb[10].mxu1 }
  0xfc   : > { %v1244_v27 = vmax.f32 %v1148_v20, 0.0  ;;  %v1151_v28 = vadd.f32 %v8569_v25, %v10278_v29  ;;  %v1142_v30 = vpop.f32.mrb[11].mxu0  ;;  %8614 = vmatprep.mubr.bf16.mxu1 %v1468_v11  ;;  %8643 = vmatpush3.bf16.msra.mxu1 %v10007_v3  ;;  %v1260_v47 = vmax.f32 %v1212_v40, 0.0  ;;  %v1215_v48 = vadd.f32 %v8585_v44, %v10278_v29  ;;  %v1206_v49 = vpop.f32.mrb[11].mxu1  ;;  %v10369_v40 = vld [vmem:[#allocation2 + $0x27] sm:$0xff]  ;;  %v10373_v44 = vld [vmem:[#allocation2 + $0x1f] sm:$0xff] }
  0xfd   : > { %v1242_v32 = vmax.f32 %v1140_v24, 0.0  ;;  %v1143_v33 = vadd.f32 %v10278_v29, %v1142_v30  ;;  %8644 = vmatprep.subr.bf16.mxu1 %v10008_v19  ;;  %v1258_v53 = vmax.f32 %v1204_v43, 0.0  ;;  %v1207_v54 = vadd.f32 %v10278_v29, %v1206_v49  ;;  %v10353_v30 = vld [vmem:[#allocation2] sm:$0xff]  ;;  %v10380_v49 = vld [vmem:[#allocation2 + $0x2f] sm:$0xff] }
  0xfe   : > { %1314 = vst [vmem:[#allocation2 + $0x68] sm:$0xff] %v1244_v27  ;;  %v1245_v36 = vmax.f32 %v1151_v28, 0.0  ;;  %1330 = vst [vmem:[#allocation2 + $0xe8] sm:$0xff] %v1260_v47  ;;  %v1261_v57 = vmax.f32 %v1215_v48, 0.0  ;;  %v1336_v28 = vld [vmem:[#allocation2 + $0x7] sm:$0xff] }
  0xff   : > { %1312 = vst [vmem:[#allocation2 + $0x58] sm:$0xff] %v1242_v32  ;;  %v1243_v39 = vmax.f32 %v1143_v33, 0.0  ;;  %1328 = vst [vmem:[#allocation2 + $0xd8] sm:$0xff] %v1258_v53  ;;  %v1259_v61 = vmax.f32 %v1207_v54, 0.0  ;;  %v1337_v33 = vld [vmem:[#allocation2 + $0xf] sm:$0xff] }
 0x100   : > { %1315 = vst [vmem:[#allocation2 + $0x70] sm:$0xff] %v1245_v36  ;;  %v1470_v42 = vpack.c.bf16 %v1245_v36, %v1244_v27  ;;  %8645 = vmatpush3.bf16.msra.mxu1 %v10008_v19  ;;  %1331 = vst [vmem:[#allocation2 + $0xf0] sm:$0xff] %v1261_v57  ;;  %v1478_v1 = vpack.c.bf16 %v1261_v57, %v1260_v47 }
 0x101   : > { %1313 = vst [vmem:[#allocation2 + $0x60] sm:$0xff] %v1243_v39  ;;  %v8572_v45 = vpop.f32.mrb[12].mxu0  ;;  %v1469_v46 = vpack.c.bf16 %v1243_v39, %v1242_v32  ;;  %8646 = vmatprep.subr.bf16.mxu1 %v10009_v34  ;;  %1329 = vst [vmem:[#allocation2 + $0xe0] sm:$0xff] %v1259_v61  ;;  %v8588_v3 = vpop.f32.mrb[12].mxu1  ;;  %v1477_v5 = vpack.c.bf16 %v1259_v61, %v1258_v53  ;;  %v10389_v53 = vld [vmem:[#allocation2 + $0x37] sm:$0xff] }
 0x102   : > { %v1164_v51 = vadd.f32 %v8572_v45, %v10278_v29  ;;  %v1155_v52 = vpop.f32.mrb[13].mxu0  ;;  %v1228_v8 = vadd.f32 %v8588_v3, %v10278_v29  ;;  %v1219_v9 = vpop.f32.mrb[13].mxu1 }
 0x103   : > { %v1156_v55 = vadd.f32 %v10278_v29, %v1155_v52  ;;  %v8573_v56 = vpop.f32.mrb[14].mxu0  ;;  %8615 = vmatmul.mubr.bf16.gmra.mrb[24].mxu1 %v1469_v46  ;;  %v1220_v11 = vadd.f32 %v10278_v29, %v1219_v9  ;;  %v8589_v12 = vpop.f32.mrb[14].mxu1 }
 0x104   : > { %v1248_v58 = vmax.f32 %v1164_v51, 0.0  ;;  %v1167_v59 = vadd.f32 %v8573_v56, %v10278_v29  ;;  %v1158_v60 = vpop.f32.mrb[15].mxu0  ;;  %8618 = vmatprep.mubr.bf16.mxu1 %v1470_v42  ;;  %8647 = vmatpush3.bf16.msra.mxu1 %v10009_v34  ;;  %v1264_v14 = vmax.f32 %v1228_v8, 0.0  ;;  %v1231_v15 = vadd.f32 %v8589_v12, %v10278_v29  ;;  %v1222_v16 = vpop.f32.mrb[15].mxu1 }
 0x105   : > { %v1246_v62 = vmax.f32 %v1156_v55, 0.0  ;;  %v1159_v63 = vadd.f32 %v10278_v29, %v1158_v60  ;;  %8648 = vmatprep.subr.bf16.mxu1 %v10010_v50  ;;  %v1262_v18 = vmax.f32 %v1220_v11, 0.0  ;;  %v1223_v19 = vadd.f32 %v10278_v29, %v1222_v16  ;;  %v10394_v55 = vld [vmem:[#allocation2 + $0x47] sm:$0xff]  ;;  %v10401_v60 = vld [vmem:[#allocation2 + $0x3f] sm:$0xff] }
 0x106   : > { %1318 = vst [vmem:[#allocation2 + $0x88] sm:$0xff] %v1248_v58  ;;  %v1249_v2 = vmax.f32 %v1167_v59, 0.0  ;;  %1334 = vst [vmem:[#allocation2 + $0x108] sm:$0xff] %v1264_v14  ;;  %v1265_v20 = vmax.f32 %v1231_v15, 0.0  ;;  %v280_v29 = vlaneseq  ;;  %v10015_v59 = vld [vmem:[%s12066_s3 + $0x90] sm:$0xff]  }
 0x107   : > { %1316 = vst [vmem:[#allocation2 + $0x78] sm:$0xff] %v1246_v62  ;;  %v1247_v6 = vmax.f32 %v1159_v63, 0.0  ;;  %1332 = vst [vmem:[#allocation2 + $0xf8] sm:$0xff] %v1262_v18  ;;  %v1263_v21 = vmax.f32 %v1223_v19, 0.0  ;;  %v10436_v19 = vld [vmem:[#allocation2 + $0x6f] sm:$0xff] }
 0x108   : > { %1319 = vst [vmem:[#allocation2 + $0x90] sm:$0xff] %v1249_v2  ;;  %v1472_v10 = vpack.c.bf16 %v1249_v2, %v1248_v58  ;;  %8649 = vmatpush3.bf16.msra.mxu1 %v10010_v50  ;;  %1335 = vst [vmem:[#allocation2 + $0x110] sm:$0xff] %v1265_v20  ;;  %v10346_v24 = vshrl.u32 %v280_v29, 7  ;;  %v10014_v50 = vld [vmem:[%s12066_s3 + $0x88] sm:$0xff]   ;;  %v10016_v2 = vld [vmem:[%s12066_s3 + $0x98] sm:$0xff]  }
 0x109   : > { %1317 = vst [vmem:[#allocation2 + $0x80] sm:$0xff] %v1247_v6  ;;  %v1471_v13 = vpack.c.bf16 %v1247_v6, %v1246_v62  ;;  %8650 = vmatprep.subr.bf16.mxu1 %v10011_v0  ;;  %1333 = vst [vmem:[#allocation2 + $0x100] sm:$0xff] %v1263_v21  ;;  %v1479_v23 = vpack.c.bf16 %v1263_v21, %v1262_v18  ;;  %v10417_v6 = vld [vmem:[#allocation2 + $0x57] sm:$0xff]  ;;  %v10422_v9 = vld [vmem:[#allocation2 + $0x67] sm:$0xff] }
 0x10a   : > { %v317_v25 = vand.u32 15, %v10346_v24  ;;  %v283_v26 = vadd.s32 16, %v10346_v24  ;;  %v285_v27 = vadd.s32 32, %v10346_v24  ;;  %v287_v34 = vadd.s32 48, %v10346_v24  ;;  %v10429_v14 = vld [vmem:[#allocation2 + $0x5f] sm:$0xff]  ;;  %v10018_v20 = vld [vmem:[%s12066_s3 + $0xa8] sm:$0xff]  }
 0x10b   : > { %8619 = vmatmul.mubr.bf16.gmra.mrb[28].mxu1 %v1471_v13  ;;  %v289_v36 = vadd.s32 64, %v10346_v24  ;;  %v291_v46 = vadd.s32 80, %v10346_v24  ;;  %v293_v47 = vadd.s32 96, %v10346_v24  ;;  %v295_v62 = vadd.s32 112, %v10346_v24  ;;  %v10017_v13 = vld [vmem:[%s12066_s3 + $0xa0] sm:$0xff]  }
 0x10c   : > { %8622 = vmatprep.mubr.bf16.mxu1 %v1472_v10  ;;  %8651 = vmatpush3.bf16.msra.mxu1 %v10011_v0  ;;  %vm697_vm1 = vcmp.ne.s32.totalorder %v317_v25, 0  ;;  %v345_v32 = vand.u32 15, %v285_v27  ;;  %v359_v41 = vand.u32 15, %v287_v34  ;;  %v297_v63 = vadd.s32 128, %v10346_v24 }
 0x10d   : > { %8652 = vmatprep.subr.bf16.mxu1 %v10012_v17  ;;  %v373_v42 = vand.u32 15, %v289_v36  ;;  %v387_v56 = vand.u32 15, %v291_v46  ;;  %v401_v57 = vand.u32 15, %v293_v47  ;;  %v415_v10 = vand.u32 15, %v295_v62  ;;  %v10478_v47 = vld [vmem:[#allocation2 + $0xa7] sm:$0xff] }
 0x10e   : > { %vm701_vm3 = vcmp.ne.s32.totalorder %v345_v32, 0  ;;  %vm703_vm4 = vcmp.ne.s32.totalorder %v359_v41, 0  ;;  %v429_v11 = vand.u32 15, %v297_v63  ;;  %v299_v16 = vadd.s32 144, %v10346_v24  ;;  %v10020_v41 = vld [vmem:[%s12066_s3 + $0xb8] sm:$0xff]  }
 0x10f   : > { %v10367_v39 = vsel %vm701_vm3, 1.0, %v10353_v30  ;;  %vm705_vm5 = vcmp.ne.s32.totalorder %v373_v42, 0  ;;  %v10387_v52 = vsel %vm703_vm4, 1.0, %v10353_v30  ;;  %vm707_vm6 = vcmp.ne.s32.totalorder %v387_v56, 0  ;;  %v10464_v36 = vld [vmem:[#allocation2 + $0x8f] sm:$0xff]  ;;  %v10485_v56 = vld [vmem:[%s12066_s3 + $0xc0] sm:$0xff]  }
 0x110   : > { %8653 = vmatpush3.bf16.msra.mxu1 %v10012_v17  ;;  %v1372_v45 = vmul.f32 %v10367_v39, %v10369_v40  ;;  %v10392_v54 = vsel %vm705_vm5, 1.0, %v10353_v30  ;;  %v1374_v58 = vmul.f32 %v10387_v52, %v10389_v53  ;;  %vm709_vm7 = vcmp.ne.s32.totalorder %v401_v57, 0  ;;  %v10450_v25 = vld [vmem:[#allocation2 + $0x87] sm:$0xff]  ;;  %v10487_v57 = vld [vmem:[#allocation2 + $0x9f] sm:$0xff] }
 0x111   : > { %8686 = vmatprep.subr.bf16.mxu1 %v10013_v22  ;;  %v1376_v61 = vmul.f32 %v10392_v54, %v10394_v55  ;;  %v10420_v8 = vsel %vm709_vm7, 1.0, %v10353_v30  ;;  %vm711_vm8 = vcmp.ne.s32.totalorder %v415_v10, 0  ;;  %vm713_vm9 = vcmp.ne.s32.totalorder %v429_v11, 0  ;;  %v10506_v11 = vld [vmem:[#allocation2 + $0xc7] sm:$0xff] }
 0x112   : > { %v1402_v51 = vpack.c.bf16 %v10380_v49, %v1372_v45  ;;  %v1403_v0 = vpack.c.bf16 %v10401_v60, %v1374_v58  ;;  %v1380_v15 = vmul.f32 %v10420_v8, %v10422_v9  ;;  %v301_v17 = vadd.s32 160, %v10346_v24  ;;  %v10473_v45 = vld [vmem:[#allocation2 + $0x97] sm:$0xff] }
 0x113   : > { %8623 = vmatmul.mubr.bf16.gmra.mrb[32].mxu1 %v10300_v7  ;;  %v331_v7 = vand.u32 15, %v283_v26  ;;  %v10448_v29 = vsel %vm713_vm9, 1.0, %v10353_v30  ;;  %v443_v26 = vand.u32 15, %v299_v16  ;;  %v305_v34 = vadd.s32 192, %v10346_v24  ;;  %v10510_v16 = vld [vmem:[#allocation2 + $0xbf] sm:$0xff] }
 0x114   : > { %8626 = vmatprep.mubr.bf16.mxu1 %v10298_v4  ;;  %v10356_v4 = vsel %vm697_vm1, 1.0, %v10353_v30  ;;  %v1406_v21 = vpack.c.bf16 %v10436_v19, %v1380_v15  ;;  %12181 = vst [vmem:[#allocation5_spill] sm:$0xff] %v10448_v29  ;;  %v457_v27 = vand.u32 15, %v301_v17  ;;  %v1384_v32 = vmul.f32 %v10448_v29, %v10450_v25 }
 0x115   : > { %12180 = vst [vmem:[#allocation4_spill] sm:$0xff] %v10356_v4  ;;  %v1368_v31 = vmul.f32 %v10356_v4, %v1336_v28  ;;  %vm699_vm2 = vcmp.ne.s32.totalorder %v331_v7, 0  ;;  %v10019_v7 = vld [vmem:[%s12066_s3 + $0xb0] sm:$0xff]   ;;  %vm715_vm10 = vcmp.ne.s32.totalorder %v443_v26, 0  ;;  %v309_v62 = vadd.s32 224, %v10346_v24 }
 0x116   : > { %v10362_v37 = vsel %vm699_vm2, 1.0, %v10353_v30  ;;  %vm717_vm11 = vcmp.ne.s32.totalorder %v457_v27, 0  ;;  %v1408_v42 = vpack.c.bf16 %v10464_v36, %v1384_v32 }
 0x117   : > { %v10476_v46 = vsel %vm717_vm11, 1.0, %v10353_v30 }
 0x118   : > { %v1388_v58 = vmul.f32 %v10476_v46, %v10478_v47 }
 0x11b   : > { %8627 = vmatmul.mubr.bf16.gmra.mrb[36].mxu1 %v10318_v38  ;;  %v10364_v38 = vld [vmem:[#allocation2 + $0x17] sm:$0xff] }
 0x11c   : > { %8630 = vmatprep.mubr.bf16.mxu1 %v10316_v35  ;;  %v1400_v35 = vpack.c.bf16 %v1337_v33, %v1368_v31  ;;  %v1370_v43 = vmul.f32 %v10362_v37, %v10364_v38  ;;  %v10457_v31 = vld [vmem:[#allocation2 + $0x7f] sm:$0xff]  ;;  %v303_v33 = vadd.s32 176, %v10346_v24 }
 0x11e   : > { %v1401_v48 = vpack.c.bf16 %v10373_v44, %v1370_v43  ;;  %v10471_v43 = vsel %vm715_vm10, 1.0, %v10353_v30 }
 0x11f   : > { %12182 = vst [vmem:[#allocation6_spill] sm:$0xff] %v10471_v43 }
 0x123   : > { %8631 = vmatmul.mubr.bf16.gmra.mrb[40].mxu1 %v1477_v5  ;;  %v10415_v5 = vsel %vm707_vm6, 1.0, %v10353_v30 }
 0x124   : > { %8634 = vmatprep.mubr.bf16.mxu1 %v1478_v1  ;;  %v10408_v1 = vld [vmem:[#allocation2 + $0x4f] sm:$0xff]  ;;  %v1378_v12 = vmul.f32 %v10415_v5, %v10417_v6 }
 0x125   : > { %v1404_v3 = vpack.c.bf16 %v10408_v1, %v1376_v61  ;;  %v307_v61 = vadd.s32 208, %v10346_v24 }
 0x126   : > { %v1405_v18 = vpack.c.bf16 %v10429_v14, %v1378_v12 }
 0x127   : > { %v499_v12 = vand.u32 15, %v307_v61 }
 0x129   : > { %vm723_vm14 = vcmp.ne.s32.totalorder %v499_v12, 0 }
 0x12b   : > { %8635 = vmatmul.mubr.bf16.gmra.mrb[44].mxu1 %v1479_v23  ;;  %v10445_v23 = vld [vmem:[#allocation2 + $0x77] sm:$0xff] }
 0x12c   : > { %8654 = vmatprep.mubr.bf16.mxu1 %v1400_v35 }
 0x133   : > { %8655 = vmatmul.mubr.bf16.vlgmr.msra.gmra.mrb[16].mxu1 %v1401_v48  ;;  %v471_v48 = vand.u32 15, %v303_v33  ;;  %v10528_v33 = vld [vmem:[#allocation2 + $0xe7] sm:$0xff] }
 0x134   : > { %8687 = vmatpush3.bf16.msra.mxu1 %v10013_v22  ;;  %8658 = vmatprep.mubr.bf16.mxu1 %v1402_v51  ;;  %v10443_v22 = vsel %vm711_vm8, 1.0, %v10353_v30  ;;  %v1386_v51 = vmul.f32 %v10471_v43, %v10473_v45 }
 0x135   : > { %8688 = vmatprep.subr.bf16.mxu1 %v10014_v50  ;;  %v1382_v28 = vmul.f32 %v10443_v22, %v10445_v23  ;;  %vm719_vm12 = vcmp.ne.s32.totalorder %v471_v48, 0 }
 0x136   : > { %v1409_v63 = vpack.c.bf16 %v10487_v57, %v1386_v51  ;;  %v284_v51 = vadd.s32 24, %v10346_v24 }
 0x137   : > { %v1407_v35 = vpack.c.bf16 %v10457_v31, %v1382_v28  ;;  %v10521_v28 = vsel %vm723_vm14, 1.0, %v10353_v30 }
 0x138   : > { %8689 = vmatpush3.bf16.msra.mxu1 %v10014_v50  ;;  %v485_v50 = vand.u32 15, %v305_v34  ;;  %12185 = vst [vmem:[#allocation9_spill] sm:$0xff] %v10521_v28 }
 0x139   : > { %8690 = vmatprep.subr.bf16.mxu1 %v10015_v59 }
 0x13a   : > { %vm721_vm13 = vcmp.ne.s32.totalorder %v485_v50, 0  ;;  %v10536_v50 = vld [vmem:[#allocation2 + $0xef] sm:$0xff] }
 0x13b   : > { %8659 = vmatmul.mubr.bf16.gmra.mrb[20].mxu1 %v1403_v0  ;;  %v10504_v10 = vsel %vm721_vm13, 1.0, %v10353_v30 }
 0x13c   : > { %8662 = vmatprep.mubr.bf16.mxu1 %v1404_v3  ;;  %8691 = vmatpush3.bf16.msra.mxu1 %v10015_v59  ;;  %v10491_v59 = vld [vmem:[#allocation2 + $0xaf] sm:$0xff]  ;;  %v10501_v3 = vld [vmem:[#allocation2 + $0xb7] sm:$0xff]  ;;  %12184 = vst [vmem:[#allocation8_spill] sm:$0xff] %v10504_v10  ;;  %v1392_v17 = vmul.f32 %v10504_v10, %v10506_v11 }
 0x13d   : > { %8692 = vmatprep.subr.bf16.mxu1 %v10016_v2  ;;  %v1410_v0 = vpack.c.bf16 %v10491_v59, %v1388_v58  ;;  %v286_v58 = vadd.s32 40, %v10346_v24 }
 0x140   : > { %8693 = vmatpush3.bf16.msra.mxu1 %v10016_v2  ;;  %v10499_v2 = vsel %vm719_vm12, 1.0, %v10353_v30 }
 0x141   : > { %8694 = vmatprep.subr.bf16.mxu1 %v10017_v13  ;;  %12183 = vst [vmem:[#allocation7_spill] sm:$0xff] %v10499_v2  ;;  %v1390_v15 = vmul.f32 %v10499_v2, %v10501_v3 }
 0x143   : > { %8663 = vmatmul.mubr.bf16.gmra.mrb[24].mxu1 %v1405_v18  ;;  %v10514_v18 = vld [vmem:[#allocation2 + $0xcf] sm:$0xff]  ;;  %v1411_v26 = vpack.c.bf16 %v10510_v16, %v1390_v15  ;;  %v338_v15 = vand.u32 15, %v284_v51 }
 0x144   : > { %8666 = vmatprep.mubr.bf16.mxu1 %v1406_v21  ;;  %8695 = vmatpush3.bf16.msra.mxu1 %v10017_v13  ;;  %v513_v13 = vand.u32 15, %v309_v62  ;;  %v282_v21 = vadd.s32 8, %v10346_v24  ;;  %v1412_v27 = vpack.c.bf16 %v10514_v18, %v1392_v17  ;;  %v352_v17 = vand.u32 15, %v286_v58  ;;  %v10561_v58 = vld [vmem:[#allocation2 + $0x21] sm:$0xff] }
 0x145   : > { %8696 = vmatprep.subr.bf16.mxu1 %v10018_v20  ;;  %vm796_vm2 = vcmp.ne.s32.totalorder %v338_v15, 15 }
 0x146   : > { %vm725_vm15 = vcmp.ne.s32.totalorder %v513_v13, 0  ;;  %v1916_v13 = vld [vmem:[#allocation2 + $0x11] sm:$0xff]  ;;  %vm798_vm3 = vcmp.ne.s32.totalorder %v352_v17, 15  ;;  %v10559_v51 = vsel %vm796_vm2, 1.0, %v10353_v30 }
 0x147   : > { %v10526_v32 = vsel %vm725_vm15, 1.0, %v10353_v30  ;;  %12189 = vst [vmem:[#allocation13_spill] sm:$0xff] %v10559_v51  ;;  %v1950_v17 = vmul.f32 %v10559_v51, %v10561_v58 }
 0x148   : > { %8697 = vmatpush3.bf16.msra.mxu1 %v10018_v20  ;;  %v311_v20 = vadd.s32 240, %v10346_v24  ;;  %12186 = vst [vmem:[#allocation10_spill] sm:$0xff] %v10526_v32  ;;  %v1396_v48 = vmul.f32 %v10526_v32, %v10528_v33 }
 0x149   : > { %8698 = vmatprep.subr.bf16.mxu1 %v10019_v7 }
 0x14a   : > { %v527_v34 = vand.u32 15, %v311_v20  ;;  %v1414_v62 = vpack.c.bf16 %v10536_v50, %v1396_v48 }
 0x14b   : > { %8667 = vmatmul.mubr.bf16.gmra.mrb[28].mxu1 %v1407_v35  ;;  %v324_v35 = vand.u32 15, %v282_v21  ;;  %v10552_v21 = vld [vmem:[#allocation2 + $0xff] sm:$0xff] }
 0x14c   : > { %8670 = vmatprep.mubr.bf16.mxu1 %v1408_v42  ;;  %8699 = vmatpush3.bf16.msra.mxu1 %v10019_v7  ;;  %v10523_v7 = vld [vmem:[#allocation2 + $0xd7] sm:$0xff]  ;;  %v10532_v42 = vld [vmem:[#allocation2 + $0xdf] sm:$0xff]  ;;  %vm727_vm0 = vcmp.ne.s32.totalorder %v527_v34, 0  ;;  %v288_v34 = vadd.s32 56, %v10346_v24 }
 0x14d   : > { %8700 = vmatprep.subr.bf16.mxu1 %v10020_v41  ;;  %vm794_vm1 = vcmp.ne.s32.totalorder %v324_v35, 15  ;;  %v290_v35 = vadd.s32 72, %v10346_v24 }
 0x14e   : > { %v10548_v12 = vsel %vm794_vm1, 1.0, %v10353_v30 }
 0x14f   : > { %12188 = vst [vmem:[#allocation12_spill] sm:$0xff] %v10548_v12  ;;  %v380_v15 = vand.u32 15, %v290_v35 }
 0x150   : > { %8701 = vmatpush3.bf16.msra.mxu1 %v10020_v41  ;;  %v1394_v41 = vmul.f32 %v10521_v28, %v10523_v7 }
 0x151   : > { %8734 = vmatprep.subr.bf16.mxu1 %v10485_v56  ;;  %vm802_vm5 = vcmp.ne.s32.totalorder %v380_v15, 15 }
 0x152   : > { %v1413_v61 = vpack.c.bf16 %v10532_v42, %v1394_v41  ;;  %v10589_v15 = vsel %vm802_vm5, 1.0, %v10353_v30 }
 0x153   : > { %8671 = vmatmul.mubr.bf16.gmra.mrb[32].mxu1 %v1409_v63  ;;  %v10543_v63 = vsel %vm727_vm0, 1.0, %v10353_v30  ;;  %12196 = vst [vmem:[#allocation20_spill] sm:$0xff] %v10589_v15 }
 0x154   : > { %8674 = vmatprep.mubr.bf16.mxu1 %v1410_v0  ;;  %12187 = vst [vmem:[#allocation11_spill] sm:$0xff] %v10543_v63  ;;  %v10545_v0 = vld [vmem:[#allocation2 + $0xf7] sm:$0xff] }
 0x155   : > { %v1398_v20 = vmul.f32 %v10543_v63, %v10545_v0  ;;  %v10577_v63 = vld [vmem:[#allocation2 + $0x29] sm:$0xff] }
 0x156   : > { %12193 = vst [vmem:[#allocation17_spill] sm:$0xff] %v10577_v63 }
 0x157   : > { %v1415_v41 = vpack.c.bf16 %v10552_v21, %v1398_v20 }
 0x15b   : > { %8675 = vmatmul.mubr.bf16.gmra.mrb[36].mxu1 %v1411_v26  ;;  %v1948_v26 = vmul.f32 %v10548_v12, %v1916_v13  ;;  %v366_v13 = vand.u32 15, %v288_v34  ;;  %v10022_v34 = vld [vmem:[%s12066_s3 + $0xc8] sm:$0xff]  }
 0x15c   : > { %8678 = vmatprep.mubr.bf16.mxu1 %v1412_v27  ;;  %v1915_v27 = vld [vmem:[#allocation2 + $0x9] sm:$0xff] }
 0x15d   : > { %v1979_v48 = vpack.c.bf16 %v1948_v26, %v1915_v27  ;;  %vm800_vm4 = vcmp.ne.s32.totalorder %v366_v13, 15  ;;  %v292_v26 = vadd.s32 88, %v10346_v24  ;;  %v10573_v27 = vld [vmem:[#allocation2 + $0x19] sm:$0xff]  ;;  %v10586_v13 = vld [vmem:[#allocation2 + $0x41] sm:$0xff] }
 0x15e   : > { %12192 = vst [vmem:[#allocation16_spill] sm:$0xff] %v10573_v27  ;;  %v1980_v12 = vpack.c.bf16 %v1950_v17, %v10573_v27  ;;  %12195 = vst [vmem:[#allocation19_spill] sm:$0xff] %v10586_v13  ;;  %v10602_v27 = vld [vmem:[#allocation2 + $0x39] sm:$0xff] }
 0x15f   : > { %v394_v17 = vand.u32 15, %v292_v26  ;;  %12198 = vst [vmem:[#allocation22_spill] sm:$0xff] %v10602_v27 }
 0x161   : > { %vm804_vm6 = vcmp.ne.s32.totalorder %v394_v17, 15 }
 0x162   : > { %v10613_v17 = vsel %vm804_vm6, 1.0, %v10353_v30 }
 0x163   : > { %8679 = vmatmul.mubr.bf16.gmra.mrb[40].mxu1 %v1413_v61  ;;  %v10564_v61 = vsel %vm798_vm3, 1.0, %v10353_v30  ;;  %12200 = vst [vmem:[#allocation24_spill] sm:$0xff] %v10613_v17 }
 0x164   : > { %8682 = vmatprep.mubr.bf16.mxu1 %v1414_v62  ;;  %12190 = vst [vmem:[#allocation14_spill] sm:$0xff] %v10564_v61  ;;  %v10566_v62 = vld [vmem:[#allocation2 + $0x31] sm:$0xff] }
 0x165   : > { %12191 = vst [vmem:[#allocation15_spill] sm:$0xff] %v10566_v62  ;;  %v1952_v20 = vmul.f32 %v10564_v61, %v10566_v62  ;;  %v10591_v61 = vld [vmem:[#allocation2 + $0x51] sm:$0xff]  ;;  %v296_v62 = vadd.s32 120, %v10346_v24 }
 0x166   : > { %12197 = vst [vmem:[#allocation21_spill] sm:$0xff] %v10591_v61 }
 0x167   : > { %v1981_v35 = vpack.c.bf16 %v1952_v20, %v10577_v63  ;;  %v10023_v63 = vld [vmem:[%s12066_s3 + $0xd0] sm:$0xff]  }
 0x16b   : > { %8683 = vmatmul.mubr.bf16.gmra.mrb[44].mxu1 %v1415_v41  ;;  %v294_v41 = vadd.s32 104, %v10346_v24 }
 0x16c   : > { %8702 = vmatprep.mubr.bf16.mxu1 %v1979_v48  ;;  %v10584_v48 = vsel %vm800_vm4, 1.0, %v10353_v30 }
 0x16d   : > { %12194 = vst [vmem:[#allocation18_spill] sm:$0xff] %v10584_v48  ;;  %v408_v51 = vand.u32 15, %v294_v41  ;;  %v1954_v20 = vmul.f32 %v10584_v48, %v10586_v13  ;;  %v10606_v41 = vld [vmem:[#allocation2 + $0x49] sm:$0xff]  ;;  %v10615_v48 = vld [vmem:[#allocation2 + $0x61] sm:$0xff]  ;;  %v10630_v13 = vld [vmem:[#allocation2 + $0x59] sm:$0xff] }
 0x16e   : > { %12199 = vst [vmem:[#allocation23_spill] sm:$0xff] %v10606_v41  ;;  %12201 = vst [vmem:[#allocation25_spill] sm:$0xff] %v10615_v48 }
 0x16f   : > { %vm806_vm7 = vcmp.ne.s32.totalorder %v408_v51, 15  ;;  %v1982_v26 = vpack.c.bf16 %v1954_v20, %v10602_v27  ;;  %v422_v20 = vand.u32 15, %v296_v62  ;;  %v1958_v27 = vmul.f32 %v10613_v17, %v10615_v48  ;;  %12204 = vst [vmem:[#allocation28_spill] sm:$0xff] %v10630_v13  ;;  %v10643_v17 = vld [vmem:[#allocation2 + $0x81] sm:$0xff]  ;;  %v10658_v48 = vld [vmem:[#allocation2 + $0x79] sm:$0xff] }
 0x170   : > { %v10618_v51 = vsel %vm806_vm7, 1.0, %v10353_v30  ;;  %12207 = vst [vmem:[#allocation31_spill] sm:$0xff] %v10643_v17  ;;  %12210 = vst [vmem:[#allocation34_spill] sm:$0xff] %v10658_v48 }
 0x171   : > { %12202 = vst [vmem:[#allocation26_spill] sm:$0xff] %v10618_v51  ;;  %vm808_vm8 = vcmp.ne.s32.totalorder %v422_v20, 15  ;;  %v1984_v62 = vpack.c.bf16 %v1958_v27, %v10630_v13 }
 0x172   : > { %v10641_v20 = vsel %vm808_vm8, 1.0, %v10353_v30 }
 0x173   : > { %8703 = vmatmul.mubr.bf16.vlgmr.msra.gmra.mrb[16].mxu1 %v1980_v12  ;;  %v1956_v12 = vmul.f32 %v10589_v15, %v10591_v61  ;;  %12206 = vst [vmem:[#allocation30_spill] sm:$0xff] %v10641_v20  ;;  %v1962_v13 = vmul.f32 %v10641_v20, %v10643_v17  ;;  %v10671_v20 = vld [vmem:[#allocation2 + $0xa1] sm:$0xff]  ;;  %v10687_v17 = vld [vmem:[#allocation2 + $0xa9] sm:$0xff] }
 0x174   : > { %8735 = vmatpush3.bf16.msra.mxu1 %v10485_v56  ;;  %8706 = vmatprep.mubr.bf16.mxu1 %v1981_v35  ;;  %v298_v56 = vadd.s32 136, %v10346_v24  ;;  %v10024_v35 = vld [vmem:[%s12066_s3 + $0xd8] sm:$0xff]   ;;  %12213 = vst [vmem:[#allocation37_spill] sm:$0xff] %v10671_v20  ;;  %12217 = vst [vmem:[#allocation41_spill] sm:$0xff] %v10687_v17 }
 0x175   : > { %8736 = vmatprep.subr.bf16.mxu1 %v10022_v34  ;;  %v1983_v15 = vpack.c.bf16 %v1956_v12, %v10606_v41  ;;  %v10025_v12 = vld [vmem:[%s12066_s3 + $0xe0] sm:$0xff]   ;;  %v300_v41 = vadd.s32 152, %v10346_v24 }
 0x176   : > { %v436_v61 = vand.u32 15, %v298_v56  ;;  %v10026_v56 = vld [vmem:[%s12066_s3 + $0xe8] sm:$0xff]  }
 0x177   : > { %v450_v27 = vand.u32 15, %v300_v41  ;;  %v306_v41 = vadd.s32 200, %v10346_v24 }
 0x178   : > { %8737 = vmatpush3.bf16.msra.mxu1 %v10022_v34  ;;  %v10620_v34 = vld [vmem:[#allocation2 + $0x71] sm:$0xff]  ;;  %vm810_vm9 = vcmp.ne.s32.totalorder %v436_v61, 15 }
 0x179   : > { %8738 = vmatprep.subr.bf16.mxu1 %v10023_v63  ;;  %12203 = vst [vmem:[#allocation27_spill] sm:$0xff] %v10620_v34  ;;  %v10646_v61 = vsel %vm810_vm9, 1.0, %v10353_v30  ;;  %vm812_vm10 = vcmp.ne.s32.totalorder %v450_v27, 15 }
 0x17a   : > { %12208 = vst [vmem:[#allocation32_spill] sm:$0xff] %v10646_v61  ;;  %v10669_v27 = vsel %vm812_vm10, 1.0, %v10353_v30 }
 0x17b   : > { %8707 = vmatmul.mubr.bf16.gmra.mrb[20].mxu1 %v1982_v26  ;;  %v1960_v26 = vmul.f32 %v10618_v51, %v10620_v34  ;;  %12212 = vst [vmem:[#allocation36_spill] sm:$0xff] %v10669_v27 }
 0x17c   : > { %8710 = vmatprep.mubr.bf16.mxu1 %v1983_v15  ;;  %8739 = vmatpush3.bf16.msra.mxu1 %v10023_v63  ;;  %v302_v63 = vadd.s32 168, %v10346_v24  ;;  %v10634_v15 = vld [vmem:[#allocation2 + $0x69] sm:$0xff] }
 0x17d   : > { %8740 = vmatprep.subr.bf16.mxu1 %v10024_v35  ;;  %12205 = vst [vmem:[#allocation29_spill] sm:$0xff] %v10634_v15  ;;  %v1985_v51 = vpack.c.bf16 %v1960_v26, %v10634_v15  ;;  %v10027_v26 = vld [vmem:[%s12066_s3 + $0xf0] sm:$0xff]   ;;  %v304_v15 = vadd.s32 184, %v10346_v24 }
 0x17e   : > { %v464_v34 = vand.u32 15, %v302_v63  ;;  %v10028_v63 = vld [vmem:[%s12066_s3 + $0xf8] sm:$0xff]  }
 0x180   : > { %8741 = vmatpush3.bf16.msra.mxu1 %v10024_v35  ;;  %v10648_v35 = vld [vmem:[#allocation2 + $0x91] sm:$0xff]  ;;  %vm814_vm11 = vcmp.ne.s32.totalorder %v464_v34, 15 }
 0x181   : > { %8742 = vmatprep.subr.bf16.mxu1 %v10025_v12  ;;  %12209 = vst [vmem:[#allocation33_spill] sm:$0xff] %v10648_v35  ;;  %v10674_v34 = vsel %vm814_vm11, 1.0, %v10353_v30 }
 0x182   : > { %12214 = vst [vmem:[#allocation38_spill] sm:$0xff] %v10674_v34 }
 0x183   : > { %8711 = vmatmul.mubr.bf16.gmra.mrb[24].mxu1 %v1984_v62  ;;  %v1964_v62 = vmul.f32 %v10646_v61, %v10648_v35  ;;  %v492_v35 = vand.u32 15, %v306_v41 }
 0x184   : > { %8714 = vmatprep.mubr.bf16.mxu1 %v1985_v51  ;;  %8743 = vmatpush3.bf16.msra.mxu1 %v10025_v12  ;;  %v1986_v51 = vpack.c.bf16 %v1962_v13, %v10658_v48  ;;  %v10662_v12 = vld [vmem:[#allocation2 + $0x89] sm:$0xff]  ;;  %v478_v13 = vand.u32 15, %v304_v15  ;;  %v1966_v48 = vmul.f32 %v10669_v27, %v10671_v20  ;;  %v308_v15 = vadd.s32 216, %v10346_v24  ;;  %v10696_v20 = vld [vmem:[#allocation2 + $0xc1] sm:$0xff] }
 0x185   : > { %8744 = vmatprep.subr.bf16.mxu1 %v10026_v56  ;;  %12211 = vst [vmem:[#allocation35_spill] sm:$0xff] %v10662_v12  ;;  %v1987_v61 = vpack.c.bf16 %v1964_v62, %v10662_v12  ;;  %v10029_v62 = vld [vmem:[%s12066_s3 + $0x100] sm:$0xff]   ;;  %vm818_vm13 = vcmp.ne.s32.totalorder %v492_v35, 15 }
 0x186   : > { %v10683_v12 = vld [vmem:[#allocation2 + $0x99] sm:$0xff]  ;;  %vm816_vm12 = vcmp.ne.s32.totalorder %v478_v13, 15  ;;  %v10701_v13 = vld [vmem:[#allocation2 + $0xd1] sm:$0xff]  ;;  %v506_v35 = vand.u32 15, %v308_v15 }
 0x187   : > { %12216 = vst [vmem:[#allocation40_spill] sm:$0xff] %v10683_v12  ;;  %v10694_v27 = vsel %vm816_vm12, 1.0, %v10353_v30  ;;  %12220 = vst [vmem:[#allocation44_spill] sm:$0xff] %v10701_v13 }
 0x188   : > { %8745 = vmatpush3.bf16.msra.mxu1 %v10026_v56  ;;  %v10676_v56 = vld [vmem:[#allocation2 + $0xb1] sm:$0xff]  ;;  %12218 = vst [vmem:[#allocation42_spill] sm:$0xff] %v10694_v27  ;;  %vm820_vm14 = vcmp.ne.s32.totalorder %v506_v35, 15 }
 0x189   : > { %8746 = vmatprep.subr.bf16.mxu1 %v10027_v26  ;;  %12215 = vst [vmem:[#allocation39_spill] sm:$0xff] %v10676_v56 }
 0x18b   : > { %8715 = vmatmul.mubr.bf16.gmra.mrb[28].mxu1 %v1986_v51  ;;  %v1968_v51 = vmul.f32 %v10674_v34, %v10676_v56  ;;  %v10699_v34 = vsel %vm818_vm13, 1.0, %v10353_v30 }
 0x18c   : > { %8718 = vmatprep.mubr.bf16.mxu1 %v1987_v61  ;;  %8747 = vmatpush3.bf16.msra.mxu1 %v10027_v26  ;;  %v310_v61 = vadd.s32 232, %v10346_v24  ;;  %v1988_v26 = vpack.c.bf16 %v1966_v48, %v10683_v12  ;;  %12219 = vst [vmem:[#allocation43_spill] sm:$0xff] %v10699_v34  ;;  %v1970_v48 = vmul.f32 %v10694_v27, %v10696_v20 }
 0x18d   : > { %8748 = vmatprep.subr.bf16.mxu1 %v10028_v63  ;;  %v1989_v41 = vpack.c.bf16 %v1968_v51, %v10687_v17  ;;  %v1972_v51 = vmul.f32 %v10699_v34, %v10701_v13  ;;  %v10709_v17 = vld [vmem:[#allocation2 + $0xc9] sm:$0xff]  ;;  %v10722_v34 = vld [vmem:[#allocation2 + $0xf1] sm:$0xff] }
 0x18e   : > { %v520_v56 = vand.u32 15, %v310_v61  ;;  %12221 = vst [vmem:[#allocation45_spill] sm:$0xff] %v10709_v17  ;;  %v10715_v61 = vsel %vm820_vm14, 1.0, %v10353_v30 }
 0x18f   : > { %v1991_v15 = vpack.c.bf16 %v1972_v51, %v10709_v17  ;;  %12222 = vst [vmem:[#allocation46_spill] sm:$0xff] %v10715_v61 }
 0x190   : > { %8749 = vmatpush3.bf16.msra.mxu1 %v10028_v63  ;;  %v10705_v63 = vld [vmem:[#allocation2 + $0xb9] sm:$0xff]  ;;  %vm822_vm15 = vcmp.ne.s32.totalorder %v520_v56, 15 }
 0x191   : > { %8782 = vmatprep.subr.bf16.mxu1 %v10029_v62  ;;  %v1990_v12 = vpack.c.bf16 %v1970_v48, %v10705_v63  ;;  %v10720_v27 = vsel %vm822_vm15, 1.0, %v10353_v30  ;;  %v10726_v56 = vld [vmem:[#allocation2 + $0xd9] sm:$0xff]  ;;  %v10730_v48 = vld [vmem:[#allocation2 + $0xe9] sm:$0xff] }
 0x192   : > { %12223 = vst [vmem:[#allocation47_spill] sm:$0xff] %v10720_v27  ;;  %v1976_v35 = vmul.f32 %v10720_v27, %v10722_v34  ;;  %v2285_v27 = vmul.f32 %v10356_v4, %v10364_v38 }
 0x193   : > { %8719 = vmatmul.mubr.bf16.gmra.mrb[32].mxu1 %v1988_v26  ;;  %v312_v26 = vadd.s32 248, %v10346_v24 }
 0x194   : > { %8722 = vmatprep.mubr.bf16.mxu1 %v1989_v41  ;;  %v10717_v41 = vld [vmem:[#allocation2 + $0xe1] sm:$0xff]  ;;  %v1993_v51 = vpack.c.bf16 %v1976_v35, %v10730_v48  ;;  %v2289_v35 = vmul.f32 %v10367_v39, %v10389_v53 }
 0x195   : > { %v534_v13 = vand.u32 15, %v312_v26  ;;  %v1974_v24 = vmul.f32 %v10715_v61, %v10717_v41  ;;  %v10737_v26 = vld [vmem:[#allocation2 + $0x101] sm:$0xff]  ;;  %v10741_v61 = vld [vmem:[#allocation2 + $0xf9] sm:$0xff] }
 0x196   : > { %v2319_v38 = vpack.c.bf16 %v10401_v60, %v2289_v35  ;;  %v10032_v60 = vld [vmem:[%s12066_s3 + $0x118] sm:$0xff]   ;;  %v2307_v35 = vmul.f32 %v10499_v2, %v10506_v11  ;;  %v10813_v11 = vld [vmem:[#allocation2 + $0x107] sm:$0xff] }
 0x197   : > { %vm824_vm0 = vcmp.ne.s32.totalorder %v534_v13, 15 }
 0x198   : > { %v10735_v17 = vsel %vm824_vm0, 1.0, %v10353_v30  ;;  %v2287_v30 = vmul.f32 %v10362_v37, %v10369_v40  ;;  %v10031_v40 = vld [vmem:[%s12066_s3 + $0x110] sm:$0xff]  }
 0x19b   : > { %8723 = vmatmul.mubr.bf16.gmra.mrb[36].mxu1 %v1990_v12  ;;  %v1992_v12 = vpack.c.bf16 %v1974_v24, %v10726_v56  ;;  %v2317_v24 = vpack.c.bf16 %v10373_v44, %v2285_v27  ;;  %v2291_v44 = vmul.f32 %v10387_v52, %v10394_v55  ;;  %v2295_v55 = vmul.f32 %v10415_v5, %v10422_v9 }
 0x19c   : > { %8726 = vmatprep.mubr.bf16.mxu1 %v1991_v15  ;;  %v1978_v15 = vmul.f32 %v10735_v17, %v10737_v26  ;;  %v2299_v9 = vmul.f32 %v10443_v22, %v10450_v25  ;;  %v2303_v25 = vmul.f32 %v10471_v43, %v10478_v47  ;;  %v2309_v47 = vmul.f32 %v10504_v10, %v10523_v7 }
 0x19d   : > { %v2320_v53 = vpack.c.bf16 %v10408_v1, %v2291_v44  ;;  %v2297_v1 = vmul.f32 %v10420_v8, %v10445_v23  ;;  %v10035_v23 = vld [vmem:[%s12066_s3 + $0x130] sm:$0xff]   ;;  %v2592_v44 = vld [vmem:[#allocation2 + $0x20] sm:$0xff] }
 0x19e   : > { %v1994_v13 = vpack.c.bf16 %v1978_v15, %v10741_v61 }
 0x19f   : > { %v2323_v15 = vpack.c.bf16 %v10457_v31, %v2297_v1  ;;  %v10036_v31 = vld [vmem:[%s12066_s3 + $0x138] sm:$0xff]   ;;  %v2598_v1 = vld [vmem:[#allocation2 + $0x50] sm:$0xff] }
 0x1a3   : > { %8727 = vmatmul.mubr.bf16.gmra.mrb[40].mxu1 %v1992_v12  ;;  %v2318_v12 = vpack.c.bf16 %v10380_v49, %v2287_v30  ;;  %v2293_v49 = vmul.f32 %v10392_v54, %v10417_v6  ;;  %v10033_v6 = vld [vmem:[%s12066_s3 + $0x120] sm:$0xff]   ;;  %v2326_v30 = vpack.c.bf16 %v10491_v59, %v2303_v25  ;;  %v2311_v59 = vmul.f32 %v10521_v28, %v10528_v33  ;;  %v2591_v33 = vld [vmem:[#allocation2 + $0x18] sm:$0xff]  ;;  %v2601_v25 = vld [vmem:[#allocation2 + $0x68] sm:$0xff] }
 0x1a4   : > { %8730 = vmatprep.mubr.bf16.mxu1 %v1993_v51  ;;  %v10030_v51 = vld [vmem:[%s12066_s3 + $0x108] sm:$0xff]  }
 0x1a5   : > { %v2321_v27 = vpack.c.bf16 %v10429_v14, %v2293_v49  ;;  %v10034_v14 = vld [vmem:[%s12066_s3 + $0x128] sm:$0xff]   ;;  %v2623_v49 = vpack.c.bf16 %v2592_v44, %v2591_v33  ;;  %v2611_v33 = vld [vmem:[#allocation2 + $0xb8] sm:$0xff] }
 0x1a6   : > { %v2609_v44 = vld [vmem:[#allocation2 + $0xa8] sm:$0xff] }
 0x1ab   : > { %8731 = vmatmul.mubr.bf16.gmra.mrb[44].mxu1 %v1994_v13  ;;  %v2324_v13 = vpack.c.bf16 %v10464_v36, %v2299_v9  ;;  %v2305_v36 = vmul.f32 %v10476_v46, %v10501_v3  ;;  %v2313_v3 = vmul.f32 %v10526_v32, %v10545_v0  ;;  %v2594_v0 = vld [vmem:[#allocation2 + $0x30] sm:$0xff]  ;;  %v2599_v9 = vld [vmem:[#allocation2 + $0x58] sm:$0xff] }
 0x1ac   : > { %8750 = vmatprep.mubr.bf16.mxu1 %v2317_v24 }
 0x1b3   : > { %8751 = vmatmul.mubr.bf16.vlgmr.msra.gmra.mrb[16].mxu1 %v2318_v12  ;;  %v2328_v12 = vpack.c.bf16 %v10514_v18, %v2307_v35  ;;  %v12224_v18 = vld [vmem:[#allocation11_spill] sm:$0xff]  ;;  %v10043_v35 = vld [vmem:[%s12066_s3 + $0x170] sm:$0xff]  }
 0x1b4   : > { %8783 = vmatpush3.bf16.msra.mxu1 %v10029_v62  ;;  %8754 = vmatprep.mubr.bf16.mxu1 %v2319_v38  ;;  %v2322_v62 = vpack.c.bf16 %v10436_v19, %v2295_v55  ;;  %v2301_v19 = vmul.f32 %v10448_v29, %v10473_v45  ;;  %v10037_v45 = vld [vmem:[%s12066_s3 + $0x140] sm:$0xff]   ;;  %v2331_v38 = vpack.c.bf16 %v10552_v21, %v2313_v3 }
 0x1b5   : > { %8784 = vmatprep.subr.bf16.mxu1 %v10030_v51  ;;  %v2315_v7 = vmul.f32 %v12224_v18, %v10813_v11 }
 0x1b6   : > { %v2325_v24 = vpack.c.bf16 %v10487_v57, %v2301_v19  ;;  %v2327_v57 = vpack.c.bf16 %v10510_v16, %v2305_v36  ;;  %v2330_v16 = vpack.c.bf16 %v10536_v50, %v2311_v59  ;;  %v2596_v50 = vld [vmem:[#allocation2 + $0x40] sm:$0xff]  ;;  %v2603_v36 = vld [vmem:[#allocation2 + $0x78] sm:$0xff]  ;;  %v2605_v59 = vld [vmem:[#allocation2 + $0x88] sm:$0xff] }
 0x1b8   : > { %8785 = vmatpush3.bf16.msra.mxu1 %v10030_v51  ;;  %v2329_v51 = vpack.c.bf16 %v10532_v42, %v2309_v47  ;;  %v10817_v42 = vld [vmem:[#allocation2 + $0x10f] sm:$0xff] }
 0x1b9   : > { %8786 = vmatprep.subr.bf16.mxu1 %v10031_v40  ;;  %v2606_v47 = vld [vmem:[#allocation2 + $0x90] sm:$0xff] }
 0x1ba   : > { %v10856_v3 = vpack.c.bf16 %v2606_v47, %v2605_v59  ;;  %v12227_v59 = vld [vmem:[#allocation15_spill] sm:$0xff] }
 0x1bb   : > { %8755 = vmatmul.mubr.bf16.gmra.mrb[20].mxu1 %v2320_v53  ;;  %v2593_v53 = vld [vmem:[#allocation2 + $0x28] sm:$0xff] }
 0x1bc   : > { %8758 = vmatprep.mubr.bf16.mxu1 %v2321_v27  ;;  %8787 = vmatpush3.bf16.msra.mxu1 %v10031_v40  ;;  %v2332_v40 = vpack.c.bf16 %v10817_v42, %v2315_v7  ;;  %v10820_v21 = vpack.c.bf16 %v2594_v0, %v2593_v53  ;;  %v10038_v27 = vld [vmem:[%s12066_s3 + $0x148] sm:$0xff]   ;;  %v10045_v7 = vld [vmem:[%s12066_s3 + $0x180] sm:$0xff]  }
 0x1bd   : > { %8788 = vmatprep.subr.bf16.mxu1 %v10032_v60  ;;  %v2613_v53 = vld [vmem:[#allocation2 + $0xc8] sm:$0xff] }
 0x1c0   : > { %8789 = vmatpush3.bf16.msra.mxu1 %v10032_v60  ;;  %v2595_v60 = vld [vmem:[#allocation2 + $0x38] sm:$0xff] }
 0x1c1   : > { %8790 = vmatprep.subr.bf16.mxu1 %v10033_v6  ;;  %v10825_v55 = vpack.c.bf16 %v2596_v50, %v2595_v60  ;;  %v2614_v60 = vld [vmem:[#allocation2 + $0xd0] sm:$0xff] }
 0x1c3   : > { %8759 = vmatmul.mubr.bf16.gmra.mrb[24].mxu1 %v2322_v62  ;;  %v2600_v62 = vld [vmem:[#allocation2 + $0x60] sm:$0xff] }
 0x1c4   : > { %8762 = vmatprep.mubr.bf16.mxu1 %v2323_v15  ;;  %8791 = vmatpush3.bf16.msra.mxu1 %v10033_v6  ;;  %v10039_v6 = vld [vmem:[%s12066_s3 + $0x150] sm:$0xff]   ;;  %v10837_v19 = vpack.c.bf16 %v2600_v62, %v2599_v9 }
 0x1c5   : > { %8792 = vmatprep.subr.bf16.mxu1 %v10034_v14  ;;  %v2618_v9 = vld [vmem:[#allocation2 + $0xf0] sm:$0xff] }
 0x1c8   : > { %8793 = vmatpush3.bf16.msra.mxu1 %v10034_v14  ;;  %v2597_v14 = vld [vmem:[#allocation2 + $0x48] sm:$0xff] }
 0x1c9   : > { %8794 = vmatprep.subr.bf16.mxu1 %v10035_v23  ;;  %v10832_v15 = vpack.c.bf16 %v2598_v1, %v2597_v14  ;;  %v10874_v1 = vpack.c.bf16 %v2614_v60, %v2613_v53  ;;  %v2617_v14 = vld [vmem:[#allocation2 + $0xe8] sm:$0xff]  ;;  %v12231_v53 = vld [vmem:[#allocation17_spill] sm:$0xff] }
 0x1cb   : > { %8763 = vmatmul.mubr.bf16.gmra.mrb[28].mxu1 %v2324_v13  ;;  %v10041_v13 = vld [vmem:[%s12066_s3 + $0x160] sm:$0xff]  }
 0x1cc   : > { %8766 = vmatprep.mubr.bf16.mxu1 %v2325_v24  ;;  %8795 = vmatpush3.bf16.msra.mxu1 %v10035_v23  ;;  %v10040_v23 = vld [vmem:[%s12066_s3 + $0x158] sm:$0xff]   ;;  %v2604_v24 = vld [vmem:[#allocation2 + $0x80] sm:$0xff] }
 0x1cd   : > { %8796 = vmatprep.subr.bf16.mxu1 %v10036_v31 }
 0x1d0   : > { %8797 = vmatpush3.bf16.msra.mxu1 %v10036_v31  ;;  %v2602_v31 = vld [vmem:[#allocation2 + $0x70] sm:$0xff] }
 0x1d1   : > { %8830 = vmatprep.subr.bf16.mxu1 %v10037_v45 }
 0x1d3   : > { %8767 = vmatmul.mubr.bf16.gmra.mrb[32].mxu1 %v2326_v30  ;;  %v10042_v30 = vld [vmem:[%s12066_s3 + $0x168] sm:$0xff]  }
 0x1d4   : > { %8770 = vmatprep.mubr.bf16.mxu1 %v2327_v57  ;;  %v10849_v57 = vpack.c.bf16 %v2604_v24, %v2603_v36  ;;  %v2622_v36 = vld [vmem:[#allocation2 + $0x110] sm:$0xff] }
 0x1db   : > { %8771 = vmatmul.mubr.bf16.gmra.mrb[36].mxu1 %v2328_v12  ;;  %v2607_v12 = vld [vmem:[#allocation2 + $0x98] sm:$0xff] }
 0x1dc   : > { %8774 = vmatprep.mubr.bf16.mxu1 %v2329_v51  ;;  %v2608_v51 = vld [vmem:[#allocation2 + $0xa0] sm:$0xff] }
 0x1e3   : > { %8775 = vmatmul.mubr.bf16.gmra.mrb[40].mxu1 %v2330_v16  ;;  %v10044_v16 = vld [vmem:[%s12066_s3 + $0x178] sm:$0xff]  }
 0x1e4   : > { %8778 = vmatprep.mubr.bf16.mxu1 %v2331_v38  ;;  %v10861_v38 = vpack.c.bf16 %v2608_v51, %v2607_v12  ;;  %v12226_v12 = vld [vmem:[#allocation16_spill] sm:$0xff] }
 0x1eb   : > { %8779 = vmatmul.mubr.bf16.gmra.mrb[44].mxu1 %v2332_v40  ;;  %v2610_v40 = vld [vmem:[#allocation2 + $0xb0] sm:$0xff] }
 0x1ec   : > { %8798 = vmatprep.mubr.bf16.mxu1 %v2623_v49  ;;  %v2612_v49 = vld [vmem:[#allocation2 + $0xc0] sm:$0xff]  ;;  %v10868_v0 = vpack.c.bf16 %v2610_v40, %v2609_v44  ;;  %v12229_v40 = vld [vmem:[#allocation19_spill] sm:$0xff] }
 0x1ed   : > { %v10870_v50 = vpack.c.bf16 %v2612_v49, %v2611_v33  ;;  %v12230_v33 = vld [vmem:[#allocation14_spill] sm:$0xff] }
 0x1ee   : > { %v2934_v49 = vmul.f32 %v12230_v33, %v12229_v40  ;;  %v12239_v40 = vld [vmem:[#allocation27_spill] sm:$0xff] }
 0x1f3   : > { %8799 = vmatmul.mubr.bf16.vlgmr.msra.gmra.mrb[16].mxu1 %v10820_v21 }
 0x1f4   : > { %8831 = vmatpush3.bf16.msra.mxu1 %v10037_v45  ;;  %8802 = vmatprep.mubr.bf16.mxu1 %v10825_v55  ;;  %v10844_v45 = vpack.c.bf16 %v2602_v31, %v2601_v25  ;;  %v10880_v31 = vpack.c.bf16 %v2618_v9, %v2617_v14  ;;  %v2621_v25 = vld [vmem:[#allocation2 + $0x108] sm:$0xff]  ;;  %v12233_v14 = vld [vmem:[#allocation21_spill] sm:$0xff]  ;;  %v12234_v9 = vld [vmem:[#allocation18_spill] sm:$0xff] }
 0x1f5   : > { %8832 = vmatprep.subr.bf16.mxu1 %v10038_v27  ;;  %v10888_v47 = vpack.c.bf16 %v2622_v36, %v2621_v25  ;;  %v12235_v25 = vld [vmem:[#allocation25_spill] sm:$0xff]  ;;  %v12236_v36 = vld [vmem:[#allocation20_spill] sm:$0xff] }
 0x1f8   : > { %8833 = vmatpush3.bf16.msra.mxu1 %v10038_v27  ;;  %v2615_v27 = vld [vmem:[#allocation2 + $0xd8] sm:$0xff] }
 0x1f9   : > { %8834 = vmatprep.subr.bf16.mxu1 %v10039_v6 }
 0x1fb   : > { %8803 = vmatmul.mubr.bf16.gmra.mrb[20].mxu1 %v10832_v15 }
 0x1fc   : > { %8806 = vmatprep.mubr.bf16.mxu1 %v10837_v19  ;;  %8835 = vmatpush3.bf16.msra.mxu1 %v10039_v6  ;;  %v2616_v6 = vld [vmem:[#allocation2 + $0xe0] sm:$0xff] }
 0x1fd   : > { %8836 = vmatprep.subr.bf16.mxu1 %v10040_v23  ;;  %v10876_v62 = vpack.c.bf16 %v2616_v6, %v2615_v27  ;;  %v10046_v27 = vld [vmem:[%s12066_s3 + $0x188] sm:$0xff]  }
 0x200   : > { %8837 = vmatpush3.bf16.msra.mxu1 %v10040_v23  ;;  %v2619_v23 = vld [vmem:[#allocation2 + $0xf8] sm:$0xff] }
 0x201   : > { %8838 = vmatprep.subr.bf16.mxu1 %v10041_v13 }
 0x203   : > { %8807 = vmatmul.mubr.bf16.gmra.mrb[24].mxu1 %v10844_v45 }
 0x204   : > { %8810 = vmatprep.mubr.bf16.mxu1 %v10849_v57  ;;  %8839 = vmatpush3.bf16.msra.mxu1 %v10041_v13  ;;  %v2620_v13 = vld [vmem:[#allocation2 + $0x100] sm:$0xff] }
 0x205   : > { %8840 = vmatprep.subr.bf16.mxu1 %v10042_v30  ;;  %v10882_v24 = vpack.c.bf16 %v2620_v13, %v2619_v23  ;;  %v2936_v23 = vmul.f32 %v12234_v9, %v12233_v14  ;;  %v10047_v13 = vld [vmem:[%s12066_s3 + $0x190] sm:$0xff]   ;;  %v12243_v14 = vld [vmem:[#allocation29_spill] sm:$0xff] }
 0x208   : > { %8841 = vmatpush3.bf16.msra.mxu1 %v10042_v30  ;;  %v12225_v30 = vld [vmem:[#allocation12_spill] sm:$0xff] }
 0x209   : > { %8842 = vmatprep.subr.bf16.mxu1 %v10043_v35 }
 0x20b   : > { %8811 = vmatmul.mubr.bf16.gmra.mrb[28].mxu1 %v10856_v3 }
 0x20c   : > { %8814 = vmatprep.mubr.bf16.mxu1 %v10861_v38  ;;  %8843 = vmatpush3.bf16.msra.mxu1 %v10043_v35  ;;  %v2930_v35 = vmul.f32 %v12225_v30, %v10561_v58  ;;  %v12232_v58 = vld [vmem:[#allocation22_spill] sm:$0xff] }
 0x20d   : > { %8844 = vmatprep.subr.bf16.mxu1 %v10044_v16  ;;  %v2963_v6 = vpack.c.bf16 %v2934_v49, %v12232_v58  ;;  %v12240_v49 = vld [vmem:[#allocation24_spill] sm:$0xff]  ;;  %v12242_v58 = vld [vmem:[#allocation26_spill] sm:$0xff] }
 0x20e   : > { %v2961_v51 = vpack.c.bf16 %v2930_v35, %v12226_v12  ;;  %v2938_v35 = vmul.f32 %v12236_v36, %v12235_v25  ;;  %v12237_v12 = vld [vmem:[#allocation23_spill] sm:$0xff] }
 0x20f   : > { %v10050_v25 = vld [vmem:[%s12066_s3 + $0x1a8] sm:$0xff]  }
 0x210   : > { %8845 = vmatpush3.bf16.msra.mxu1 %v10044_v16  ;;  %v12228_v16 = vld [vmem:[#allocation13_spill] sm:$0xff] }
 0x211   : > { %8878 = vmatprep.subr.bf16.mxu1 %v10045_v7  ;;  %v2932_v44 = vmul.f32 %v12228_v16, %v12227_v59  ;;  %v12238_v59 = vld [vmem:[#allocation28_spill] sm:$0xff] }
 0x213   : > { %8815 = vmatmul.mubr.bf16.gmra.mrb[32].mxu1 %v10868_v0  ;;  %v2962_v60 = vpack.c.bf16 %v2932_v44, %v12231_v53  ;;  %v2965_v44 = vpack.c.bf16 %v2938_v35, %v12238_v59  ;;  %v2940_v53 = vmul.f32 %v12240_v49, %v12239_v40  ;;  %v12248_v40 = vld [vmem:[#allocation32_spill] sm:$0xff] }
 0x214   : > { %8818 = vmatprep.mubr.bf16.mxu1 %v10870_v50 }
 0x21b   : > { %8819 = vmatmul.mubr.bf16.gmra.mrb[36].mxu1 %v10874_v1 }
 0x21c   : > { %8822 = vmatprep.mubr.bf16.mxu1 %v10876_v62 }
 0x223   : > { %8823 = vmatmul.mubr.bf16.gmra.mrb[40].mxu1 %v10880_v31 }
 0x224   : > { %8826 = vmatprep.mubr.bf16.mxu1 %v10882_v24 }
 0x22b   : > { %8827 = vmatmul.mubr.bf16.gmra.mrb[44].mxu1 %v10888_v47 }
 0x22c   : > { %8846 = vmatprep.mubr.bf16.mxu1 %v2961_v51  ;;  %v2964_v51 = vpack.c.bf16 %v2936_v23, %v12237_v12  ;;  %v2966_v23 = vpack.c.bf16 %v2940_v53, %v12243_v14  ;;  %v12245_v12 = vld [vmem:[#allocation33_spill] sm:$0xff] }
 0x233   : > { %8847 = vmatmul.mubr.bf16.vlgmr.msra.gmra.mrb[16].mxu1 %v2962_v60  ;;  %v10049_v60 = vld [vmem:[%s12066_s3 + $0x1a0] sm:$0xff]  }
 0x234   : > { %8879 = vmatpush3.bf16.msra.mxu1 %v10045_v7  ;;  %8850 = vmatprep.mubr.bf16.mxu1 %v2963_v6  ;;  %v10048_v7 = vld [vmem:[%s12066_s3 + $0x198] sm:$0xff]  }
 0x235   : > { %8880 = vmatprep.subr.bf16.mxu1 %v10046_v27 }
 0x238   : > { %8881 = vmatpush3.bf16.msra.mxu1 %v10046_v27  ;;  %v12241_v27 = vld [vmem:[#allocation31_spill] sm:$0xff] }
 0x239   : > { %8882 = vmatprep.subr.bf16.mxu1 %v10047_v13  ;;  %v2942_v6 = vmul.f32 %v12242_v58, %v12241_v27  ;;  %v12249_v27 = vld [vmem:[#allocation35_spill] sm:$0xff] }
 0x23b   : > { %8851 = vmatmul.mubr.bf16.gmra.mrb[20].mxu1 %v2964_v51  ;;  %v12246_v51 = vld [vmem:[#allocation30_spill] sm:$0xff] }
 0x23c   : > { %8854 = vmatprep.mubr.bf16.mxu1 %v2965_v44  ;;  %8883 = vmatpush3.bf16.msra.mxu1 %v10047_v13  ;;  %v12244_v13 = vld [vmem:[#allocation34_spill] sm:$0xff]  ;;  %v2944_v59 = vmul.f32 %v12246_v51, %v12245_v12  ;;  %v12247_v44 = vld [vmem:[#allocation37_spill] sm:$0xff] }
 0x23d   : > { %8884 = vmatprep.subr.bf16.mxu1 %v10048_v7  ;;  %v2967_v35 = vpack.c.bf16 %v2942_v6, %v12244_v13  ;;  %v2946_v53 = vmul.f32 %v12248_v40, %v12247_v44  ;;  %v10052_v6 = vld [vmem:[%s12066_s3 + $0x1b8] sm:$0xff]   ;;  %v12251_v13 = vld [vmem:[#allocation39_spill] sm:$0xff] }
 0x23e   : > { %v2968_v14 = vpack.c.bf16 %v2944_v59, %v12249_v27  ;;  %v12253_v59 = vld [vmem:[#allocation38_spill] sm:$0xff]  ;;  %v12254_v27 = vld [vmem:[#allocation41_spill] sm:$0xff] }
 0x23f   : > { %v2950_v44 = vmul.f32 %v12253_v59, %v10696_v20  ;;  %v12259_v20 = vld [vmem:[#allocation46_spill] sm:$0xff] }
 0x240   : > { %8885 = vmatpush3.bf16.msra.mxu1 %v10048_v7  ;;  %v10051_v7 = vld [vmem:[%s12066_s3 + $0x1b0] sm:$0xff]  }
 0x241   : > { %8886 = vmatprep.subr.bf16.mxu1 %v10049_v60 }
 0x243   : > { %8855 = vmatmul.mubr.bf16.gmra.mrb[24].mxu1 %v2966_v23 }
 0x244   : > { %8858 = vmatprep.mubr.bf16.mxu1 %v2967_v35  ;;  %8887 = vmatpush3.bf16.msra.mxu1 %v10049_v60  ;;  %v12250_v60 = vld [vmem:[#allocation40_spill] sm:$0xff] }
 0x245   : > { %8888 = vmatprep.subr.bf16.mxu1 %v10050_v25  ;;  %v2969_v23 = vpack.c.bf16 %v2946_v53, %v12250_v60  ;;  %v12252_v35 = vld [vmem:[#allocation36_spill] sm:$0xff]  ;;  %v2971_v53 = vpack.c.bf16 %v2950_v44, %v10705_v63 }
 0x246   : > { %v2948_v12 = vmul.f32 %v12252_v35, %v12251_v13  ;;  %v12258_v35 = vld [vmem:[#allocation45_spill] sm:$0xff] }
 0x248   : > { %8889 = vmatpush3.bf16.msra.mxu1 %v10050_v25  ;;  %v10053_v25 = vld [vmem:[%s12066_s3 + $0x1c0] sm:$0xff]   ;;  %v2970_v40 = vpack.c.bf16 %v2948_v12, %v12254_v27  ;;  %v12260_v12 = vld [vmem:[#allocation47_spill] sm:$0xff]  ;;  %v10958_v27 = vld [vmem:[#allocation2 + $0x111] sm:$0xff] }
 0x249   : > { %8890 = vmatprep.subr.bf16.mxu1 %v10051_v7  ;;  %v2958_v63 = vmul.f32 %v12260_v12, %v10737_v26 }
 0x24b   : > { %8859 = vmatmul.mubr.bf16.gmra.mrb[28].mxu1 %v2968_v14  ;;  %v12256_v14 = vld [vmem:[#allocation42_spill] sm:$0xff]  ;;  %v2975_v44 = vpack.c.bf16 %v2958_v63, %v10741_v61  ;;  %v3236_v61 = vld [vmem:[#allocation2 + $0x2f] sm:$0xff] }
 0x24c   : > { %8862 = vmatprep.mubr.bf16.mxu1 %v2969_v23  ;;  %8891 = vmatpush3.bf16.msra.mxu1 %v10051_v7  ;;  %v12255_v7 = vld [vmem:[#allocation44_spill] sm:$0xff]  ;;  %v12257_v23 = vld [vmem:[#allocation43_spill] sm:$0xff] }
 0x24d   : > { %8892 = vmatprep.subr.bf16.mxu1 %v10052_v6  ;;  %v2952_v60 = vmul.f32 %v12256_v14, %v12255_v7  ;;  %v2954_v13 = vmul.f32 %v12257_v23, %v10717_v41  ;;  %v3235_v41 = vld [vmem:[#allocation2 + $0x27] sm:$0xff] }
 0x24e   : > { %v3239_v7 = vld [vmem:[#allocation2 + $0x47] sm:$0xff] }
 0x24f   : > { %v2972_v51 = vpack.c.bf16 %v2952_v60, %v12258_v35  ;;  %v2973_v58 = vpack.c.bf16 %v2954_v13, %v10726_v56  ;;  %v10142_v35 = vld [vmem:[#allocation2] sm:$0xff]  ;;  %v2960_v56 = vmul.f32 %v10735_v17, %v10958_v27 }
 0x250   : > { %8893 = vmatpush3.bf16.msra.mxu1 %v10052_v6  ;;  %v2956_v6 = vmul.f32 %v12259_v20, %v10722_v34  ;;  %v3267_v34 = vmul.f32 %v10356_v4, %v3235_v41  ;;  %v3238_v13 = vld [vmem:[#allocation2 + $0x3f] sm:$0xff] }
 0x251   : > { %8926 = vmatprep.subr.bf16.mxu1 %v10053_v25 }
 0x252   : > { %v3299_v26 = vpack.c.bf16 %v3236_v61, %v3267_v34  ;;  %v3242_v61 = vld [vmem:[#allocation2 + $0x5f] sm:$0xff] }
 0x253   : > { %8863 = vmatmul.mubr.bf16.gmra.mrb[32].mxu1 %v2970_v40  ;;  %v2974_v40 = vpack.c.bf16 %v2956_v6, %v10730_v48  ;;  %v3271_v6 = vmul.f32 %v10367_v39, %v3239_v7  ;;  %v3244_v7 = vld [vmem:[#allocation2 + $0x6f] sm:$0xff] }
 0x254   : > { %8866 = vmatprep.mubr.bf16.mxu1 %v2971_v53  ;;  %v10960_v53 = vpack.c.bf16 %v10142_v35, %v10142_v35  ;;  %v3241_v35 = vld [vmem:[#allocation2 + $0x57] sm:$0xff] }
 0x255   : > { %v3273_v34 = vmul.f32 %v10387_v52, %v3241_v35 }
 0x256   : > { %9038 = vmatprep.mubr.bf16.mxu0 %v10960_v53 }
 0x25b   : > { %8867 = vmatmul.mubr.bf16.gmra.mrb[36].mxu1 %v2972_v51  ;;  %v3237_v51 = vld [vmem:[#allocation2 + $0x37] sm:$0xff] }
 0x25c   : > { %8870 = vmatprep.mubr.bf16.mxu1 %v2973_v58  ;;  %v10964_v58 = vld [vmem:[#allocation2 + $0x109] sm:$0xff]  ;;  %v3269_v60 = vmul.f32 %v10362_v37, %v3237_v51  ;;  %v3302_v51 = vpack.c.bf16 %v3242_v61, %v3273_v34 }
 0x25d   : > { %v2976_v48 = vpack.c.bf16 %v2960_v56, %v10964_v58  ;;  %v3243_v56 = vld [vmem:[#allocation2 + $0x67] sm:$0xff] }
 0x25e   : > { %v3300_v63 = vpack.c.bf16 %v3238_v13, %v3269_v60  ;;  %v10056_v60 = vld [vmem:[%s12066_s3 + $0x1d8] sm:$0xff]   ;;  %v10058_v34 = vld [vmem:[%s12066_s3 + $0x1e8] sm:$0xff]  }
 0x25f   : > { %v3245_v13 = vld [vmem:[#allocation2 + $0x77] sm:$0xff] }
 0x263   : > { %8871 = vmatmul.mubr.bf16.gmra.mrb[40].mxu1 %v2974_v40  ;;  %v3240_v40 = vld [vmem:[#allocation2 + $0x4f] sm:$0xff] }
 0x264   : > { %8874 = vmatprep.mubr.bf16.mxu1 %v2975_v44  ;;  %v10054_v44 = vld [vmem:[%s12066_s3 + $0x1c8] sm:$0xff]   ;;  %v3301_v41 = vpack.c.bf16 %v3240_v40, %v3271_v6  ;;  %v10057_v40 = vld [vmem:[%s12066_s3 + $0x1e0] sm:$0xff]  }
 0x265   : > { %v3247_v6 = vld [vmem:[#allocation2 + $0x87] sm:$0xff] }
 0x26b   : > { %8875 = vmatmul.mubr.bf16.gmra.mrb[44].mxu1 %v2976_v48  ;;  %v10055_v48 = vld [vmem:[%s12066_s3 + $0x1d0] sm:$0xff]  }
 0x26c   : > { %8894 = vmatprep.mubr.bf16.mxu1 %v3299_v26  ;;  %v3275_v26 = vmul.f32 %v10392_v54, %v3243_v56  ;;  %v3248_v56 = vld [vmem:[#allocation2 + $0x8f] sm:$0xff] }
 0x273   : > { %8895 = vmatmul.mubr.bf16.vlgmr.msra.gmra.mrb[16].mxu1 %v3300_v63  ;;  %v3277_v63 = vmul.f32 %v10415_v5, %v3245_v13  ;;  %v3252_v13 = vld [vmem:[#allocation2 + $0xaf] sm:$0xff] }
 0x274   : > { %8927 = vmatpush3.bf16.msra.mxu1 %v10053_v25  ;;  %8898 = vmatprep.mubr.bf16.mxu1 %v3301_v41  ;;  %v3303_v25 = vpack.c.bf16 %v3244_v7, %v3275_v26  ;;  %v3279_v41 = vmul.f32 %v10420_v8, %v3247_v6  ;;  %v3251_v26 = vld [vmem:[#allocation2 + $0xa7] sm:$0xff]  ;;  %v10059_v7 = vld [vmem:[%s12066_s3 + $0x1f0] sm:$0xff]  }
 0x275   : > { %8928 = vmatprep.subr.bf16.mxu1 %v10054_v44 }
 0x276   : > { %v3305_v61 = vpack.c.bf16 %v3248_v56, %v3279_v41  ;;  %v3255_v41 = vld [vmem:[#allocation2 + $0xc7] sm:$0xff] }
 0x277   : > { %v10061_v56 = vld [vmem:[%s12066_s3 + $0x200] sm:$0xff]  }
 0x278   : > { %8929 = vmatpush3.bf16.msra.mxu1 %v10054_v44  ;;  %v3246_v44 = vld [vmem:[#allocation2 + $0x7f] sm:$0xff] }
 0x279   : > { %8930 = vmatprep.subr.bf16.mxu1 %v10055_v48  ;;  %v3304_v35 = vpack.c.bf16 %v3246_v44, %v3277_v63  ;;  %v10060_v63 = vld [vmem:[%s12066_s3 + $0x1f8] sm:$0xff]  }
 0x27b   : > { %8899 = vmatmul.mubr.bf16.gmra.mrb[20].mxu1 %v3302_v51 }
 0x27c   : > { %8902 = vmatprep.mubr.bf16.mxu1 %v3303_v25  ;;  %8931 = vmatpush3.bf16.msra.mxu1 %v10055_v48  ;;  %v3249_v48 = vld [vmem:[#allocation2 + $0x97] sm:$0xff]  ;;  %v3283_v25 = vmul.f32 %v10448_v29, %v3251_v26 }
 0x27d   : > { %8932 = vmatprep.subr.bf16.mxu1 %v10056_v60  ;;  %v3281_v51 = vmul.f32 %v10443_v22, %v3249_v48  ;;  %v3256_v48 = vld [vmem:[#allocation2 + $0xcf] sm:$0xff]  ;;  %v3261_v29 = vld [vmem:[#allocation2 + $0xf7] sm:$0xff] }
 0x27e   : > { %v3307_v44 = vpack.c.bf16 %v3252_v13, %v3283_v25  ;;  %v3259_v25 = vld [vmem:[#allocation2 + $0xe7] sm:$0xff]  ;;  %v3258_v13 = vld [vmem:[#allocation2 + $0xdf] sm:$0xff] }
 0x280   : > { %8933 = vmatpush3.bf16.msra.mxu1 %v10056_v60  ;;  %v3250_v60 = vld [vmem:[#allocation2 + $0x9f] sm:$0xff] }
 0x281   : > { %8934 = vmatprep.subr.bf16.mxu1 %v10057_v40  ;;  %v3306_v6 = vpack.c.bf16 %v3250_v60, %v3281_v51  ;;  %v3257_v60 = vld [vmem:[#allocation2 + $0xd7] sm:$0xff] }
 0x283   : > { %8903 = vmatmul.mubr.bf16.gmra.mrb[24].mxu1 %v3304_v35 }
 0x284   : > { %8906 = vmatprep.mubr.bf16.mxu1 %v3305_v61  ;;  %8935 = vmatpush3.bf16.msra.mxu1 %v10057_v40  ;;  %v3253_v40 = vld [vmem:[#allocation2 + $0xb7] sm:$0xff]  ;;  %v3287_v61 = vmul.f32 %v10476_v46, %v3255_v41  ;;  %v3262_v41 = vld [vmem:[#allocation2 + $0xff] sm:$0xff] }
 0x285   : > { %8936 = vmatprep.subr.bf16.mxu1 %v10058_v34  ;;  %v3285_v35 = vmul.f32 %v10471_v43, %v3253_v40 }
 0x286   : > { %v3309_v51 = vpack.c.bf16 %v3256_v48, %v3287_v61  ;;  %v3265_v48 = vld [vmem:[#allocation2 + $0x117] sm:$0xff] }
 0x288   : > { %8937 = vmatpush3.bf16.msra.mxu1 %v10058_v34  ;;  %v3254_v34 = vld [vmem:[#allocation2 + $0xbf] sm:$0xff] }
 0x289   : > { %8938 = vmatprep.subr.bf16.mxu1 %v10059_v7  ;;  %v3308_v26 = vpack.c.bf16 %v3254_v34, %v3285_v35  ;;  %v3295_v35 = vmul.f32 %v10526_v32, %v10813_v11  ;;  %v10071_v11 = vld [vmem:[%s12068_s5 + $0x50] sm:$0xff]  }
 0x28b   : > { %8907 = vmatmul.mubr.bf16.gmra.mrb[28].mxu1 %v3306_v6  ;;  %v3291_v6 = vmul.f32 %v10504_v10, %v3259_v25  ;;  %v3313_v61 = vpack.c.bf16 %v10817_v42, %v3295_v35  ;;  %v10062_v42 = vld [vmem:[%s12066_s3 + $0x208] sm:$0xff]   ;;  %v10072_v25 = vld [vmem:[%s12068_s5 + $0x58] sm:$0xff]  }
 0x28c   : > { %8910 = vmatprep.mubr.bf16.mxu1 %v3307_v44  ;;  %8939 = vmatpush3.bf16.msra.mxu1 %v10059_v7  ;;  %v3289_v7 = vmul.f32 %v10499_v2, %v3257_v60  ;;  %v3260_v44 = vld [vmem:[#allocation2 + $0xef] sm:$0xff] }
 0x28d   : > { %8940 = vmatprep.subr.bf16.mxu1 %v10060_v63  ;;  %v3311_v43 = vpack.c.bf16 %v3260_v44, %v3291_v6  ;;  %v3883_v6 = vld [vmem:[#allocation2 + $0x49] sm:$0xff]  ;;  %v3886_v44 = vld [vmem:[#allocation2 + $0x61] sm:$0xff] }
 0x28e   : > { %v3310_v40 = vpack.c.bf16 %v3258_v13, %v3289_v7  ;;  %v3882_v7 = vld [vmem:[#allocation2 + $0x41] sm:$0xff]  ;;  %v3884_v13 = vld [vmem:[#allocation2 + $0x51] sm:$0xff]  ;;  %v3887_v35 = vld [vmem:[#allocation2 + $0x69] sm:$0xff] }
 0x290   : > { %8941 = vmatpush3.bf16.msra.mxu1 %v10060_v63  ;;  %v3293_v63 = vmul.f32 %v10521_v28, %v3261_v29  ;;  %v10070_v29 = vld [vmem:[%s12068_s5 + $0x48] sm:$0xff]  }
 0x291   : > { %8974 = vmatprep.subr.bf16.mxu1 %v10061_v56 }
 0x292   : > { %v3312_v34 = vpack.c.bf16 %v3262_v41, %v3293_v63  ;;  %v3885_v41 = vld [vmem:[#allocation2 + $0x59] sm:$0xff] }
 0x293   : > { %8911 = vmatmul.mubr.bf16.gmra.mrb[32].mxu1 %v3308_v26  ;;  %v3297_v26 = vmul.f32 %v12224_v18, %v3265_v48  ;;  %v3892_v48 = vld [vmem:[#allocation2 + $0x91] sm:$0xff] }
 0x294   : > { %8914 = vmatprep.mubr.bf16.mxu1 %v3309_v51  ;;  %v3266_v51 = vld [vmem:[#allocation2 + $0x11f] sm:$0xff] }
 0x295   : > { %v3314_v60 = vpack.c.bf16 %v3266_v51, %v3297_v26  ;;  %v12261_v51 = vld [vmem:[#allocation26_spill] sm:$0xff] }
 0x29b   : > { %8915 = vmatmul.mubr.bf16.gmra.mrb[36].mxu1 %v3310_v40  ;;  %v3918_v40 = vmul.f32 %v12234_v9, %v3886_v44  ;;  %v3902_v44 = vld [vmem:[#allocation2 + $0xe1] sm:$0xff] }
 0x29c   : > { %8918 = vmatprep.mubr.bf16.mxu1 %v3311_v43  ;;  %v10069_v43 = vld [vmem:[%s12068_s5 + $0x40] sm:$0xff]  }
 0x29d   : > { %9022 = vmatprep.subr.bf16.mxu0 %v10069_v43 }
 0x29e   : > { %9023 = vmatpush3.bf16.msra.mxu0 %v10069_v43  ;;  %v3889_v43 = vld [vmem:[#allocation2 + $0x79] sm:$0xff] }
 0x29f   : > { %9024 = vmatprep.subr.bf16.mxu0 %v10070_v29 }
 0x2a2   : > { %9025 = vmatpush3.bf16.msra.mxu0 %v10070_v29 }
 0x2a3   : > { %8919 = vmatmul.mubr.bf16.gmra.mrb[40].mxu1 %v3312_v34  ;;  %9026 = vmatprep.subr.bf16.mxu0 %v10071_v11 }
 0x2a4   : > { %8922 = vmatprep.mubr.bf16.mxu1 %v3313_v61  ;;  %v3890_v61 = vld [vmem:[#allocation2 + $0x81] sm:$0xff] }
 0x2a5   : > { %v3922_v26 = vmul.f32 %v12240_v49, %v3890_v61  ;;  %v3906_v61 = vld [vmem:[#allocation2 + $0x101] sm:$0xff] }
 0x2a6   : > { %9027 = vmatpush3.bf16.msra.mxu0 %v10071_v11  ;;  %v3891_v11 = vld [vmem:[#allocation2 + $0x89] sm:$0xff] }
 0x2a7   : > { %9028 = vmatprep.subr.bf16.mxu0 %v10072_v25  ;;  %v3948_v29 = vpack.c.bf16 %v3922_v26, %v3889_v43  ;;  %v3905_v26 = vld [vmem:[#allocation2 + $0xf9] sm:$0xff]  ;;  %v3910_v43 = vld [vmem:[#allocation2 + $0x121] sm:$0xff] }
 0x2aa   : > { %9029 = vmatpush3.bf16.msra.mxu0 %v10072_v25  ;;  %v3894_v25 = vld [vmem:[#allocation2 + $0xa1] sm:$0xff] }
 0x2ab   : > { %8923 = vmatmul.mubr.bf16.gmra.mrb[44].mxu1 %v3314_v60  ;;  %v3924_v60 = vmul.f32 %v12261_v51, %v3892_v48  ;;  %v3938_v48 = vmul.f32 %v12259_v20, %v3906_v61 }
 0x2ac   : > { %8942 = vmatprep.mubr.bf16.mxu1 %v10820_v21  ;;  %v10063_v21 = vld [vmem:[%s12066_s3 + $0x210] sm:$0xff]  }
 0x2b3   : > { %8943 = vmatmul.mubr.bf16.vlgmr.msra.gmra.mrb[16].mxu1 %v10825_v55  ;;  %v10064_v55 = vld [vmem:[%s12066_s3 + $0x218] sm:$0xff]  }
 0x2b4   : > { %8975 = vmatpush3.bf16.msra.mxu1 %v10061_v56  ;;  %8946 = vmatprep.mubr.bf16.mxu1 %v10832_v15  ;;  %v10065_v15 = vld [vmem:[%s12066_s3 + $0x220] sm:$0xff]   ;;  %v10066_v56 = vld [vmem:[%s12066_s3 + $0x228] sm:$0xff]  }
 0x2b5   : > { %8976 = vmatprep.subr.bf16.mxu1 %v10062_v42 }
 0x2b8   : > { %8977 = vmatpush3.bf16.msra.mxu1 %v10062_v42  ;;  %v3949_v42 = vpack.c.bf16 %v3924_v60, %v3891_v11  ;;  %v3940_v60 = vmul.f32 %v12260_v12, %v10958_v27  ;;  %v10074_v27 = vld [vmem:[%s12068_s5 + $0x68] sm:$0xff]  }
 0x2b9   : > { %8978 = vmatprep.subr.bf16.mxu1 %v10063_v21 }
 0x2ba   : > { %v3957_v11 = vpack.c.bf16 %v3940_v60, %v10964_v58  ;;  %v10075_v58 = vld [vmem:[%s12068_s5 + $0x70] sm:$0xff]  }
 0x2bb   : > { %8947 = vmatmul.mubr.bf16.gmra.mrb[20].mxu1 %v10837_v19  ;;  %v10067_v19 = vld [vmem:[%s12066_s3 + $0x230] sm:$0xff]  }
 0x2bc   : > { %8950 = vmatprep.mubr.bf16.mxu1 %v10844_v45  ;;  %8979 = vmatpush3.bf16.msra.mxu1 %v10063_v21  ;;  %v10068_v45 = vld [vmem:[%s12066_s3 + $0x238] sm:$0xff]  }
 0x2bd   : > { %8980 = vmatprep.subr.bf16.mxu1 %v10064_v55  ;;  %v3896_v21 = vld [vmem:[#allocation2 + $0xb1] sm:$0xff] }
 0x2c0   : > { %8981 = vmatpush3.bf16.msra.mxu1 %v10064_v55  ;;  %v12262_v55 = vld [vmem:[#allocation30_spill] sm:$0xff] }
 0x2c1   : > { %8982 = vmatprep.subr.bf16.mxu1 %v10065_v15 }
 0x2c3   : > { %8951 = vmatmul.mubr.bf16.gmra.mrb[24].mxu1 %v10849_v57  ;;  %v3880_v57 = vld [vmem:[#allocation2 + $0x31] sm:$0xff] }
 0x2c4   : > { %8954 = vmatprep.mubr.bf16.mxu1 %v10856_v3  ;;  %8983 = vmatpush3.bf16.msra.mxu1 %v10065_v15  ;;  %v3912_v3 = vmul.f32 %v12225_v30, %v3880_v57  ;;  %v3926_v15 = vmul.f32 %v12262_v55, %v3894_v25  ;;  %v3895_v57 = vld [vmem:[#allocation2 + $0xa9] sm:$0xff]  ;;  %v3909_v25 = vld [vmem:[#allocation2 + $0x119] sm:$0xff] }
 0x2c5   : > { %8984 = vmatprep.subr.bf16.mxu1 %v10066_v56 }
 0x2c8   : > { %8985 = vmatpush3.bf16.msra.mxu1 %v10066_v56  ;;  %v3893_v56 = vld [vmem:[#allocation2 + $0x99] sm:$0xff] }
 0x2c9   : > { %8986 = vmatprep.subr.bf16.mxu1 %v10067_v19 }
 0x2cb   : > { %8955 = vmatmul.mubr.bf16.gmra.mrb[28].mxu1 %v10861_v38  ;;  %v3879_v38 = vld [vmem:[#allocation2 + $0x29] sm:$0xff] }
 0x2cc   : > { %8958 = vmatprep.mubr.bf16.mxu1 %v10868_v0  ;;  %8987 = vmatpush3.bf16.msra.mxu1 %v10067_v19  ;;  %v3943_v0 = vpack.c.bf16 %v3912_v3, %v3879_v38  ;;  %v12263_v19 = vld [vmem:[#allocation32_spill] sm:$0xff]  ;;  %v3950_v3 = vpack.c.bf16 %v3926_v15, %v3893_v56  ;;  %v10073_v15 = vld [vmem:[%s12068_s5 + $0x60] sm:$0xff]   ;;  %v10076_v56 = vld [vmem:[%s12068_s5 + $0x78] sm:$0xff]  }
 0x2cd   : > { %8988 = vmatprep.subr.bf16.mxu1 %v10068_v45  ;;  %9030 = vmatprep.subr.bf16.mxu0 %v10073_v15 }
 0x2ce   : > { %9031 = vmatpush3.bf16.msra.mxu0 %v10073_v15 }
 0x2cf   : > { %9032 = vmatprep.subr.bf16.mxu0 %v10074_v27 }
 0x2d0   : > { %8989 = vmatpush3.bf16.msra.mxu1 %v10068_v45  ;;  %v3928_v45 = vmul.f32 %v12263_v19, %v3896_v21 }
 0x2d2   : > { %v3951_v38 = vpack.c.bf16 %v3928_v45, %v3895_v57  ;;  %9033 = vmatpush3.bf16.msra.mxu0 %v10074_v27  ;;  %v10077_v45 = vld [vmem:[%s12068_s5] sm:$0xff]  }
 0x2d3   : > { %8959 = vmatmul.mubr.bf16.gmra.mrb[32].mxu1 %v10870_v50  ;;  %v3914_v50 = vmul.f32 %v12228_v16, %v3882_v7  ;;  %v3900_v7 = vld [vmem:[#allocation2 + $0xd1] sm:$0xff]  ;;  %9034 = vmatprep.subr.bf16.mxu0 %v10075_v58  ;;  %v11095_v57 = vld [vmem:[%s12067_s4] ss:$0 sm:$0xff] }
 0x2d4   : > { %8962 = vmatprep.mubr.bf16.mxu1 %v10874_v1  ;;  %v3916_v1 = vmul.f32 %v12230_v33, %v3884_v13  ;;  %v12264_v13 = vld [vmem:[#allocation36_spill] sm:$0xff] }
 0x2d6   : > { %9035 = vmatpush3.bf16.msra.mxu0 %v10075_v58 }
 0x2d7   : > { %9036 = vmatprep.subr.bf16.mxu0 %v10076_v56 }
 0x2da   : > { %9037 = vmatpush3.bf16.msra.mxu0 %v10076_v56  ;;  %v10080_v56 = vld [vmem:[%s12068_s5 + $0x18] sm:$0xff]  }
 0x2db   : > { %8963 = vmatmul.mubr.bf16.gmra.mrb[36].mxu1 %v10876_v62  ;;  %v3881_v62 = vld [vmem:[#allocation2 + $0x39] sm:$0xff]  ;;  %9070 = vmatprep.subr.bf16.mxu0 %v10077_v45 }
 0x2dc   : > { %8966 = vmatprep.mubr.bf16.mxu1 %v10880_v31  ;;  %v3944_v31 = vpack.c.bf16 %v3914_v50, %v3881_v62  ;;  %v3932_v62 = vmul.f32 %v12253_v59, %v3900_v7 }
 0x2e3   : > { %8967 = vmatmul.mubr.bf16.gmra.mrb[40].mxu1 %v10882_v24  ;;  %v3945_v24 = vpack.c.bf16 %v3916_v1, %v3883_v6  ;;  %v3897_v1 = vld [vmem:[#allocation2 + $0xb9] sm:$0xff] }
 0x2e4   : > { %8970 = vmatprep.mubr.bf16.mxu1 %v10888_v47  ;;  %v3888_v47 = vld [vmem:[#allocation2 + $0x71] sm:$0xff] }
 0x2e5   : > { %v3920_v63 = vmul.f32 %v12236_v36, %v3888_v47  ;;  %v3904_v47 = vld [vmem:[#allocation2 + $0xf1] sm:$0xff] }
 0x2e7   : > { %v3947_v34 = vpack.c.bf16 %v3920_v63, %v3887_v35  ;;  %v3901_v63 = vld [vmem:[#allocation2 + $0xd9] sm:$0xff] }
 0x2eb   : > { %8971 = vmatmul.mubr.bf16.gmra.mrb[44].mxu1 %v10960_v53  ;;  %v3946_v53 = vpack.c.bf16 %v3918_v40, %v3885_v41  ;;  %v3934_v40 = vmul.f32 %v12256_v14, %v3902_v44  ;;  %v3936_v41 = vmul.f32 %v12257_v23, %v3904_v47 }
 0x2ec   : > { %8990 = vmatprep.mubr.bf16.mxu1 %v3943_v0  ;;  %v3898_v0 = vld [vmem:[#allocation2 + $0xc1] sm:$0xff] }
 0x2ed   : > { %v3930_v50 = vmul.f32 %v12264_v13, %v3898_v0  ;;  %v3954_v35 = vpack.c.bf16 %v3934_v40, %v3901_v63 }
 0x2ef   : > { %v3952_v6 = vpack.c.bf16 %v3930_v50, %v3897_v1 }
 0x2f3   : > { %8991 = vmatmul.mubr.bf16.vlgmr.msra.gmra.mrb[16].mxu1 %v3944_v31  ;;  %v3899_v31 = vld [vmem:[#allocation2 + $0xc9] sm:$0xff] }
 0x2f4   : > { %8994 = vmatprep.mubr.bf16.mxu1 %v3945_v24  ;;  %v3953_v24 = vpack.c.bf16 %v3932_v62, %v3899_v31 }
 0x2fb   : > { %8995 = vmatmul.mubr.bf16.gmra.mrb[20].mxu1 %v3946_v53  ;;  %v3903_v53 = vld [vmem:[#allocation2 + $0xe9] sm:$0xff] }
 0x2fc   : > { %8998 = vmatprep.mubr.bf16.mxu1 %v3947_v34  ;;  %v3955_v34 = vpack.c.bf16 %v3936_v41, %v3903_v53  ;;  %v10078_v53 = vld [vmem:[%s12068_s5 + $0x8] sm:$0xff]  }
 0x303   : > { %8999 = vmatmul.mubr.bf16.gmra.mrb[24].mxu1 %v3948_v29  ;;  %v3956_v29 = vpack.c.bf16 %v3938_v48, %v3905_v26 }
 0x304   : > { %9002 = vmatprep.mubr.bf16.mxu1 %v3949_v42  ;;  %v3942_v42 = vmul.f32 %v10735_v17, %v3910_v43 }
 0x306   : > { %v3958_v21 = vpack.c.bf16 %v3942_v42, %v3909_v25  ;;  %v10079_v42 = vld [vmem:[%s12068_s5 + $0x10] sm:$0xff]  }
 0x30b   : > { %9003 = vmatmul.mubr.bf16.gmra.mrb[28].mxu1 %v3950_v3 }
 0x30c   : > { %9006 = vmatprep.mubr.bf16.mxu1 %v3951_v38 }
 0x313   : > { %9007 = vmatmul.mubr.bf16.gmra.mrb[32].mxu1 %v3952_v6 }
 0x314   : > { %9010 = vmatprep.mubr.bf16.mxu1 %v3953_v24 }
 0x31b   : > { %9011 = vmatmul.mubr.bf16.gmra.mrb[36].mxu1 %v3954_v35 }
 0x31c   : > { %9014 = vmatprep.mubr.bf16.mxu1 %v3955_v34 }
 0x323   : > { %9015 = vmatmul.mubr.bf16.gmra.mrb[40].mxu1 %v3956_v29 }
 0x324   : > { %9018 = vmatprep.mubr.bf16.mxu1 %v3957_v11 }
 0x32b   : > { %9019 = vmatmul.mubr.bf16.gmra.mrb[44].mxu1 %v3958_v21 }
 0x3c6   : > { %v8992_v3 = vpop.f32.mrb[16].mxu1 }
 0x3c7   : > { %v4226_v38 = vadd.f32 %v8992_v3, %v11095_v57  ;;  %v4058_v0 = vpop.f32.mrb[17].mxu1 }
 0x3c8   : > { %v4224_v7 = vadd.f32 %v11095_v57, %v4058_v0  ;;  %v8993_v50 = vpop.f32.mrb[18].mxu1 }
 0x3c9   : > { %v4258_v1 = vmax.f32 %v4226_v38, 0.0  ;;  %v4227_v62 = vadd.f32 %v8993_v50, %v11095_v57  ;;  %v4061_v31 = vpop.f32.mrb[19].mxu1 }
 0x3ca   : > { %v4256_v6 = vmax.f32 %v4224_v7, 0.0  ;;  %v4225_v24 = vadd.f32 %v11095_v57, %v4061_v31 }
 0x3cb   : > { %4290 = vst [vmem:[#allocation2 + $0x28] sm:$0xff] %v4258_v1  ;;  %v4259_v44 = vmax.f32 %v4227_v62, 0.0 }
 0x3cc   : > { %4288 = vst [vmem:[#allocation2 + $0x18] sm:$0xff] %v4256_v6  ;;  %v4257_v47 = vmax.f32 %v4225_v24, 0.0 }
 0x3cd   : > { %4291 = vst [vmem:[#allocation2 + $0x30] sm:$0xff] %v4259_v44  ;;  %v4450_v40 = vpack.c.bf16 %v4259_v44, %v4258_v1 }
 0x3ce   : > { %4289 = vst [vmem:[#allocation2 + $0x20] sm:$0xff] %v4257_v47  ;;  %v8996_v63 = vpop.f32.mrb[20].mxu1  ;;  %v4449_v41 = vpack.c.bf16 %v4257_v47, %v4256_v6  ;;  %v10081_v6 = vld [vmem:[%s12068_s5 + $0x20] sm:$0xff]  }
 0x3cf   : > { %v4230_v35 = vadd.f32 %v8996_v63, %v11095_v57  ;;  %v4074_v34 = vpop.f32.mrb[21].mxu1 }
 0x3d0   : > { %v4228_v61 = vadd.f32 %v11095_v57, %v4074_v34  ;;  %v8997_v48 = vpop.f32.mrb[22].mxu1  ;;  %9039 = vmatmul.mubr.bf16.vlgmr.msra.gmra.mrb[16].mxu0 %v4449_v41  ;;  %v10082_v41 = vld [vmem:[%s12068_s5 + $0x28] sm:$0xff]  }
 0x3d1   : > { %v4262_v26 = vmax.f32 %v4230_v35, 0.0  ;;  %v4231_v60 = vadd.f32 %v8997_v48, %v11095_v57  ;;  %v4077_v43 = vpop.f32.mrb[23].mxu1  ;;  %9071 = vmatpush3.bf16.msra.mxu0 %v10077_v45  ;;  %9042 = vmatprep.mubr.bf16.mxu0 %v4450_v40 }
 0x3d2   : > { %v4260_v29 = vmax.f32 %v4228_v61, 0.0  ;;  %v4229_v11 = vadd.f32 %v11095_v57, %v4077_v43  ;;  %9072 = vmatprep.subr.bf16.mxu0 %v10078_v53 }
 0x3d3   : > { %4294 = vst [vmem:[#allocation2 + $0x48] sm:$0xff] %v4262_v26  ;;  %v4263_v25 = vmax.f32 %v4231_v60, 0.0 }
 0x3d4   : > { %4292 = vst [vmem:[#allocation2 + $0x38] sm:$0xff] %v4260_v29  ;;  %v4261_v21 = vmax.f32 %v4229_v11, 0.0  ;;  %v10083_v11 = vld [vmem:[%s12068_s5 + $0x30] sm:$0xff]  }
 0x3d5   : > { %4295 = vst [vmem:[#allocation2 + $0x50] sm:$0xff] %v4263_v25  ;;  %9073 = vmatpush3.bf16.msra.mxu0 %v10078_v53  ;;  %v4452_v15 = vpack.c.bf16 %v4263_v25, %v4262_v26 }
 0x3d6   : > { %4293 = vst [vmem:[#allocation2 + $0x40] sm:$0xff] %v4261_v21  ;;  %v9000_v27 = vpop.f32.mrb[24].mxu1  ;;  %v4451_v58 = vpack.c.bf16 %v4261_v21, %v4260_v29  ;;  %9074 = vmatprep.subr.bf16.mxu0 %v10079_v42 }
 0x3d7   : > { %v4234_v45 = vadd.f32 %v9000_v27, %v11095_v57  ;;  %v4090_v3 = vpop.f32.mrb[25].mxu1 }
 0x3d8   : > { %v4232_v38 = vadd.f32 %v11095_v57, %v4090_v3  ;;  %v9001_v0 = vpop.f32.mrb[26].mxu1  ;;  %9043 = vmatmul.mubr.bf16.gmra.mrb[20].mxu0 %v4451_v58  ;;  %v10084_v58 = vld [vmem:[%s12068_s5 + $0x38] sm:$0xff]  }
 0x3d9   : > { %v4266_v7 = vmax.f32 %v4234_v45, 0.0  ;;  %v4235_v50 = vadd.f32 %v9001_v0, %v11095_v57  ;;  %v4093_v1 = vpop.f32.mrb[27].mxu1  ;;  %9046 = vmatprep.mubr.bf16.mxu0 %v4452_v15  ;;  %9075 = vmatpush3.bf16.msra.mxu0 %v10079_v42 }
 0x3da   : > { %v4264_v62 = vmax.f32 %v4232_v38, 0.0  ;;  %v4233_v31 = vadd.f32 %v11095_v57, %v4093_v1  ;;  %9076 = vmatprep.subr.bf16.mxu0 %v10080_v56 }
 0x3db   : > { %4298 = vst [vmem:[#allocation2 + $0x68] sm:$0xff] %v4266_v7  ;;  %v4267_v24 = vmax.f32 %v4235_v50, 0.0 }
 0x3dc   : > { %4296 = vst [vmem:[#allocation2 + $0x58] sm:$0xff] %v4264_v62  ;;  %v4265_v44 = vmax.f32 %v4233_v31, 0.0  ;;  %v11141_v31 = vld [vmem:[%s12068_s5 + $0x80] sm:$0xff]  }
 0x3dd   : > { %4299 = vst [vmem:[#allocation2 + $0x70] sm:$0xff] %v4267_v24  ;;  %v4454_v47 = vpack.c.bf16 %v4267_v24, %v4266_v7  ;;  %9077 = vmatpush3.bf16.msra.mxu0 %v10080_v56 }
 0x3de   : > { %4297 = vst [vmem:[#allocation2 + $0x60] sm:$0xff] %v4265_v44  ;;  %v9004_v40 = vpop.f32.mrb[28].mxu1  ;;  %v4453_v63 = vpack.c.bf16 %v4265_v44, %v4264_v62  ;;  %9078 = vmatprep.subr.bf16.mxu0 %v10081_v6 }
 0x3df   : > { %v4238_v53 = vadd.f32 %v9004_v40, %v11095_v57  ;;  %v4106_v35 = vpop.f32.mrb[29].mxu1 }
 0x3e0   : > { %v4236_v34 = vadd.f32 %v11095_v57, %v4106_v35  ;;  %v9005_v61 = vpop.f32.mrb[30].mxu1  ;;  %9047 = vmatmul.mubr.bf16.gmra.mrb[24].mxu0 %v4453_v63 }
 0x3e1   : > { %v4270_v48 = vmax.f32 %v4238_v53, 0.0  ;;  %v4239_v26 = vadd.f32 %v9005_v61, %v11095_v57  ;;  %v4109_v60 = vpop.f32.mrb[31].mxu1  ;;  %9050 = vmatprep.mubr.bf16.mxu0 %v4454_v47  ;;  %9079 = vmatpush3.bf16.msra.mxu0 %v10081_v6 }
 0x3e2   : > { %v4268_v43 = vmax.f32 %v4236_v34, 0.0  ;;  %v4237_v29 = vadd.f32 %v11095_v57, %v4109_v60  ;;  %9080 = vmatprep.subr.bf16.mxu0 %v10082_v41 }
 0x3e3   : > { %4302 = vst [vmem:[#allocation2 + $0x88] sm:$0xff] %v4270_v48  ;;  %v4271_v42 = vmax.f32 %v4239_v26, 0.0 }
 0x3e4   : > { %4300 = vst [vmem:[#allocation2 + $0x78] sm:$0xff] %v4268_v43  ;;  %v4269_v25 = vmax.f32 %v4237_v29, 0.0 }
 0x3e5   : > { %4303 = vst [vmem:[#allocation2 + $0x90] sm:$0xff] %v4271_v42  ;;  %v4456_v21 = vpack.c.bf16 %v4271_v42, %v4270_v48  ;;  %9081 = vmatpush3.bf16.msra.mxu0 %v10082_v41 }
 0x3e6   : > { %4301 = vst [vmem:[#allocation2 + $0x80] sm:$0xff] %v4269_v25  ;;  %v9008_v15 = vpop.f32.mrb[32].mxu1  ;;  %v4455_v27 = vpack.c.bf16 %v4269_v25, %v4268_v43  ;;  %9082 = vmatprep.subr.bf16.mxu0 %v10083_v11 }
 0x3e7   : > { %v4242_v56 = vadd.f32 %v9008_v15, %v11095_v57  ;;  %v4122_v45 = vpop.f32.mrb[33].mxu1 }
 0x3e8   : > { %v4240_v3 = vadd.f32 %v11095_v57, %v4122_v45  ;;  %v9009_v38 = vpop.f32.mrb[34].mxu1  ;;  %9051 = vmatmul.mubr.bf16.gmra.mrb[28].mxu0 %v4455_v27 }
 0x3e9   : > { %v4274_v0 = vmax.f32 %v4242_v56, 0.0  ;;  %v4243_v7 = vadd.f32 %v9009_v38, %v11095_v57  ;;  %v4125_v50 = vpop.f32.mrb[35].mxu1  ;;  %9054 = vmatprep.mubr.bf16.mxu0 %v4456_v21  ;;  %9083 = vmatpush3.bf16.msra.mxu0 %v10083_v11 }
 0x3ea   : > { %v4272_v1 = vmax.f32 %v4240_v3, 0.0  ;;  %v4241_v62 = vadd.f32 %v11095_v57, %v4125_v50  ;;  %9084 = vmatprep.subr.bf16.mxu0 %v10084_v58 }
 0x3eb   : > { %4306 = vst [vmem:[#allocation2 + $0xa8] sm:$0xff] %v4274_v0  ;;  %v4275_v6 = vmax.f32 %v4243_v7, 0.0 }
 0x3ec   : > { %4304 = vst [vmem:[#allocation2 + $0x98] sm:$0xff] %v4272_v1  ;;  %v4273_v24 = vmax.f32 %v4241_v62, 0.0 }
 0x3ed   : > { %4307 = vst [vmem:[#allocation2 + $0xb0] sm:$0xff] %v4275_v6  ;;  %v4458_v44 = vpack.c.bf16 %v4275_v6, %v4274_v0  ;;  %9085 = vmatpush3.bf16.msra.mxu0 %v10084_v58 }
 0x3ee   : > { %4305 = vst [vmem:[#allocation2 + $0xa0] sm:$0xff] %v4273_v24  ;;  %v9012_v47 = vpop.f32.mrb[36].mxu1  ;;  %v4457_v40 = vpack.c.bf16 %v4273_v24, %v4272_v1  ;;  %9118 = vmatprep.subr.bf16.mxu0 %v11141_v31  ;;  %v4320_v24 = vld [vmem:[#allocation2 + $0x7] sm:$0xff] }
 0x3ef   : > { %v4246_v63 = vadd.f32 %v9012_v47, %v11095_v57  ;;  %v4138_v41 = vpop.f32.mrb[37].mxu1 }
 0x3f0   : > { %v4244_v53 = vadd.f32 %v11095_v57, %v4138_v41  ;;  %v9013_v35 = vpop.f32.mrb[38].mxu1  ;;  %9055 = vmatmul.mubr.bf16.gmra.mrb[32].mxu0 %v4457_v40 }
 0x3f1   : > { %v4278_v34 = vmax.f32 %v4246_v63, 0.0  ;;  %v4247_v61 = vadd.f32 %v9013_v35, %v11095_v57  ;;  %v4141_v48 = vpop.f32.mrb[39].mxu1  ;;  %9058 = vmatprep.mubr.bf16.mxu0 %v4458_v44 }
 0x3f2   : > { %v4276_v26 = vmax.f32 %v4244_v53, 0.0  ;;  %v4245_v60 = vadd.f32 %v11095_v57, %v4141_v48 }
 0x3f3   : > { %4310 = vst [vmem:[#allocation2 + $0xc8] sm:$0xff] %v4278_v34  ;;  %v4279_v43 = vmax.f32 %v4247_v61, 0.0 }
 0x3f4   : > { %4308 = vst [vmem:[#allocation2 + $0xb8] sm:$0xff] %v4276_v26  ;;  %v11148_v29 = vmax.f32 %v4245_v60, 0.0 }
 0x3f5   : > { %4311 = vst [vmem:[#allocation2 + $0xd0] sm:$0xff] %v4279_v43  ;;  %v4460_v11 = vpack.c.bf16 %v4279_v43, %v4278_v34  ;;  %v4352_v34 = vmul.f32 %v10356_v4, %v4320_v24  ;;  %v11200_v24 = vld [vmem:[#allocation2 + $0x3f] sm:$0xff] }
 0x3f6   : > { %12265 = vst [vmem:[#allocation16_spill] sm:$0xff] %v11148_v29  ;;  %4309 = vst [vmem:[#allocation2 + $0xc0] sm:$0xff] %v11148_v29  ;;  %v9016_v42 = vpop.f32.mrb[40].mxu1  ;;  %v4459_v25 = vpack.c.bf16 %v11148_v29, %v4276_v26  ;;  %v4321_v26 = vld [vmem:[#allocation2 + $0xf] sm:$0xff] }
 0x3f7   : > { %v4250_v21 = vadd.f32 %v9016_v42, %v11095_v57  ;;  %v4154_v15 = vpop.f32.mrb[41].mxu1 }
 0x3f8   : > { %v4248_v27 = vadd.f32 %v11095_v57, %v4154_v15  ;;  %v9017_v58 = vpop.f32.mrb[42].mxu1  ;;  %9059 = vmatmul.mubr.bf16.gmra.mrb[36].mxu0 %v4459_v25  ;;  %v11175_v15 = vld [vmem:[#allocation2 + $0x27] sm:$0xff] }
 0x3f9   : > { %v4282_v56 = vmax.f32 %v4250_v21, 0.0  ;;  %v4251_v45 = vadd.f32 %v9017_v58, %v11095_v57  ;;  %v4157_v3 = vpop.f32.mrb[43].mxu1  ;;  %9062 = vmatprep.mubr.bf16.mxu0 %v4460_v11  ;;  %v4384_v11 = vpack.c.bf16 %v4321_v26, %v4352_v34  ;;  %v11172_v21 = vld [vmem:[#allocation2 + $0x17] sm:$0xff]  ;;  %v4356_v58 = vmul.f32 %v10367_v39, %v11175_v15  ;;  %v10089_v34 = vld [vmem:[%s12068_s5 + $0xa0] sm:$0xff]  }
 0x3fa   : > { %v4280_v38 = vmax.f32 %v4248_v27, 0.0  ;;  %v4249_v0 = vadd.f32 %v11095_v57, %v4157_v3  ;;  %v11179_v27 = vld [vmem:[#allocation2 + $0x1f] sm:$0xff]  ;;  %v10086_v3 = vld [vmem:[%s12068_s5 + $0x88] sm:$0xff]  }
 0x3fb   : > { %4314 = vst [vmem:[#allocation2 + $0xe8] sm:$0xff] %v4282_v56  ;;  %v11156_v7 = vmax.f32 %v4251_v45, 0.0  ;;  %v11184_v45 = vld [vmem:[#allocation2 + $0x2f] sm:$0xff] }
 0x3fc   : > { %4312 = vst [vmem:[#allocation2 + $0xd8] sm:$0xff] %v4280_v38  ;;  %v4281_v50 = vmax.f32 %v4249_v0, 0.0  ;;  %v11190_v0 = vld [vmem:[#allocation2 + $0x37] sm:$0xff] }
 0x3fd   : > { %12266 = vst [vmem:[#allocation15_spill] sm:$0xff] %v11156_v7  ;;  %4315 = vst [vmem:[#allocation2 + $0xf0] sm:$0xff] %v11156_v7  ;;  %v4462_v1 = vpack.c.bf16 %v11156_v7, %v4282_v56  ;;  %v11274_v7 = vld [vmem:[#allocation2 + $0xbf] sm:$0xff] }
 0x3fe   : > { %4313 = vst [vmem:[#allocation2 + $0xe0] sm:$0xff] %v4281_v50  ;;  %v9020_v62 = vpop.f32.mrb[44].mxu1  ;;  %v11160_v6 = vpack.c.bf16 %v4281_v50, %v4280_v38  ;;  %v4386_v38 = vpack.c.bf16 %v11184_v45, %v4356_v58  ;;  %v11192_v50 = vld [vmem:[#allocation2 + $0x47] sm:$0xff]  ;;  %12273 = vst [vmem:[#allocation25_spill] sm:$0xff] %v11274_v7 }
 0x3ff   : > { %v4254_v44 = vadd.f32 %v9020_v62, %v11095_v57  ;;  %v4170_v47 = vpop.f32.mrb[45].mxu1  ;;  %v10087_v62 = vld [vmem:[%s12068_s5 + $0x90] sm:$0xff]   ;;  %v11233_v58 = vld [vmem:[#allocation2 + $0x87] sm:$0xff] }
 0x400   : > { %12267 = vst [vmem:[#allocation19_spill] sm:$0xff] %v11160_v6  ;;  %v4252_v40 = vadd.f32 %v11095_v57, %v4170_v47  ;;  %v9021_v63 = vpop.f32.mrb[46].mxu1  ;;  %9063 = vmatmul.mubr.bf16.gmra.mrb[40].mxu0 %v11160_v6  ;;  %v11279_v6 = vld [vmem:[#allocation2 + $0xcf] sm:$0xff] }
 0x401   : > { %v4286_v41 = vmax.f32 %v4254_v44, 0.0  ;;  %v4255_v53 = vadd.f32 %v9021_v63, %v11095_v57  ;;  %v4173_v35 = vpop.f32.mrb[47].mxu1  ;;  %9066 = vmatprep.mubr.bf16.mxu0 %v4462_v1  ;;  %v4358_v1 = vmul.f32 %v10387_v52, %v11190_v0  ;;  %v4360_v44 = vmul.f32 %v10392_v54, %v11192_v50  ;;  %12274 = vst [vmem:[#allocation23_spill] sm:$0xff] %v11279_v6 }
 0x402   : > { %v4284_v61 = vmax.f32 %v4252_v40, 0.0  ;;  %v4253_v48 = vadd.f32 %v11095_v57, %v4173_v35  ;;  %v4354_v57 = vmul.f32 %v10362_v37, %v11172_v21  ;;  %v11205_v40 = vld [vmem:[#allocation2 + $0x4f] sm:$0xff] }
 0x403   : > { %4318 = vst [vmem:[#allocation2 + $0x108] sm:$0xff] %v4286_v41  ;;  %v4287_v60 = vmax.f32 %v4255_v53, 0.0  ;;  %v4387_v47 = vpack.c.bf16 %v11200_v24, %v4358_v1  ;;  %v4388_v63 = vpack.c.bf16 %v11205_v40, %v4360_v44  ;;  %v11213_v53 = vld [vmem:[#allocation2 + $0x67] sm:$0xff]  ;;  %v12270_v1 = vld [vmem:[#allocation5_spill] sm:$0xff] }
 0x404   : > { %4316 = vst [vmem:[#allocation2 + $0xf8] sm:$0xff] %v4284_v61  ;;  %v4285_v43 = vmax.f32 %v4253_v48, 0.0  ;;  %v4385_v56 = vpack.c.bf16 %v11179_v27, %v4354_v57  ;;  %v4364_v48 = vmul.f32 %v10420_v8, %v11213_v53  ;;  %v11231_v57 = vld [vmem:[#allocation2 + $0x77] sm:$0xff] }
 0x405   : > { %4319 = vst [vmem:[#allocation2 + $0x110] sm:$0xff] %v4287_v60  ;;  %v11168_v42 = vpack.c.bf16 %v4287_v60, %v4286_v41  ;;  %v11211_v41 = vld [vmem:[#allocation2 + $0x57] sm:$0xff]  ;;  %v11225_v60 = vld [vmem:[#allocation2 + $0x6f] sm:$0xff] }
 0x406   : > { %4317 = vst [vmem:[#allocation2 + $0x100] sm:$0xff] %v4285_v43  ;;  %v11170_v25 = vpack.c.bf16 %v4285_v43, %v4284_v61  ;;  %v4362_v35 = vmul.f32 %v10415_v5, %v11211_v41  ;;  %v11220_v61 = vld [vmem:[#allocation2 + $0x5f] sm:$0xff]  ;;  %v10090_v43 = vld [vmem:[%s12068_s5 + $0xa8] sm:$0xff]   ;;  %v11282_v29 = vld [vmem:[#allocation2 + $0xd7] sm:$0xff] }
 0x407   : > { %12268 = vst [vmem:[#allocation17_spill] sm:$0xff] %v11168_v42  ;;  %v11270_v42 = vld [vmem:[#allocation2 + $0xc7] sm:$0xff]  ;;  %12275 = vst [vmem:[#allocation28_spill] sm:$0xff] %v11282_v29 }
 0x408   : > { %12269 = vst [vmem:[#allocation22_spill] sm:$0xff] %v11170_v25  ;;  %9067 = vmatmul.mubr.bf16.gmra.mrb[44].mxu0 %v11170_v25  ;;  %v4389_v26 = vpack.c.bf16 %v11220_v61, %v4362_v35  ;;  %v11251_v35 = vld [vmem:[#allocation2 + $0x97] sm:$0xff]  ;;  %12272 = vst [vmem:[#allocation21_spill] sm:$0xff] %v11270_v42 }
 0x409   : > { %9086 = vmatprep.mubr.bf16.mxu0 %v4384_v11  ;;  %v4390_v11 = vpack.c.bf16 %v11225_v60, %v4364_v48  ;;  %v12271_v48 = vld [vmem:[#allocation6_spill] sm:$0xff] }
 0x410   : > { %9087 = vmatmul.mubr.bf16.vlgmr.msra.gmra.mrb[16].mxu0 %v4385_v56  ;;  %v4366_v56 = vmul.f32 %v10443_v22, %v11231_v57 }
 0x411   : > { %9119 = vmatpush3.bf16.msra.mxu0 %v11141_v31  ;;  %9090 = vmatprep.mubr.bf16.mxu0 %v4386_v38  ;;  %v10088_v31 = vld [vmem:[%s12068_s5 + $0x98] sm:$0xff]  }
 0x412   : > { %9120 = vmatprep.subr.bf16.mxu0 %v10086_v3  ;;  %v11240_v38 = vld [vmem:[#allocation2 + $0x7f] sm:$0xff] }
 0x413   : > { %v4391_v44 = vpack.c.bf16 %v11240_v38, %v4366_v56 }
 0x415   : > { %9121 = vmatpush3.bf16.msra.mxu0 %v10086_v3  ;;  %v10091_v3 = vld [vmem:[%s12068_s5 + $0xb0] sm:$0xff]  }
 0x416   : > { %9122 = vmatprep.subr.bf16.mxu0 %v10087_v62 }
 0x418   : > { %9091 = vmatmul.mubr.bf16.gmra.mrb[20].mxu0 %v4387_v47  ;;  %v11245_v47 = vld [vmem:[#allocation2 + $0x8f] sm:$0xff] }
 0x419   : > { %9094 = vmatprep.mubr.bf16.mxu0 %v4388_v63  ;;  %9123 = vmatpush3.bf16.msra.mxu0 %v10087_v62  ;;  %v4368_v62 = vmul.f32 %v12270_v1, %v11233_v58 }
 0x41a   : > { %9124 = vmatprep.subr.bf16.mxu0 %v10088_v31 }
 0x41b   : > { %v4392_v63 = vpack.c.bf16 %v11245_v47, %v4368_v62 }
 0x41d   : > { %9125 = vmatpush3.bf16.msra.mxu0 %v10088_v31  ;;  %v10092_v31 = vld [vmem:[%s12068_s5 + $0xb8] sm:$0xff]  }
 0x41e   : > { %9126 = vmatprep.subr.bf16.mxu0 %v10089_v34 }
 0x420   : > { %9095 = vmatmul.mubr.bf16.gmra.mrb[24].mxu0 %v4389_v26  ;;  %v4370_v26 = vmul.f32 %v12271_v48, %v11251_v35 }
 0x421   : > { %9098 = vmatprep.mubr.bf16.mxu0 %v4390_v11  ;;  %9127 = vmatpush3.bf16.msra.mxu0 %v10089_v34  ;;  %v11253_v34 = vld [vmem:[#allocation2 + $0xa7] sm:$0xff]  ;;  %v11260_v11 = vld [vmem:[#allocation2 + $0x9f] sm:$0xff] }
 0x422   : > { %9128 = vmatprep.subr.bf16.mxu0 %v10090_v43  ;;  %v4372_v56 = vmul.f32 %v10476_v46, %v11253_v34  ;;  %v4393_v62 = vpack.c.bf16 %v11260_v11, %v4370_v26 }
 0x425   : > { %9129 = vmatpush3.bf16.msra.mxu0 %v10090_v43  ;;  %v10093_v43 = vld [vmem:[%s12068_s5 + $0xc0] sm:$0xff]  }
 0x426   : > { %9130 = vmatprep.subr.bf16.mxu0 %v10091_v3 }
 0x428   : > { %9099 = vmatmul.mubr.bf16.gmra.mrb[28].mxu0 %v4391_v44  ;;  %v11265_v44 = vld [vmem:[#allocation2 + $0xaf] sm:$0xff] }
 0x429   : > { %9102 = vmatprep.mubr.bf16.mxu0 %v4392_v63  ;;  %9131 = vmatpush3.bf16.msra.mxu0 %v10091_v3  ;;  %v4394_v3 = vpack.c.bf16 %v11265_v44, %v4372_v56  ;;  %v11268_v63 = vld [vmem:[#allocation2 + $0xb7] sm:$0xff] }
 0x42a   : > { %9132 = vmatprep.subr.bf16.mxu0 %v10092_v31  ;;  %v4374_v25 = vmul.f32 %v10499_v2, %v11268_v63  ;;  %v11288_v2 = vld [vmem:[#allocation2 + $0xdf] sm:$0xff] }
 0x42c   : > { %v4395_v26 = vpack.c.bf16 %v11274_v7, %v4374_v25  ;;  %v4899_v7 = vld [vmem:[#allocation2 + $0x9] sm:$0xff] }
 0x42d   : > { %9133 = vmatpush3.bf16.msra.mxu0 %v10092_v31  ;;  %v4376_v31 = vmul.f32 %v10504_v10, %v11270_v42  ;;  %v11293_v42 = vld [vmem:[#allocation2 + $0xef] sm:$0xff] }
 0x42e   : > { %9166 = vmatprep.subr.bf16.mxu0 %v10093_v43 }
 0x42f   : > { %v4396_v56 = vpack.c.bf16 %v11279_v6, %v4376_v31  ;;  %v11296_v6 = vld [vmem:[#allocation2 + $0xf7] sm:$0xff] }
 0x430   : > { %9103 = vmatmul.mubr.bf16.gmra.mrb[32].mxu0 %v4393_v62  ;;  %v11284_v62 = vld [vmem:[#allocation2 + $0xe7] sm:$0xff] }
 0x431   : > { %9106 = vmatprep.mubr.bf16.mxu0 %v4394_v3  ;;  %12276 = vst [vmem:[#allocation27_spill] sm:$0xff] %v11284_v62  ;;  %v4378_v3 = vmul.f32 %v10521_v28, %v11282_v29  ;;  %v4380_v10 = vmul.f32 %v10526_v32, %v11284_v62  ;;  %v11300_v28 = vld [vmem:[#allocation2 + $0xff] sm:$0xff] }
 0x432   : > { %v11304_v62 = vld [vmem:[#allocation2 + $0x21] sm:$0xff] }
 0x433   : > { %v4397_v25 = vpack.c.bf16 %v11288_v2, %v4378_v3  ;;  %v4398_v31 = vpack.c.bf16 %v11293_v42, %v4380_v10  ;;  %v11306_v10 = vld [vmem:[#allocation2 + $0x31] sm:$0xff] }
 0x438   : > { %9107 = vmatmul.mubr.bf16.gmra.mrb[36].mxu0 %v4395_v26  ;;  %v4900_v26 = vld [vmem:[#allocation2 + $0x11] sm:$0xff] }
 0x439   : > { %9110 = vmatprep.mubr.bf16.mxu0 %v4396_v56  ;;  %v4382_v56 = vmul.f32 %v12224_v18, %v11296_v6  ;;  %v4932_v29 = vmul.f32 %v12225_v30, %v4900_v26  ;;  %v11312_v18 = vld [vmem:[#allocation2 + $0x19] sm:$0xff]  ;;  %v11315_v30 = vld [vmem:[#allocation2 + $0x29] sm:$0xff] }
 0x43a   : > { %12277 = vst [vmem:[#allocation31_spill] sm:$0xff] %v11315_v30 }
 0x43b   : > { %v4399_v32 = vpack.c.bf16 %v11300_v28, %v4382_v56  ;;  %v4963_v3 = vpack.c.bf16 %v4932_v29, %v4899_v7  ;;  %v10094_v29 = vld [vmem:[%s12068_s5 + $0xc8] sm:$0xff]   ;;  %v11323_v56 = vld [vmem:[#allocation2 + $0x51] sm:$0xff] }
 0x43c   : > { %v11321_v7 = vld [vmem:[#allocation2 + $0x41] sm:$0xff]  ;;  %12278 = vst [vmem:[#allocation29_spill] sm:$0xff] %v11323_v56 }
 0x440   : > { %9111 = vmatmul.mubr.bf16.gmra.mrb[40].mxu0 %v4397_v25  ;;  %v4934_v25 = vmul.f32 %v12228_v16, %v11304_v62  ;;  %v11332_v16 = vld [vmem:[#allocation2 + $0x39] sm:$0xff] }
 0x441   : > { %9114 = vmatprep.mubr.bf16.mxu0 %v4398_v31  ;;  %v4936_v31 = vmul.f32 %v12230_v33, %v11306_v10  ;;  %v4940_v33 = vmul.f32 %v12236_v36, %v11323_v56  ;;  %v11352_v56 = vld [vmem:[#allocation2 + $0x59] sm:$0xff] }
 0x442   : > { %v4964_v26 = vpack.c.bf16 %v4934_v25, %v11312_v18  ;;  %v10095_v25 = vld [vmem:[%s12068_s5 + $0xd0] sm:$0xff]  }
 0x448   : > { %9115 = vmatmul.mubr.bf16.gmra.mrb[44].mxu0 %v4399_v32  ;;  %v4965_v32 = vpack.c.bf16 %v4936_v31, %v11315_v30  ;;  %v11343_v30 = vld [vmem:[#allocation2 + $0x71] sm:$0xff] }
 0x449   : > { %9134 = vmatprep.mubr.bf16.mxu0 %v4963_v3  ;;  %v4938_v3 = vmul.f32 %v12234_v9, %v11321_v7  ;;  %v11341_v9 = vld [vmem:[#allocation2 + $0x61] sm:$0xff]  ;;  %12280 = vst [vmem:[#allocation33_spill] sm:$0xff] %v11343_v30  ;;  %v4944_v36 = vmul.f32 %v12261_v51, %v11343_v30  ;;  %v11372_v30 = vld [vmem:[#allocation2 + $0x79] sm:$0xff] }
 0x44b   : > { %v4966_v31 = vpack.c.bf16 %v4938_v3, %v11332_v16  ;;  %v10097_v3 = vld [vmem:[%s12068_s5 + $0xe0] sm:$0xff]  }
 0x450   : > { %9135 = vmatmul.mubr.bf16.vlgmr.msra.gmra.mrb[16].mxu0 %v4964_v26  ;;  %v11335_v26 = vld [vmem:[#allocation2 + $0x49] sm:$0xff] }
 0x451   : > { %9167 = vmatpush3.bf16.msra.mxu0 %v10093_v43  ;;  %9138 = vmatprep.mubr.bf16.mxu0 %v4965_v32  ;;  %12279 = vst [vmem:[#allocation34_spill] sm:$0xff] %v11335_v26  ;;  %v10096_v43 = vld [vmem:[%s12068_s5 + $0xd8] sm:$0xff]   ;;  %v4967_v32 = vpack.c.bf16 %v4940_v33, %v11335_v26 }
 0x452   : > { %9168 = vmatprep.subr.bf16.mxu0 %v10094_v29  ;;  %v11363_v26 = vld [vmem:[#allocation2 + $0x91] sm:$0xff] }
 0x453   : > { %12282 = vst [vmem:[#allocation35_spill] sm:$0xff] %v11363_v26  ;;  %v4948_v51 = vmul.f32 %v12263_v19, %v11363_v26  ;;  %v11392_v26 = vld [vmem:[#allocation2 + $0x99] sm:$0xff] }
 0x455   : > { %9169 = vmatpush3.bf16.msra.mxu0 %v10094_v29  ;;  %v4942_v29 = vmul.f32 %v12240_v49, %v11341_v9  ;;  %v11361_v49 = vld [vmem:[#allocation2 + $0x81] sm:$0xff] }
 0x456   : > { %9170 = vmatprep.subr.bf16.mxu0 %v10095_v25 }
 0x457   : > { %v4968_v33 = vpack.c.bf16 %v4942_v29, %v11352_v56  ;;  %v10099_v29 = vld [vmem:[%s12068_s5 + $0xf0] sm:$0xff]  }
 0x458   : > { %9139 = vmatmul.mubr.bf16.gmra.mrb[20].mxu0 %v4966_v31  ;;  %v11355_v31 = vld [vmem:[#allocation2 + $0x69] sm:$0xff] }
 0x459   : > { %9142 = vmatprep.mubr.bf16.mxu0 %v4967_v32  ;;  %9171 = vmatpush3.bf16.msra.mxu0 %v10095_v25  ;;  %12281 = vst [vmem:[#allocation37_spill] sm:$0xff] %v11355_v31  ;;  %v10098_v25 = vld [vmem:[%s12068_s5 + $0xe8] sm:$0xff]   ;;  %v4969_v32 = vpack.c.bf16 %v4944_v36, %v11355_v31  ;;  %v11383_v31 = vld [vmem:[#allocation2 + $0xb1] sm:$0xff] }
 0x45a   : > { %9172 = vmatprep.subr.bf16.mxu0 %v10096_v43  ;;  %12284 = vst [vmem:[#allocation39_spill] sm:$0xff] %v11383_v31  ;;  %v4952_v19 = vmul.f32 %v12253_v59, %v11383_v31  ;;  %v11409_v31 = vld [vmem:[#allocation2 + $0xc9] sm:$0xff] }
 0x45b   : > { %12287 = vst [vmem:[#allocation45_spill] sm:$0xff] %v11409_v31 }
 0x45d   : > { %9173 = vmatpush3.bf16.msra.mxu0 %v10096_v43  ;;  %v4946_v43 = vmul.f32 %v12262_v55, %v11361_v49  ;;  %v11381_v55 = vld [vmem:[#allocation2 + $0xa1] sm:$0xff] }
 0x45e   : > { %9174 = vmatprep.subr.bf16.mxu0 %v10097_v3 }
 0x45f   : > { %v4970_v36 = vpack.c.bf16 %v4946_v43, %v11372_v30  ;;  %v10101_v43 = vld [vmem:[%s12068_s5 + $0x100] sm:$0xff]  }
 0x460   : > { %9143 = vmatmul.mubr.bf16.gmra.mrb[24].mxu0 %v4968_v33  ;;  %v11375_v33 = vld [vmem:[#allocation2 + $0x89] sm:$0xff] }
 0x461   : > { %9146 = vmatprep.mubr.bf16.mxu0 %v4969_v32  ;;  %9175 = vmatpush3.bf16.msra.mxu0 %v10097_v3  ;;  %12283 = vst [vmem:[#allocation40_spill] sm:$0xff] %v11375_v33  ;;  %v10100_v3 = vld [vmem:[%s12068_s5 + $0xf8] sm:$0xff]   ;;  %v4971_v32 = vpack.c.bf16 %v4948_v51, %v11375_v33 }
 0x462   : > { %9176 = vmatprep.subr.bf16.mxu0 %v10098_v25 }
 0x465   : > { %9177 = vmatpush3.bf16.msra.mxu0 %v10098_v25  ;;  %v4950_v25 = vmul.f32 %v12264_v13, %v11381_v55  ;;  %v11400_v13 = vld [vmem:[#allocation2 + $0xd1] sm:$0xff] }
 0x466   : > { %9178 = vmatprep.subr.bf16.mxu0 %v10099_v29  ;;  %12286 = vst [vmem:[#allocation44_spill] sm:$0xff] %v11400_v13  ;;  %v4956_v59 = vmul.f32 %v12257_v23, %v11400_v13  ;;  %v11423_v13 = vld [vmem:[#allocation2 + $0xe9] sm:$0xff] }
 0x467   : > { %v4972_v51 = vpack.c.bf16 %v4950_v25, %v11392_v26 }
 0x468   : > { %9147 = vmatmul.mubr.bf16.gmra.mrb[28].mxu0 %v4970_v36  ;;  %v11395_v36 = vld [vmem:[#allocation2 + $0xa9] sm:$0xff] }
 0x469   : > { %9150 = vmatprep.mubr.bf16.mxu0 %v4971_v32  ;;  %9179 = vmatpush3.bf16.msra.mxu0 %v10099_v29  ;;  %12285 = vst [vmem:[#allocation41_spill] sm:$0xff] %v11395_v36  ;;  %v4973_v29 = vpack.c.bf16 %v4952_v19, %v11395_v36  ;;  %v11398_v32 = vld [vmem:[#allocation2 + $0xc1] sm:$0xff]  ;;  %v4975_v19 = vpack.c.bf16 %v4956_v59, %v11409_v31 }
 0x46a   : > { %9180 = vmatprep.subr.bf16.mxu0 %v10100_v3  ;;  %v4954_v33 = vmul.f32 %v12256_v14, %v11398_v32  ;;  %v11412_v36 = vld [vmem:[#allocation2 + $0xe1] sm:$0xff]  ;;  %v11420_v14 = vld [vmem:[#allocation2 + $0xd9] sm:$0xff] }
 0x46b   : > { %v11426_v31 = vld [vmem:[#allocation2 + $0x101] sm:$0xff] }
 0x46d   : > { %9181 = vmatpush3.bf16.msra.mxu0 %v10100_v3  ;;  %v11406_v3 = vld [vmem:[#allocation2 + $0xb9] sm:$0xff] }
 0x46e   : > { %9214 = vmatprep.subr.bf16.mxu0 %v10101_v43  ;;  %v4974_v25 = vpack.c.bf16 %v4954_v33, %v11406_v3 }
 0x470   : > { %9151 = vmatmul.mubr.bf16.gmra.mrb[32].mxu0 %v4972_v51  ;;  %v11414_v51 = vld [vmem:[#allocation2 + $0xf1] sm:$0xff] }
 0x471   : > { %9154 = vmatprep.mubr.bf16.mxu0 %v4973_v29  ;;  %v4958_v29 = vmul.f32 %v12259_v20, %v11412_v36  ;;  %v4960_v23 = vmul.f32 %v12260_v12, %v11414_v51  ;;  %v11432_v20 = vld [vmem:[#allocation2 + $0xf9] sm:$0xff] }
 0x473   : > { %v4976_v33 = vpack.c.bf16 %v4958_v29, %v11420_v14  ;;  %v4977_v59 = vpack.c.bf16 %v4960_v23, %v11423_v13  ;;  %v5271_v23 = vmul.f32 %v10362_v37, %v11175_v15  ;;  %v10103_v15 = vld [vmem:[%s12068_s5 + $0x110] sm:$0xff]  }
 0x478   : > { %9155 = vmatmul.mubr.bf16.gmra.mrb[36].mxu0 %v4974_v25  ;;  %v4962_v25 = vmul.f32 %v10735_v17, %v11426_v31 }
 0x479   : > { %9158 = vmatprep.mubr.bf16.mxu0 %v4975_v19  ;;  %v5269_v19 = vmul.f32 %v10356_v4, %v11172_v21  ;;  %v10102_v21 = vld [vmem:[%s12068_s5 + $0x108] sm:$0xff]  }
 0x47a   : > { %v4978_v12 = vpack.c.bf16 %v4962_v25, %v11432_v20 }
 0x47b   : > { %v5301_v29 = vpack.c.bf16 %v11179_v27, %v5269_v19  ;;  %v5277_v27 = vmul.f32 %v10392_v54, %v11211_v41 }
 0x480   : > { %9159 = vmatmul.mubr.bf16.gmra.mrb[40].mxu0 %v4976_v33  ;;  %v5273_v33 = vmul.f32 %v10367_v39, %v11190_v0  ;;  %v10104_v0 = vld [vmem:[%s12068_s5 + $0x118] sm:$0xff]  }
 0x481   : > { %9162 = vmatprep.mubr.bf16.mxu0 %v4977_v59  ;;  %v5302_v59 = vpack.c.bf16 %v11184_v45, %v5271_v23  ;;  %v12288_v23 = vld [vmem:[#allocation25_spill] sm:$0xff] }
 0x482   : > { %v5303_v4 = vpack.c.bf16 %v11200_v24, %v5273_v33  ;;  %v10105_v24 = vld [vmem:[%s12068_s5 + $0x120] sm:$0xff]   ;;  %v12289_v33 = vld [vmem:[#allocation21_spill] sm:$0xff] }
 0x488   : > { %9163 = vmatmul.mubr.bf16.gmra.mrb[44].mxu0 %v4978_v12  ;;  %v5275_v12 = vmul.f32 %v10387_v52, %v11192_v50  ;;  %v5279_v50 = vmul.f32 %v10415_v5, %v11213_v53  ;;  %v5283_v53 = vmul.f32 %v10443_v22, %v11233_v58  ;;  %v5287_v58 = vmul.f32 %v12271_v48, %v11253_v34  ;;  %v12291_v34 = vld [vmem:[#allocation28_spill] sm:$0xff] }
 0x489   : > { %9182 = vmatprep.mubr.bf16.mxu0 %v5301_v29 }
 0x48a   : > { %v5304_v45 = vpack.c.bf16 %v11205_v40, %v5275_v12  ;;  %v5281_v40 = vmul.f32 %v10420_v8, %v11231_v57  ;;  %v5306_v41 = vpack.c.bf16 %v11225_v60, %v5279_v50  ;;  %v10107_v57 = vld [vmem:[%s12068_s5 + $0x130] sm:$0xff]   ;;  %v5285_v60 = vmul.f32 %v12270_v1, %v11251_v35  ;;  %v10109_v35 = vld [vmem:[%s12068_s5 + $0x140] sm:$0xff]  }
 0x48b   : > { %v5308_v25 = vpack.c.bf16 %v11245_v47, %v5283_v53  ;;  %v5289_v47 = vmul.f32 %v10476_v46, %v11268_v63  ;;  %v5310_v29 = vpack.c.bf16 %v11265_v44, %v5287_v58  ;;  %v12292_v12 = vld [vmem:[#allocation8_spill] sm:$0xff]  ;;  %v12294_v63 = vld [vmem:[#allocation27_spill] sm:$0xff]  ;;  %v12296_v50 = vld [vmem:[#allocation10_spill] sm:$0xff] }
 0x48c   : > { %v5309_v19 = vpack.c.bf16 %v11260_v11, %v5285_v60  ;;  %v5579_v58 = vld [vmem:[#allocation2 + $0x38] sm:$0xff] }
 0x48d   : > { %v5311_v11 = vpack.c.bf16 %v12288_v23, %v5289_v47  ;;  %v10110_v47 = vld [vmem:[%s12068_s5 + $0x148] sm:$0xff]   ;;  %v10111_v23 = vld [vmem:[%s12068_s5 + $0x150] sm:$0xff]  }
 0x490   : > { %9183 = vmatmul.mubr.bf16.vlgmr.msra.gmra.mrb[16].mxu0 %v5302_v59  ;;  %v12290_v59 = vld [vmem:[#allocation7_spill] sm:$0xff] }
 0x491   : > { %9215 = vmatpush3.bf16.msra.mxu0 %v10101_v43  ;;  %9186 = vmatprep.mubr.bf16.mxu0 %v5303_v4  ;;  %v5305_v4 = vpack.c.bf16 %v11220_v61, %v5277_v27  ;;  %v10106_v61 = vld [vmem:[%s12068_s5 + $0x128] sm:$0xff]   ;;  %v5307_v43 = vpack.c.bf16 %v11240_v38, %v5281_v40  ;;  %v10108_v38 = vld [vmem:[%s12068_s5 + $0x138] sm:$0xff]  }
 0x492   : > { %9216 = vmatprep.subr.bf16.mxu0 %v10102_v21  ;;  %v12293_v27 = vld [vmem:[#allocation23_spill] sm:$0xff] }
 0x495   : > { %9217 = vmatpush3.bf16.msra.mxu0 %v10102_v21  ;;  %v5291_v21 = vmul.f32 %v12290_v59, %v12289_v33  ;;  %v5584_v33 = vld [vmem:[#allocation2 + $0x60] sm:$0xff] }
 0x496   : > { %9218 = vmatprep.subr.bf16.mxu0 %v10103_v15 }
 0x498   : > { %9187 = vmatmul.mubr.bf16.gmra.mrb[20].mxu0 %v5304_v45  ;;  %v5312_v45 = vpack.c.bf16 %v12293_v27, %v5291_v21  ;;  %v5581_v21 = vld [vmem:[#allocation2 + $0x48] sm:$0xff]  ;;  %v10112_v27 = vld [vmem:[%s12068_s5 + $0x158] sm:$0xff]  }
 0x499   : > { %9190 = vmatprep.mubr.bf16.mxu0 %v5305_v4  ;;  %9219 = vmatpush3.bf16.msra.mxu0 %v10103_v15  ;;  %v5293_v15 = vmul.f32 %v12292_v12, %v12291_v34  ;;  %v12295_v4 = vld [vmem:[#allocation9_spill] sm:$0xff] }
 0x49a   : > { %9220 = vmatprep.subr.bf16.mxu0 %v10104_v0  ;;  %v5295_v44 = vmul.f32 %v12295_v4, %v12294_v63  ;;  %v5588_v63 = vld [vmem:[#allocation2 + $0x80] sm:$0xff] }
 0x49c   : > { %v5314_v40 = vpack.c.bf16 %v11293_v42, %v5295_v44  ;;  %v5580_v42 = vld [vmem:[#allocation2 + $0x40] sm:$0xff]  ;;  %v5585_v44 = vld [vmem:[#allocation2 + $0x68] sm:$0xff] }
 0x49d   : > { %9221 = vmatpush3.bf16.msra.mxu0 %v10104_v0  ;;  %v5313_v0 = vpack.c.bf16 %v11288_v2, %v5293_v15  ;;  %v5576_v2 = vld [vmem:[#allocation2 + $0x20] sm:$0xff]  ;;  %v5583_v15 = vld [vmem:[#allocation2 + $0x58] sm:$0xff] }
 0x49e   : > { %9222 = vmatprep.subr.bf16.mxu0 %v10105_v24 }
 0x4a0   : > { %9191 = vmatmul.mubr.bf16.gmra.mrb[24].mxu0 %v5306_v41 }
 0x4a1   : > { %9194 = vmatprep.mubr.bf16.mxu0 %v5307_v43  ;;  %9223 = vmatpush3.bf16.msra.mxu0 %v10105_v24  ;;  %v5297_v24 = vmul.f32 %v12296_v50, %v11296_v6  ;;  %v12297_v43 = vld [vmem:[#allocation11_spill] sm:$0xff]  ;;  %v5578_v6 = vld [vmem:[#allocation2 + $0x30] sm:$0xff] }
 0x4a2   : > { %9224 = vmatprep.subr.bf16.mxu0 %v10106_v61 }
 0x4a3   : > { %v5315_v41 = vpack.c.bf16 %v11300_v28, %v5297_v24 }
 0x4a5   : > { %9225 = vmatpush3.bf16.msra.mxu0 %v10106_v61  ;;  %v11502_v61 = vld [vmem:[#allocation2 + $0x107] sm:$0xff] }
 0x4a6   : > { %9226 = vmatprep.subr.bf16.mxu0 %v10107_v57  ;;  %v5299_v53 = vmul.f32 %v12297_v43, %v11502_v61 }
 0x4a8   : > { %9195 = vmatmul.mubr.bf16.gmra.mrb[28].mxu0 %v5308_v25  ;;  %v5575_v25 = vld [vmem:[#allocation2 + $0x18] sm:$0xff] }
 0x4a9   : > { %9198 = vmatprep.mubr.bf16.mxu0 %v5309_v19  ;;  %9227 = vmatpush3.bf16.msra.mxu0 %v10107_v57  ;;  %v11506_v57 = vld [vmem:[#allocation2 + $0x10f] sm:$0xff] }
 0x4aa   : > { %9228 = vmatprep.subr.bf16.mxu0 %v10108_v38  ;;  %v5316_v60 = vpack.c.bf16 %v11506_v57, %v5299_v53  ;;  %v5577_v19 = vld [vmem:[#allocation2 + $0x28] sm:$0xff] }
 0x4ab   : > { %v11509_v28 = vpack.c.bf16 %v5578_v6, %v5577_v19  ;;  %v10116_v19 = vld [vmem:[%s12068_s5 + $0x178] sm:$0xff]  }
 0x4ad   : > { %9229 = vmatpush3.bf16.msra.mxu0 %v10108_v38  ;;  %v5607_v38 = vpack.c.bf16 %v5576_v2, %v5575_v25  ;;  %v10115_v2 = vld [vmem:[%s12068_s5 + $0x170] sm:$0xff]   ;;  %v5592_v25 = vld [vmem:[#allocation2 + $0xa0] sm:$0xff] }
 0x4ae   : > { %9262 = vmatprep.subr.bf16.mxu0 %v10109_v35 }
 0x4b0   : > { %9199 = vmatmul.mubr.bf16.gmra.mrb[32].mxu0 %v5310_v29  ;;  %v11514_v29 = vpack.c.bf16 %v5580_v42, %v5579_v58  ;;  %v5591_v42 = vld [vmem:[#allocation2 + $0x98] sm:$0xff] }
 0x4b1   : > { %9202 = vmatprep.mubr.bf16.mxu0 %v5311_v11  ;;  %v5582_v11 = vld [vmem:[#allocation2 + $0x50] sm:$0xff]  ;;  %v11550_v58 = vpack.c.bf16 %v5592_v25, %v5591_v42 }
 0x4b2   : > { %v11521_v34 = vpack.c.bf16 %v5582_v11, %v5581_v21  ;;  %v11557_v11 = vld [vmem:[#allocation2 + $0xb8] sm:$0xff]  ;;  %v12302_v25 = vld [vmem:[#allocation12_spill] sm:$0xff] }
 0x4b8   : > { %9203 = vmatmul.mubr.bf16.gmra.mrb[36].mxu0 %v5312_v45  ;;  %v10113_v45 = vld [vmem:[%s12068_s5 + $0x160] sm:$0xff]  }
 0x4b9   : > { %9206 = vmatprep.mubr.bf16.mxu0 %v5313_v0  ;;  %v5586_v0 = vld [vmem:[#allocation2 + $0x70] sm:$0xff] }
 0x4ba   : > { %v11533_v24 = vpack.c.bf16 %v5586_v0, %v5585_v44  ;;  %v5597_v0 = vld [vmem:[#allocation2 + $0xc8] sm:$0xff] }
 0x4bb   : > { %v12299_v44 = vld [vmem:[#allocation19_spill] sm:$0xff] }
 0x4c0   : > { %9207 = vmatmul.mubr.bf16.gmra.mrb[40].mxu0 %v5314_v40  ;;  %v5587_v40 = vld [vmem:[#allocation2 + $0x78] sm:$0xff] }
 0x4c1   : > { %9210 = vmatprep.mubr.bf16.mxu0 %v5315_v41  ;;  %v10114_v41 = vld [vmem:[%s12068_s5 + $0x168] sm:$0xff]   ;;  %v11538_v53 = vpack.c.bf16 %v5588_v63, %v5587_v40 }
 0x4c2   : > { %v11568_v40 = vld [vmem:[#allocation2 + $0xe8] sm:$0xff] }
 0x4c8   : > { %9211 = vmatmul.mubr.bf16.gmra.mrb[44].mxu0 %v5316_v60  ;;  %v5590_v60 = vld [vmem:[#allocation2 + $0x90] sm:$0xff] }
 0x4c9   : > { %9230 = vmatprep.mubr.bf16.mxu0 %v5607_v38  ;;  %v5589_v38 = vld [vmem:[#allocation2 + $0x88] sm:$0xff] }
 0x4ca   : > { %v11545_v6 = vpack.c.bf16 %v5590_v60, %v5589_v38  ;;  %v12301_v60 = vld [vmem:[#allocation22_spill] sm:$0xff]  ;;  %v5914_v38 = vmul.f32 %v12302_v25, %v11304_v62 }
 0x4cb   : > { %v12308_v62 = vld [vmem:[#allocation18_spill] sm:$0xff] }
 0x4cc   : > { %v5945_v42 = vpack.c.bf16 %v5914_v38, %v11312_v18  ;;  %v12307_v18 = vld [vmem:[#allocation29_spill] sm:$0xff]  ;;  %v12310_v38 = vld [vmem:[#allocation34_spill] sm:$0xff] }
 0x4d0   : > { %9231 = vmatmul.mubr.bf16.vlgmr.msra.gmra.mrb[16].mxu0 %v11509_v28 }
 0x4d1   : > { %9263 = vmatpush3.bf16.msra.mxu0 %v10109_v35  ;;  %9234 = vmatprep.mubr.bf16.mxu0 %v11514_v29  ;;  %v11526_v35 = vpack.c.bf16 %v5584_v33, %v5583_v15  ;;  %v5593_v33 = vld [vmem:[#allocation2 + $0xa8] sm:$0xff]  ;;  %v12298_v15 = vld [vmem:[#allocation16_spill] sm:$0xff] }
 0x4d2   : > { %9264 = vmatprep.subr.bf16.mxu0 %v10110_v47 }
 0x4d5   : > { %9265 = vmatpush3.bf16.msra.mxu0 %v10110_v47  ;;  %v10117_v47 = vld [vmem:[%s12068_s5 + $0x180] sm:$0xff]  }
 0x4d6   : > { %9266 = vmatprep.subr.bf16.mxu0 %v10111_v23 }
 0x4d8   : > { %9235 = vmatmul.mubr.bf16.gmra.mrb[20].mxu0 %v11521_v34 }
 0x4d9   : > { %9238 = vmatprep.mubr.bf16.mxu0 %v11526_v35  ;;  %9267 = vmatpush3.bf16.msra.mxu0 %v10111_v23  ;;  %v5594_v23 = vld [vmem:[#allocation2 + $0xb0] sm:$0xff] }
 0x4da   : > { %9268 = vmatprep.subr.bf16.mxu0 %v10112_v27  ;;  %v11559_v21 = vpack.c.bf16 %v5594_v23, %v5593_v33  ;;  %v12304_v23 = vld [vmem:[#allocation13_spill] sm:$0xff] }
 0x4db   : > { %v5916_v33 = vmul.f32 %v12304_v23, %v11306_v10  ;;  %v10119_v10 = vld [vmem:[%s12068_s5 + $0x190] sm:$0xff]  }
 0x4dd   : > { %9269 = vmatpush3.bf16.msra.mxu0 %v10112_v27  ;;  %v5617_v27 = vpack.c.bf16 %v12298_v15, %v11557_v11  ;;  %v12305_v15 = vld [vmem:[#allocation14_spill] sm:$0xff] }
 0x4de   : > { %9270 = vmatprep.subr.bf16.mxu0 %v10113_v45 }
 0x4e0   : > { %9239 = vmatmul.mubr.bf16.gmra.mrb[24].mxu0 %v11533_v24 }
 0x4e1   : > { %9242 = vmatprep.mubr.bf16.mxu0 %v11538_v53  ;;  %9271 = vmatpush3.bf16.msra.mxu0 %v10113_v45  ;;  %v5598_v45 = vld [vmem:[#allocation2 + $0xd0] sm:$0xff] }
 0x4e2   : > { %9272 = vmatprep.subr.bf16.mxu0 %v10114_v41  ;;  %v11564_v63 = vpack.c.bf16 %v5598_v45, %v5597_v0  ;;  %v12306_v45 = vld [vmem:[#allocation31_spill] sm:$0xff] }
 0x4e3   : > { %v5946_v0 = vpack.c.bf16 %v5916_v33, %v12306_v45  ;;  %v12312_v33 = vld [vmem:[#allocation24_spill] sm:$0xff]  ;;  %v12313_v45 = vld [vmem:[#allocation26_spill] sm:$0xff] }
 0x4e5   : > { %9273 = vmatpush3.bf16.msra.mxu0 %v10114_v41  ;;  %v12300_v41 = vld [vmem:[#allocation15_spill] sm:$0xff] }
 0x4e6   : > { %9274 = vmatprep.subr.bf16.mxu0 %v10115_v2 }
 0x4e8   : > { %9243 = vmatmul.mubr.bf16.gmra.mrb[28].mxu0 %v11545_v6 }
 0x4e9   : > { %9246 = vmatprep.mubr.bf16.mxu0 %v11550_v58  ;;  %9275 = vmatpush3.bf16.msra.mxu0 %v10115_v2  ;;  %v5620_v2 = vpack.c.bf16 %v12300_v41, %v11568_v40 }
 0x4ea   : > { %9276 = vmatprep.subr.bf16.mxu0 %v10116_v19 }
 0x4ed   : > { %9277 = vmatpush3.bf16.msra.mxu0 %v10116_v19  ;;  %v12303_v19 = vld [vmem:[#allocation17_spill] sm:$0xff] }
 0x4ee   : > { %9310 = vmatprep.subr.bf16.mxu0 %v10117_v47 }
 0x4f0   : > { %9247 = vmatmul.mubr.bf16.gmra.mrb[32].mxu0 %v11559_v21 }
 0x4f1   : > { %9250 = vmatprep.mubr.bf16.mxu0 %v5617_v27  ;;  %v5918_v27 = vmul.f32 %v12305_v15, %v11321_v7  ;;  %v12309_v7 = vld [vmem:[#allocation20_spill] sm:$0xff] }
 0x4f3   : > { %v5947_v41 = vpack.c.bf16 %v5918_v27, %v11332_v16  ;;  %v10120_v16 = vld [vmem:[%s12068_s5 + $0x198] sm:$0xff]  }
 0x4f8   : > { %9251 = vmatmul.mubr.bf16.gmra.mrb[36].mxu0 %v11564_v63 }
 0x4f9   : > { %9254 = vmatprep.mubr.bf16.mxu0 %v12299_v44  ;;  %v10118_v44 = vld [vmem:[%s12068_s5 + $0x188] sm:$0xff]  }
 0x500   : > { %9255 = vmatmul.mubr.bf16.gmra.mrb[40].mxu0 %v5620_v2  ;;  %v5920_v2 = vmul.f32 %v12308_v62, %v12307_v18 }
 0x501   : > { %9258 = vmatprep.mubr.bf16.mxu0 %v12301_v60  ;;  %v5922_v60 = vmul.f32 %v12309_v7, %v11341_v9  ;;  %v10121_v9 = vld [vmem:[%s12068_s5 + $0x1a0] sm:$0xff]  }
 0x508   : > { %9259 = vmatmul.mubr.bf16.gmra.mrb[44].mxu0 %v12303_v19  ;;  %v12311_v19 = vld [vmem:[#allocation33_spill] sm:$0xff] }
 0x509   : > { %9278 = vmatprep.mubr.bf16.mxu0 %v5945_v42  ;;  %v5948_v42 = vpack.c.bf16 %v5920_v2, %v12310_v38  ;;  %v5924_v27 = vmul.f32 %v12312_v33, %v12311_v19  ;;  %v12315_v2 = vld [vmem:[#allocation35_spill] sm:$0xff]  ;;  %v12317_v38 = vld [vmem:[#allocation32_spill] sm:$0xff] }
 0x510   : > { %9279 = vmatmul.mubr.bf16.vlgmr.msra.gmra.mrb[16].mxu0 %v5946_v0  ;;  %v5926_v0 = vmul.f32 %v12313_v45, %v11361_v49  ;;  %v10123_v49 = vld [vmem:[%s12068_s5 + $0x1b0] sm:$0xff]  }
 0x511   : > { %9311 = vmatpush3.bf16.msra.mxu0 %v10117_v47  ;;  %9282 = vmatprep.mubr.bf16.mxu0 %v5947_v41  ;;  %v5949_v47 = vpack.c.bf16 %v5922_v60, %v11352_v56  ;;  %v10122_v56 = vld [vmem:[%s12068_s5 + $0x1a8] sm:$0xff]  }
 0x512   : > { %9312 = vmatprep.subr.bf16.mxu0 %v10118_v44  ;;  %v5951_v18 = vpack.c.bf16 %v5926_v0, %v11372_v30  ;;  %v10124_v30 = vld [vmem:[%s12068_s5 + $0x1b8] sm:$0xff]  }
 0x515   : > { %9313 = vmatpush3.bf16.msra.mxu0 %v10118_v44  ;;  %v12314_v44 = vld [vmem:[#allocation37_spill] sm:$0xff] }
 0x516   : > { %9314 = vmatprep.subr.bf16.mxu0 %v10119_v10  ;;  %v5950_v41 = vpack.c.bf16 %v5924_v27, %v12314_v44  ;;  %v12319_v27 = vld [vmem:[#allocation39_spill] sm:$0xff]  ;;  %v12321_v44 = vld [vmem:[#allocation38_spill] sm:$0xff] }
 0x518   : > { %9283 = vmatmul.mubr.bf16.gmra.mrb[20].mxu0 %v5948_v42  ;;  %v5930_v42 = vmul.f32 %v12317_v38, %v11381_v55  ;;  %v10125_v55 = vld [vmem:[%s12068_s5 + $0x1c0] sm:$0xff]  }
 0x519   : > { %9286 = vmatprep.mubr.bf16.mxu0 %v5949_v47  ;;  %9315 = vmatpush3.bf16.msra.mxu0 %v10119_v10  ;;  %v12316_v10 = vld [vmem:[#allocation30_spill] sm:$0xff] }
 0x51a   : > { %9316 = vmatprep.subr.bf16.mxu0 %v10120_v16  ;;  %v5928_v60 = vmul.f32 %v12316_v10, %v12315_v2  ;;  %v5953_v19 = vpack.c.bf16 %v5930_v42, %v11392_v26  ;;  %v12323_v2 = vld [vmem:[#allocation44_spill] sm:$0xff]  ;;  %v12325_v42 = vld [vmem:[#allocation43_spill] sm:$0xff] }
 0x51d   : > { %9317 = vmatpush3.bf16.msra.mxu0 %v10120_v16  ;;  %v12318_v16 = vld [vmem:[#allocation40_spill] sm:$0xff] }
 0x51e   : > { %9318 = vmatprep.subr.bf16.mxu0 %v10121_v9  ;;  %v5952_v47 = vpack.c.bf16 %v5928_v60, %v12318_v16  ;;  %v12324_v60 = vld [vmem:[#allocation42_spill] sm:$0xff]  ;;  %v5938_v16 = vmul.f32 %v12325_v42, %v11412_v36 }
 0x51f   : > { %v6219_v36 = vld [vmem:[#allocation2 + $0x27] sm:$0xff] }
 0x520   : > { %9287 = vmatmul.mubr.bf16.gmra.mrb[24].mxu0 %v5950_v41  ;;  %v5934_v41 = vmul.f32 %v12321_v44, %v11398_v32  ;;  %v12327_v32 = vld [vmem:[#allocation46_spill] sm:$0xff] }
 0x521   : > { %9290 = vmatprep.mubr.bf16.mxu0 %v5951_v18  ;;  %9319 = vmatpush3.bf16.msra.mxu0 %v10121_v9  ;;  %v12320_v9 = vld [vmem:[#allocation36_spill] sm:$0xff] }
 0x522   : > { %9320 = vmatprep.subr.bf16.mxu0 %v10122_v56  ;;  %v5932_v0 = vmul.f32 %v12320_v9, %v12319_v27  ;;  %v5955_v26 = vpack.c.bf16 %v5934_v41, %v11406_v3  ;;  %v5957_v27 = vpack.c.bf16 %v5938_v16, %v11420_v14  ;;  %v6220_v16 = vld [vmem:[#allocation2 + $0x2f] sm:$0xff] }
 0x525   : > { %9321 = vmatpush3.bf16.msra.mxu0 %v10122_v56  ;;  %v12322_v56 = vld [vmem:[#allocation41_spill] sm:$0xff] }
 0x526   : > { %9322 = vmatprep.subr.bf16.mxu0 %v10123_v49  ;;  %v5954_v18 = vpack.c.bf16 %v5932_v0, %v12322_v56  ;;  %v12328_v0 = vld [vmem:[#allocation47_spill] sm:$0xff] }
 0x527   : > { %v5942_v3 = vmul.f32 %v12328_v0, %v11426_v31 }
 0x528   : > { %9291 = vmatmul.mubr.bf16.gmra.mrb[28].mxu0 %v5952_v47  ;;  %v12326_v47 = vld [vmem:[#allocation45_spill] sm:$0xff] }
 0x529   : > { %9294 = vmatprep.mubr.bf16.mxu0 %v5953_v19  ;;  %9323 = vmatpush3.bf16.msra.mxu0 %v10123_v49  ;;  %v5936_v49 = vmul.f32 %v12324_v60, %v12323_v2  ;;  %v5959_v56 = vpack.c.bf16 %v5942_v3, %v11432_v20  ;;  %v6224_v3 = vld [vmem:[#allocation2 + $0x4f] sm:$0xff] }
 0x52a   : > { %9324 = vmatprep.subr.bf16.mxu0 %v10124_v30 }
 0x52b   : > { %v5956_v19 = vpack.c.bf16 %v5936_v49, %v12326_v47  ;;  %v11648_v49 = vld [vmem:[#allocation2 + $0x109] sm:$0xff]  ;;  %v6221_v47 = vld [vmem:[#allocation2 + $0x37] sm:$0xff] }
 0x52c   : > { %v6253_v20 = vmul.f32 %v10362_v37, %v6221_v47 }
 0x52d   : > { %9325 = vmatpush3.bf16.msra.mxu0 %v10124_v30  ;;  %v5940_v30 = vmul.f32 %v12327_v32, %v11414_v51 }
 0x52e   : > { %9358 = vmatprep.subr.bf16.mxu0 %v10125_v55 }
 0x52f   : > { %v5958_v41 = vpack.c.bf16 %v5940_v30, %v11423_v13  ;;  %v6223_v13 = vld [vmem:[#allocation2 + $0x47] sm:$0xff] }
 0x530   : > { %9295 = vmatmul.mubr.bf16.gmra.mrb[32].mxu0 %v5954_v18  ;;  %v11643_v18 = vld [vmem:[#allocation2 + $0x111] sm:$0xff] }
 0x531   : > { %9298 = vmatprep.mubr.bf16.mxu0 %v5955_v26  ;;  %v5944_v14 = vmul.f32 %v10735_v17, %v11643_v18  ;;  %v12329_v26 = vld [vmem:[#allocation4_spill] sm:$0xff] }
 0x532   : > { %v6251_v2 = vmul.f32 %v12329_v26, %v6219_v36  ;;  %v6225_v36 = vld [vmem:[#allocation2 + $0x57] sm:$0xff] }
 0x533   : > { %v5960_v51 = vpack.c.bf16 %v5944_v14, %v11648_v49  ;;  %v6227_v14 = vld [vmem:[#allocation2 + $0x67] sm:$0xff] }
 0x534   : > { %v6283_v31 = vpack.c.bf16 %v6220_v16, %v6251_v2  ;;  %v6257_v2 = vmul.f32 %v10387_v52, %v6225_v36  ;;  %v6226_v16 = vld [vmem:[#allocation2 + $0x5f] sm:$0xff] }
 0x536   : > { %v6286_v47 = vpack.c.bf16 %v6226_v16, %v6257_v2  ;;  %v10130_v2 = vld [vmem:[%s12068_s5 + $0x1e8] sm:$0xff]  }
 0x538   : > { %9299 = vmatmul.mubr.bf16.gmra.mrb[36].mxu0 %v5956_v19  ;;  %v6222_v19 = vld [vmem:[#allocation2 + $0x3f] sm:$0xff] }
 0x539   : > { %9302 = vmatprep.mubr.bf16.mxu0 %v5957_v27  ;;  %v6255_v27 = vmul.f32 %v10367_v39, %v6223_v13  ;;  %v6284_v30 = vpack.c.bf16 %v6222_v19, %v6253_v20  ;;  %v6228_v13 = vld [vmem:[#allocation2 + $0x6f] sm:$0xff]  ;;  %v10128_v20 = vld [vmem:[%s12068_s5 + $0x1d8] sm:$0xff]  }
 0x53a   : > { %v6229_v19 = vld [vmem:[#allocation2 + $0x77] sm:$0xff] }
 0x540   : > { %9303 = vmatmul.mubr.bf16.gmra.mrb[40].mxu0 %v5958_v41  ;;  %v10126_v41 = vld [vmem:[%s12068_s5 + $0x1c8] sm:$0xff]  }
 0x541   : > { %9306 = vmatprep.mubr.bf16.mxu0 %v5959_v56  ;;  %v6285_v56 = vpack.c.bf16 %v6224_v3, %v6255_v27  ;;  %v6231_v27 = vld [vmem:[#allocation2 + $0x87] sm:$0xff] }
 0x542   : > { %v10129_v3 = vld [vmem:[%s12068_s5 + $0x1e0] sm:$0xff]  }
 0x548   : > { %9307 = vmatmul.mubr.bf16.gmra.mrb[44].mxu0 %v5960_v51  ;;  %v10127_v51 = vld [vmem:[%s12068_s5 + $0x1d0] sm:$0xff]  }
 0x549   : > { %9326 = vmatprep.mubr.bf16.mxu0 %v6283_v31  ;;  %v6259_v31 = vmul.f32 %v10392_v54, %v6227_v14  ;;  %v6232_v14 = vld [vmem:[#allocation2 + $0x8f] sm:$0xff] }
 0x550   : > { %9327 = vmatmul.mubr.bf16.vlgmr.msra.gmra.mrb[16].mxu0 %v6284_v30  ;;  %v6261_v30 = vmul.f32 %v10415_v5, %v6229_v19 }
 0x551   : > { %9359 = vmatpush3.bf16.msra.mxu0 %v10125_v55  ;;  %9330 = vmatprep.mubr.bf16.mxu0 %v6285_v56  ;;  %v6287_v55 = vpack.c.bf16 %v6228_v13, %v6259_v31  ;;  %v6263_v56 = vmul.f32 %v10420_v8, %v6231_v27  ;;  %v6235_v31 = vld [vmem:[#allocation2 + $0xa7] sm:$0xff]  ;;  %v10131_v13 = vld [vmem:[%s12068_s5 + $0x1f0] sm:$0xff]  }
 0x552   : > { %9360 = vmatprep.subr.bf16.mxu0 %v10126_v41  ;;  %v6236_v27 = vld [vmem:[#allocation2 + $0xaf] sm:$0xff] }
 0x553   : > { %v6289_v16 = vpack.c.bf16 %v6232_v14, %v6263_v56  ;;  %v6239_v56 = vld [vmem:[#allocation2 + $0xc7] sm:$0xff] }
 0x554   : > { %v10133_v14 = vld [vmem:[%s12068_s5 + $0x200] sm:$0xff]  }
 0x555   : > { %9361 = vmatpush3.bf16.msra.mxu0 %v10126_v41  ;;  %v6230_v41 = vld [vmem:[#allocation2 + $0x7f] sm:$0xff] }
 0x556   : > { %9362 = vmatprep.subr.bf16.mxu0 %v10127_v51  ;;  %v6288_v36 = vpack.c.bf16 %v6230_v41, %v6261_v30  ;;  %v10132_v30 = vld [vmem:[%s12068_s5 + $0x1f8] sm:$0xff]  }
 0x558   : > { %9331 = vmatmul.mubr.bf16.gmra.mrb[20].mxu0 %v6286_v47 }
 0x559   : > { %9334 = vmatprep.mubr.bf16.mxu0 %v6287_v55  ;;  %9363 = vmatpush3.bf16.msra.mxu0 %v10127_v51  ;;  %v6233_v51 = vld [vmem:[#allocation2 + $0x97] sm:$0xff]  ;;  %v6267_v55 = vmul.f32 %v12270_v1, %v6235_v31  ;;  %v6240_v31 = vld [vmem:[#allocation2 + $0xcf] sm:$0xff] }
 0x55a   : > { %9364 = vmatprep.subr.bf16.mxu0 %v10128_v20  ;;  %v6265_v47 = vmul.f32 %v10443_v22, %v6233_v51  ;;  %v6245_v1 = vld [vmem:[#allocation2 + $0xf7] sm:$0xff] }
 0x55b   : > { %v6291_v41 = vpack.c.bf16 %v6236_v27, %v6267_v55  ;;  %v6243_v55 = vld [vmem:[#allocation2 + $0xe7] sm:$0xff] }
 0x55c   : > { %v6275_v27 = vmul.f32 %v12292_v12, %v6243_v55 }
 0x55d   : > { %9365 = vmatpush3.bf16.msra.mxu0 %v10128_v20  ;;  %v6234_v20 = vld [vmem:[#allocation2 + $0x9f] sm:$0xff] }
 0x55e   : > { %9366 = vmatprep.subr.bf16.mxu0 %v10129_v3  ;;  %v6290_v19 = vpack.c.bf16 %v6234_v20, %v6265_v47  ;;  %v6241_v20 = vld [vmem:[#allocation2 + $0xd7] sm:$0xff] }
 0x560   : > { %9335 = vmatmul.mubr.bf16.gmra.mrb[24].mxu0 %v6288_v36 }
 0x561   : > { %9338 = vmatprep.mubr.bf16.mxu0 %v6289_v16  ;;  %9367 = vmatpush3.bf16.msra.mxu0 %v10129_v3  ;;  %v6237_v3 = vld [vmem:[#allocation2 + $0xb7] sm:$0xff]  ;;  %v6271_v16 = vmul.f32 %v10476_v46, %v6239_v56  ;;  %v6246_v56 = vld [vmem:[#allocation2 + $0xff] sm:$0xff] }
 0x562   : > { %9368 = vmatprep.subr.bf16.mxu0 %v10130_v2  ;;  %v6269_v36 = vmul.f32 %v12271_v48, %v6237_v3  ;;  %v6244_v3 = vld [vmem:[#allocation2 + $0xef] sm:$0xff] }
 0x563   : > { %v6293_v47 = vpack.c.bf16 %v6240_v31, %v6271_v16  ;;  %v6295_v48 = vpack.c.bf16 %v6244_v3, %v6275_v27 }
 0x565   : > { %9369 = vmatpush3.bf16.msra.mxu0 %v10130_v2  ;;  %v6238_v2 = vld [vmem:[#allocation2 + $0xbf] sm:$0xff] }
 0x566   : > { %9370 = vmatprep.subr.bf16.mxu0 %v10131_v13  ;;  %v6292_v51 = vpack.c.bf16 %v6238_v2, %v6269_v36  ;;  %v6279_v36 = vmul.f32 %v12296_v50, %v11502_v61  ;;  %v10136_v61 = vld [vmem:[%s12068_s5 + $0x218] sm:$0xff]  }
 0x568   : > { %9339 = vmatmul.mubr.bf16.gmra.mrb[28].mxu0 %v6290_v19  ;;  %v6242_v19 = vld [vmem:[#allocation2 + $0xdf] sm:$0xff]  ;;  %v6297_v16 = vpack.c.bf16 %v11506_v57, %v6279_v36  ;;  %v6863_v36 = vld [vmem:[#allocation2 + $0x29] sm:$0xff] }
 0x569   : > { %9342 = vmatprep.mubr.bf16.mxu0 %v6291_v41  ;;  %9371 = vmatpush3.bf16.msra.mxu0 %v10131_v13  ;;  %v6273_v13 = vmul.f32 %v12290_v59, %v6241_v20  ;;  %v10137_v57 = vld [vmem:[%s12068_s5 + $0x220] sm:$0xff]  }
 0x56a   : > { %9372 = vmatprep.subr.bf16.mxu0 %v10132_v30 }
 0x56b   : > { %v6294_v41 = vpack.c.bf16 %v6242_v19, %v6273_v13  ;;  %v6586_v19 = vld [vmem:[#allocation2 + $0x110] sm:$0xff] }
 0x56d   : > { %9373 = vmatpush3.bf16.msra.mxu0 %v10132_v30  ;;  %v6277_v30 = vmul.f32 %v12295_v4, %v6245_v1  ;;  %v10134_v1 = vld [vmem:[%s12068_s5 + $0x208] sm:$0xff]  }
 0x56e   : > { %9406 = vmatprep.subr.bf16.mxu0 %v10133_v14 }
 0x56f   : > { %v6296_v2 = vpack.c.bf16 %v6246_v56, %v6277_v30  ;;  %v6864_v30 = vld [vmem:[#allocation2 + $0x31] sm:$0xff] }
 0x570   : > { %9343 = vmatmul.mubr.bf16.gmra.mrb[32].mxu0 %v6292_v51  ;;  %v6249_v51 = vld [vmem:[#allocation2 + $0x117] sm:$0xff] }
 0x571   : > { %9346 = vmatprep.mubr.bf16.mxu0 %v6293_v47  ;;  %v6281_v31 = vmul.f32 %v12297_v43, %v6249_v51  ;;  %v6250_v47 = vld [vmem:[#allocation2 + $0x11f] sm:$0xff] }
 0x573   : > { %v6298_v20 = vpack.c.bf16 %v6250_v47, %v6281_v31  ;;  %v6865_v47 = vld [vmem:[#allocation2 + $0x39] sm:$0xff] }
 0x578   : > { %9347 = vmatmul.mubr.bf16.gmra.mrb[36].mxu0 %v6294_v41  ;;  %v6585_v41 = vld [vmem:[#allocation2 + $0x108] sm:$0xff] }
 0x579   : > { %9350 = vmatprep.mubr.bf16.mxu0 %v6295_v48  ;;  %v10135_v48 = vld [vmem:[%s12068_s5 + $0x210] sm:$0xff]   ;;  %v6603_v3 = vpack.c.bf16 %v6586_v19, %v6585_v41  ;;  %v6878_v41 = vld [vmem:[#allocation2 + $0xa1] sm:$0xff] }
 0x580   : > { %9351 = vmatmul.mubr.bf16.gmra.mrb[40].mxu0 %v6296_v2 }
 0x581   : > { %9354 = vmatprep.mubr.bf16.mxu0 %v6297_v16  ;;  %v6866_v16 = vld [vmem:[#allocation2 + $0x41] sm:$0xff] }
 0x582   : > { %v6898_v51 = vmul.f32 %v12304_v23, %v6866_v16  ;;  %v6882_v16 = vld [vmem:[#allocation2 + $0xc1] sm:$0xff] }
 0x588   : > { %9355 = vmatmul.mubr.bf16.gmra.mrb[44].mxu0 %v6298_v20  ;;  %v6928_v20 = vpack.c.bf16 %v6898_v51, %v6865_v47  ;;  %v6914_v51 = vmul.f32 %v12320_v9, %v6882_v16  ;;  %v6881_v47 = vld [vmem:[#allocation2 + $0xb9] sm:$0xff] }
 0x589   : > { %9374 = vmatprep.mubr.bf16.mxu0 %v11509_v28  ;;  %v10138_v28 = vld [vmem:[%s12068_s5 + $0x228] sm:$0xff]  }
 0x590   : > { %9375 = vmatmul.mubr.bf16.vlgmr.msra.gmra.mrb[16].mxu0 %v11514_v29  ;;  %v10139_v29 = vld [vmem:[%s12068_s5 + $0x230] sm:$0xff]  }
 0x591   : > { %9407 = vmatpush3.bf16.msra.mxu0 %v10133_v14  ;;  %9378 = vmatprep.mubr.bf16.mxu0 %v11521_v34  ;;  %v10140_v34 = vld [vmem:[%s12068_s5 + $0x238] sm:$0xff]  }
 0x592   : > { %9408 = vmatprep.subr.bf16.mxu0 %v10134_v1  ;;  %v6579_v14 = vld [vmem:[#allocation2 + $0xd8] sm:$0xff] }
 0x595   : > { %9409 = vmatpush3.bf16.msra.mxu0 %v10134_v1  ;;  %v6867_v1 = vld [vmem:[#allocation2 + $0x49] sm:$0xff] }
 0x596   : > { %9410 = vmatprep.subr.bf16.mxu0 %v10135_v48 }
 0x598   : > { %9379 = vmatmul.mubr.bf16.gmra.mrb[20].mxu0 %v11526_v35  ;;  %v6576_v35 = vld [vmem:[#allocation2 + $0xc0] sm:$0xff] }
 0x599   : > { %9382 = vmatprep.mubr.bf16.mxu0 %v11533_v24  ;;  %9411 = vmatpush3.bf16.msra.mxu0 %v10135_v48  ;;  %v6598_v24 = vpack.c.bf16 %v6576_v35, %v11557_v11  ;;  %v6896_v11 = vmul.f32 %v12302_v25, %v6864_v30  ;;  %v6910_v30 = vmul.f32 %v12316_v10, %v6878_v41  ;;  %v6893_v41 = vld [vmem:[#allocation2 + $0x119] sm:$0xff] }
 0x59a   : > { %9412 = vmatprep.subr.bf16.mxu0 %v10136_v61 }
 0x59b   : > { %v6927_v2 = vpack.c.bf16 %v6896_v11, %v6863_v36  ;;  %v6879_v36 = vld [vmem:[#allocation2 + $0xa9] sm:$0xff] }
 0x59d   : > { %9413 = vmatpush3.bf16.msra.mxu0 %v10136_v61  ;;  %v6870_v61 = vld [vmem:[#allocation2 + $0x61] sm:$0xff] }
 0x59e   : > { %9414 = vmatprep.subr.bf16.mxu0 %v10137_v57 }
 0x5a0   : > { %9383 = vmatmul.mubr.bf16.gmra.mrb[24].mxu0 %v11538_v53  ;;  %v6580_v53 = vld [vmem:[#allocation2 + $0xe0] sm:$0xff] }
 0x5a1   : > { %9386 = vmatprep.mubr.bf16.mxu0 %v11545_v6  ;;  %9415 = vmatpush3.bf16.msra.mxu0 %v10137_v57  ;;  %v6582_v6 = vld [vmem:[#allocation2 + $0xf0] sm:$0xff]  ;;  %v6600_v55 = vpack.c.bf16 %v6580_v53, %v6579_v14 }
 0x5a2   : > { %9416 = vmatprep.subr.bf16.mxu0 %v10138_v28  ;;  %v6601_v13 = vpack.c.bf16 %v6582_v6, %v11568_v40  ;;  %v6868_v40 = vld [vmem:[#allocation2 + $0x51] sm:$0xff]  ;;  %v6874_v6 = vld [vmem:[#allocation2 + $0x81] sm:$0xff] }
 0x5a3   : > { %v6900_v31 = vmul.f32 %v12305_v15, %v6868_v40  ;;  %v6872_v57 = vld [vmem:[#allocation2 + $0x71] sm:$0xff] }
 0x5a4   : > { %v6876_v14 = vld [vmem:[#allocation2 + $0x91] sm:$0xff] }
 0x5a5   : > { %9417 = vmatpush3.bf16.msra.mxu0 %v10138_v28  ;;  %v6929_v48 = vpack.c.bf16 %v6900_v31, %v6867_v1  ;;  %v6902_v28 = vmul.f32 %v12308_v62, %v6870_v61  ;;  %v6884_v40 = vld [vmem:[#allocation2 + $0xd1] sm:$0xff]  ;;  %v6883_v1 = vld [vmem:[#allocation2 + $0xc9] sm:$0xff]  ;;  %v6886_v61 = vld [vmem:[#allocation2 + $0xe1] sm:$0xff] }
 0x5a6   : > { %9418 = vmatprep.subr.bf16.mxu0 %v10139_v29  ;;  %v6916_v31 = vmul.f32 %v12321_v44, %v6884_v40 }
 0x5a8   : > { %9387 = vmatmul.mubr.bf16.gmra.mrb[28].mxu0 %v11550_v58  ;;  %v6584_v58 = vld [vmem:[#allocation2 + $0x100] sm:$0xff] }
 0x5a9   : > { %9390 = vmatprep.mubr.bf16.mxu0 %v11559_v21  ;;  %9419 = vmatpush3.bf16.msra.mxu0 %v10139_v29  ;;  %v6583_v21 = vld [vmem:[#allocation2 + $0xf8] sm:$0xff]  ;;  %v6904_v29 = vmul.f32 %v12309_v7, %v6872_v57 }
 0x5aa   : > { %9420 = vmatprep.subr.bf16.mxu0 %v10140_v34  ;;  %v6602_v27 = vpack.c.bf16 %v6584_v58, %v6583_v21  ;;  %v6873_v58 = vld [vmem:[#allocation2 + $0x79] sm:$0xff]  ;;  %v6875_v21 = vld [vmem:[#allocation2 + $0x89] sm:$0xff]  ;;  %v6888_v57 = vld [vmem:[#allocation2 + $0xf1] sm:$0xff] }
 0x5ad   : > { %9421 = vmatpush3.bf16.msra.mxu0 %v10140_v34  ;;  %v6869_v34 = vld [vmem:[#allocation2 + $0x59] sm:$0xff] }
 0x5ae   : > { %v6930_v35 = vpack.c.bf16 %v6902_v28, %v6869_v34  ;;  %v6918_v28 = vmul.f32 %v12324_v60, %v6886_v61  ;;  %v6885_v34 = vld [vmem:[#allocation2 + $0xd9] sm:$0xff] }
 0x5b0   : > { %9391 = vmatmul.mubr.bf16.gmra.mrb[32].mxu0 %v6598_v24  ;;  %v6871_v24 = vld [vmem:[#allocation2 + $0x69] sm:$0xff] }
 0x5b1   : > { %9394 = vmatprep.mubr.bf16.mxu0 %v11564_v63  ;;  %v10143_v63 = vld [vmem:[#allocation2] sm:$0xff]  ;;  %v6931_v53 = vpack.c.bf16 %v6904_v29, %v6871_v24  ;;  %v6920_v29 = vmul.f32 %v12325_v42, %v6888_v57  ;;  %v6887_v24 = vld [vmem:[#allocation2 + $0xe9] sm:$0xff] }
 0x5b2   : > { %v6604_v56 = vpack.c.bf16 %v10143_v63, %v10143_v63  ;;  %v6877_v63 = vld [vmem:[#allocation2 + $0x99] sm:$0xff] }
 0x5b8   : > { %9395 = vmatmul.mubr.bf16.gmra.mrb[36].mxu0 %v6600_v55  ;;  %v6906_v55 = vmul.f32 %v12312_v33, %v6874_v6  ;;  %v6890_v6 = vld [vmem:[#allocation2 + $0x101] sm:$0xff] }
 0x5b9   : > { %9398 = vmatprep.mubr.bf16.mxu0 %v6601_v13  ;;  %v6908_v13 = vmul.f32 %v12313_v45, %v6876_v14  ;;  %v6922_v14 = vmul.f32 %v12327_v32, %v6890_v6 }
 0x5ba   : > { %v6932_v19 = vpack.c.bf16 %v6906_v55, %v6873_v58  ;;  %v6924_v55 = vmul.f32 %v12328_v0, %v11643_v18  ;;  %v6894_v58 = vld [vmem:[#allocation2 + $0x121] sm:$0xff] }
 0x5c0   : > { %9399 = vmatmul.mubr.bf16.gmra.mrb[40].mxu0 %v6602_v27  ;;  %v6933_v27 = vpack.c.bf16 %v6908_v13, %v6875_v21  ;;  %v6889_v13 = vld [vmem:[#allocation2 + $0xf9] sm:$0xff]  ;;  %v6941_v21 = vpack.c.bf16 %v6924_v55, %v11648_v49 }
 0x5c1   : > { %9402 = vmatprep.mubr.bf16.mxu0 %v6603_v3  ;;  %v6880_v3 = vld [vmem:[#allocation2 + $0xb1] sm:$0xff] }
 0x5c2   : > { %v6912_v11 = vmul.f32 %v12317_v38, %v6880_v3 }
 0x5c8   : > { %9403 = vmatmul.mubr.bf16.gmra.mrb[44].mxu0 %v6604_v56  ;;  %v6934_v56 = vpack.c.bf16 %v6910_v30, %v6877_v63  ;;  %v11746_v30 = vld [vmem:[%s12069_s6] ss:$0 sm:$0xff] }
 0x5c9   : > { %9422 = vmatprep.mubr.bf16.mxu0 %v6927_v2  ;;  %v6935_v2 = vpack.c.bf16 %v6912_v11, %v6879_v36 }
 0x5d0   : > { %9423 = vmatmul.mubr.bf16.vlgmr.msra.gmra.mrb[16].mxu0 %v6928_v20  ;;  %v6936_v20 = vpack.c.bf16 %v6914_v51, %v6881_v47 }
 0x5d1   : > { %9426 = vmatprep.mubr.bf16.mxu0 %v6929_v48  ;;  %v6937_v48 = vpack.c.bf16 %v6916_v31, %v6883_v1 }
 0x5d8   : > { %9427 = vmatmul.mubr.bf16.gmra.mrb[20].mxu0 %v6930_v35  ;;  %v6938_v35 = vpack.c.bf16 %v6918_v28, %v6885_v34 }
 0x5d9   : > { %9430 = vmatprep.mubr.bf16.mxu0 %v6931_v53  ;;  %v6939_v53 = vpack.c.bf16 %v6920_v29, %v6887_v24 }
 0x5e0   : > { %9431 = vmatmul.mubr.bf16.gmra.mrb[24].mxu0 %v6932_v19  ;;  %v6940_v19 = vpack.c.bf16 %v6922_v14, %v6889_v13 }
 0x5e1   : > { %9434 = vmatprep.mubr.bf16.mxu0 %v6933_v27  ;;  %v6926_v27 = vmul.f32 %v10735_v17, %v6894_v58 }
 0x5e3   : > { %v6942_v3 = vpack.c.bf16 %v6926_v27, %v6893_v41 }
 0x5e8   : > { %9435 = vmatmul.mubr.bf16.gmra.mrb[28].mxu0 %v6934_v56 }
 0x5e9   : > { %9438 = vmatprep.mubr.bf16.mxu0 %v6935_v2 }
 0x5f0   : > { %9439 = vmatmul.mubr.bf16.gmra.mrb[32].mxu0 %v6936_v20 }
 0x5f1   : > { %9442 = vmatprep.mubr.bf16.mxu0 %v6937_v48 }
 0x5f8   : > { %9443 = vmatmul.mubr.bf16.gmra.mrb[36].mxu0 %v6938_v35 }
 0x5f9   : > { %9446 = vmatprep.mubr.bf16.mxu0 %v6939_v53 }
 0x600   : > { %9447 = vmatmul.mubr.bf16.gmra.mrb[40].mxu0 %v6940_v19 }
 0x601   : > { %9450 = vmatprep.mubr.bf16.mxu0 %v6941_v21 }
 0x608   : > { %9451 = vmatmul.mubr.bf16.gmra.mrb[44].mxu0 %v6942_v3 }
 0x6a3   : > { %v9424_v11 = vpop.f32.mrb[16].mxu0 }
 0x6a4   : > { %v7210_v18 = vadd.f32 %v9424_v11, %v11746_v30  ;;  %v7042_v63 = vpop.f32.mrb[17].mxu0 }
 0x6a5   : > { %v7208_v56 = vadd.f32 %v11746_v30, %v7042_v63  ;;  %v9425_v36 = vpop.f32.mrb[18].mxu0 }
 0x6a6   : > { %v7242_v49 = vmax.f32 %v7210_v18, 0.0  ;;  %v11751_v2 = vadd.f32 %v9425_v36, %v11746_v30  ;;  %v7045_v16 = vpop.f32.mrb[19].mxu0 }
 0x6a7   : > { %v7240_v40 = vmax.f32 %v7208_v56, 0.0  ;;  %v11754_v51 = vadd.f32 %v11746_v30, %v7045_v16 }
 0x6a8   : > { %7274 = vst [vmem:[#allocation2 + $0x28] sm:$0xff] %v7242_v49  ;;  %v7243_v31 = vmax.f32 %v11751_v2, 0.0 }
 0x6a9   : > { %7272 = vst [vmem:[#allocation2 + $0x18] sm:$0xff] %v7240_v40  ;;  %v7241_v47 = vmax.f32 %v11754_v51, 0.0 }
 0x6aa   : > { %7275 = vst [vmem:[#allocation2 + $0x30] sm:$0xff] %v7243_v31 }
 0x6ab   : > { %7273 = vst [vmem:[#allocation2 + $0x20] sm:$0xff] %v7241_v47  ;;  %v9428_v20 = vpop.f32.mrb[20].mxu0 }
 0x6ac   : > { %v11763_v1 = vadd.f32 %v9428_v20, %v11746_v30  ;;  %v7058_v48 = vpop.f32.mrb[21].mxu0 }
 0x6ad   : > { %v11766_v61 = vadd.f32 %v11746_v30, %v7058_v48  ;;  %v9429_v57 = vpop.f32.mrb[22].mxu0 }
 0x6ae   : > { %v7246_v28 = vmax.f32 %v11763_v1, 0.0  ;;  %v11770_v29 = vadd.f32 %v9429_v57, %v11746_v30  ;;  %v7061_v34 = vpop.f32.mrb[23].mxu0 }
 0x6af   : > { %v7244_v35 = vmax.f32 %v11766_v61, 0.0  ;;  %v11774_v24 = vadd.f32 %v11746_v30, %v7061_v34 }
 0x6b0   : > { %7278 = vst [vmem:[#allocation2 + $0x48] sm:$0xff] %v7246_v28  ;;  %v7247_v53 = vmax.f32 %v11770_v29, 0.0  ;;  %v7304_v6 = vld [vmem:[#allocation2 + $0x17] sm:$0xff] }
 0x6b1   : > { %7276 = vst [vmem:[#allocation2 + $0x38] sm:$0xff] %v7244_v35  ;;  %v12177_v14 = vmax.f32 %v11774_v24, 0.0  ;;  %v7336_v55 = vmul.f32 %v12329_v26, %v7304_v6  ;;  %v7370_v11 = vld [vmem:[#allocation2 + $0x29] sm:$0xff] }
 0x6b2   : > { %7279 = vst [vmem:[#allocation2 + $0x50] sm:$0xff] %v7247_v53  ;;  %v7306_v13 = vld [vmem:[#allocation2 + $0x27] sm:$0xff]  ;;  %v7368_v21 = vld [vmem:[#allocation2 + $0x19] sm:$0xff] }
 0x6b3   : > { %7277 = vst [vmem:[#allocation2 + $0x40] sm:$0xff] %v12177_v14  ;;  %v9432_v58 = vpop.f32.mrb[24].mxu0  ;;  %v7338_v19 = vmul.f32 %v10362_v37, %v7306_v13  ;;  %v7369_v27 = vld [vmem:[#allocation2 + $0x21] sm:$0xff]  ;;  %v7432_v18 = vmax.f32 %v7336_v55, %v7368_v21 }
 0x6b4   : > { %v11789_v41 = vadd.f32 %v9432_v58, %v11746_v30  ;;  %v7074_v3 = vpop.f32.mrb[25].mxu0  ;;  %v7401_v37 = vmul.f32 %v12302_v25, %v7369_v27 }
 0x6b5   : > { %v11792_v26 = vadd.f32 %v11746_v30, %v7074_v3  ;;  %v9433_v63 = vpop.f32.mrb[26].mxu0  ;;  %v7434_v56 = vmax.f32 %v7338_v19, %v7370_v11  ;;  %v7464_v58 = vmax.f32 %v7240_v40, %v7432_v18  ;;  %v7305_v3 = vld [vmem:[#allocation2 + $0x1f] sm:$0xff] }
 0x6b6   : > { %v7250_v36 = vmax.f32 %v11789_v41, 0.0  ;;  %v11796_v16 = vadd.f32 %v9433_v63, %v11746_v30  ;;  %v7077_v20 = vpop.f32.mrb[27].mxu0  ;;  %v7433_v63 = vmax.f32 %v7305_v3, %v7401_v37 }
 0x6b7   : > { %v12176_v48 = vmax.f32 %v11792_v26, 0.0  ;;  %v11801_v57 = vadd.f32 %v11746_v30, %v7077_v20  ;;  %v7466_v34 = vmax.f32 %v7242_v49, %v7434_v56  ;;  %v7307_v49 = vld [vmem:[#allocation2 + $0x2f] sm:$0xff] }
 0x6b8   : > { %7282 = vst [vmem:[#allocation2 + $0x68] sm:$0xff] %v7250_v36  ;;  %v12178_v6 = vmax.f32 %v11796_v16, 0.0  ;;  %v7308_v55 = vld [vmem:[#allocation2 + $0x37] sm:$0xff] }
 0x6b9   : > { %v7371_v13 = vld [vmem:[#allocation2 + $0x31] sm:$0xff]  ;;  %7280 = vst [vmem:[#allocation2 + $0x58] sm:$0xff] %v12176_v48  ;;  %v12179_v19 = vmax.f32 %v11801_v57, 0.0  ;;  %v7340_v25 = vmul.f32 %v10367_v39, %v7308_v55  ;;  %v7496_v27 = vmax.f32 %v7466_v34, 0.0  ;;  %v7374_v55 = vld [vmem:[#allocation2 + $0x49] sm:$0xff] }
 0x6ba   : > { %v7403_v21 = vmul.f32 %v12304_v23, %v7371_v13  ;;  %7283 = vst [vmem:[#allocation2 + $0x70] sm:$0xff] %v12178_v6  ;;  %v7310_v11 = vld [vmem:[#allocation2 + $0x47] sm:$0xff]  ;;  %v7372_v56 = vld [vmem:[#allocation2 + $0x39] sm:$0xff] }
 0x6bb   : > { %7281 = vst [vmem:[#allocation2 + $0x60] sm:$0xff] %v12179_v19  ;;  %v9436_v40 = vpop.f32.mrb[28].mxu0  ;;  %v7342_v18 = vmul.f32 %v10387_v52, %v7310_v11  ;;  %v7512_v48 = vmax.f32 %v7464_v58, %v7496_v27  ;;  %v7436_v13 = vmax.f32 %v7340_v25, %v7372_v56  ;;  %v7373_v14 = vld [vmem:[#allocation2 + $0x41] sm:$0xff]  ;;  %v7465_v25 = vmax.f32 %v7241_v47, %v7433_v63  ;;  %v7311_v63 = vld [vmem:[#allocation2 + $0x4f] sm:$0xff] }
 0x6bc   : > { %v7435_v20 = vmax.f32 %v7307_v49, %v7403_v21  ;;  %v11817_v39 = vadd.f32 %v9436_v40, %v11746_v30  ;;  %v7090_v23 = vpop.f32.mrb[29].mxu0 }
 0x6bd   : > { %v11820_v6 = vadd.f32 %v11746_v30, %v7090_v23  ;;  %v9437_v37 = vpop.f32.mrb[30].mxu0  ;;  %v7438_v3 = vmax.f32 %v7342_v18, %v7374_v55  ;;  %7528 = vst [vmem:[#allocation3] sm:$0xff] %v7512_v48  ;;  %v7468_v51 = vmax.f32 %v7244_v35, %v7436_v13  ;;  %v7309_v35 = vld [vmem:[#allocation2 + $0x3f] sm:$0xff] }
 0x6be   : > { %v11824_v19 = vmax.f32 %v7243_v31, %v7435_v20  ;;  %v7254_v52 = vmax.f32 %v11817_v39, 0.0  ;;  %v11828_v58 = vadd.f32 %v9437_v37, %v11746_v30  ;;  %v7093_v21 = vpop.f32.mrb[31].mxu0  ;;  %v7405_v31 = vmul.f32 %v12305_v15, %v7373_v14 }
 0x6bf   : > { %v7252_v27 = vmax.f32 %v11820_v6, 0.0  ;;  %v11834_v49 = vadd.f32 %v11746_v30, %v7093_v21  ;;  %v11838_v2 = vmax.f32 %v7246_v28, %v7438_v3 }
 0x6c0   : > { %7286 = vst [vmem:[#allocation2 + $0x88] sm:$0xff] %v7254_v52  ;;  %v7255_v48 = vmax.f32 %v11828_v58, 0.0  ;;  %v7312_v11 = vld [vmem:[#allocation2 + $0x57] sm:$0xff]  ;;  %v7497_v47 = vmax.f32 %v11824_v19, 0.0 }
 0x6c1   : > { %v7375_v40 = vld [vmem:[#allocation2 + $0x51] sm:$0xff]  ;;  %7284 = vst [vmem:[#allocation2 + $0x78] sm:$0xff] %v7252_v27  ;;  %v7253_v1 = vmax.f32 %v11834_v49, 0.0  ;;  %v7344_v28 = vmul.f32 %v10392_v54, %v7312_v11  ;;  %v7498_v14 = vmax.f32 %v11838_v2, %v7466_v34  ;;  %v7378_v3 = vld [vmem:[#allocation2 + $0x69] sm:$0xff] }
 0x6c2   : > { %v7407_v15 = vmul.f32 %v12308_v62, %v7375_v40  ;;  %7287 = vst [vmem:[#allocation2 + $0x90] sm:$0xff] %v7255_v48  ;;  %v7314_v18 = vld [vmem:[#allocation2 + $0x67] sm:$0xff]  ;;  %v7513_v61 = vmax.f32 %v7465_v25, %v7497_v47  ;;  %v7376_v23 = vld [vmem:[#allocation2 + $0x59] sm:$0xff]  ;;  %v7437_v62 = vmax.f32 %v7309_v35, %v7405_v31 }
 0x6c3   : > { %7285 = vst [vmem:[#allocation2 + $0x80] sm:$0xff] %v7253_v1  ;;  %v9440_v56 = vpop.f32.mrb[32].mxu0  ;;  %v7346_v20 = vmul.f32 %v10415_v5, %v7314_v18  ;;  %v7514_v54 = vmax.f32 %v7468_v51, %v7498_v14  ;;  %v7377_v13 = vld [vmem:[#allocation2 + $0x61] sm:$0xff]  ;;  %v7440_v21 = vmax.f32 %v7344_v28, %v7376_v23 }
 0x6c4   : > { %v7439_v55 = vmax.f32 %v7311_v63, %v7407_v15  ;;  %v11859_v34 = vadd.f32 %v9440_v56, %v11746_v30  ;;  %v7106_v37 = vpop.f32.mrb[33].mxu0  ;;  %7529 = vst [vmem:[#allocation3 + $0x8] sm:$0xff] %v7513_v61  ;;  %v7409_v28 = vmul.f32 %v12309_v7, %v7377_v13  ;;  %v12331_v7 = vmax.f32 %v11792_v26, 0.0  ;;  %v7313_v23 = vld [vmem:[#allocation2 + $0x5f] sm:$0xff] }
 0x6c5   : > { %v11862_v25 = vadd.f32 %v11746_v30, %v7106_v37  ;;  %v9441_v11 = vpop.f32.mrb[34].mxu0  ;;  %v7442_v40 = vmax.f32 %v7346_v20, %v7378_v3  ;;  %7530 = vst [vmem:[#allocation3 + $0x10] sm:$0xff] %v7514_v54 }
 0x6c6   : > { %v11866_v5 = vmax.f32 %v7247_v53, %v7439_v55  ;;  %v7258_v31 = vmax.f32 %v11859_v34, 0.0  ;;  %v11870_v51 = vadd.f32 %v9441_v11, %v11746_v30  ;;  %v7109_v47 = vpop.f32.mrb[35].mxu0  ;;  %v12330_v53 = vmax.f32 %v11774_v24, 0.0 }
 0x6c7   : > { %v7256_v15 = vmax.f32 %v11862_v25, 0.0  ;;  %v11876_v14 = vadd.f32 %v11746_v30, %v7109_v47  ;;  %v11880_v29 = vmax.f32 %v7250_v36, %v7442_v40  ;;  %v7472_v56 = vmax.f32 %v12331_v7, %v7440_v21 }
 0x6c8   : > { %v7469_v63 = vmax.f32 %v12330_v53, %v7437_v62  ;;  %7290 = vst [vmem:[#allocation2 + $0xa8] sm:$0xff] %v7258_v31  ;;  %v7259_v18 = vmax.f32 %v11870_v51, 0.0  ;;  %v7316_v61 = vld [vmem:[#allocation2 + $0x77] sm:$0xff]  ;;  %v7499_v20 = vmax.f32 %v11866_v5, %v11824_v19  ;;  %v7315_v19 = vld [vmem:[#allocation2 + $0x6f] sm:$0xff]  ;;  %v7441_v62 = vmax.f32 %v7313_v23, %v7409_v28 }
 0x6c9   : > { %v7379_v35 = vld [vmem:[#allocation2 + $0x71] sm:$0xff]  ;;  %7288 = vst [vmem:[#allocation2 + $0x98] sm:$0xff] %v7256_v15  ;;  %v7257_v41 = vmax.f32 %v11876_v14, 0.0  ;;  %v7348_v24 = vmul.f32 %v10420_v8, %v7316_v61  ;;  %v7500_v26 = vmax.f32 %v11880_v29, %v11838_v2  ;;  %v7382_v40 = vld [vmem:[#allocation2 + $0x89] sm:$0xff] }
 0x6ca   : > { %v7411_v36 = vmul.f32 %v12312_v33, %v7379_v35  ;;  %7291 = vst [vmem:[#allocation2 + $0xb0] sm:$0xff] %v7259_v18  ;;  %v7318_v55 = vld [vmem:[#allocation2 + $0x87] sm:$0xff]  ;;  %v7515_v54 = vmax.f32 %v7469_v63, %v7499_v20  ;;  %v7380_v37 = vld [vmem:[#allocation2 + $0x79] sm:$0xff]  ;;  %v7319_v6 = vld [vmem:[#allocation2 + $0x8f] sm:$0xff] }
 0x6cb   : > { %7289 = vst [vmem:[#allocation2 + $0xa0] sm:$0xff] %v7257_v41  ;;  %v9444_v13 = vpop.f32.mrb[36].mxu0  ;;  %v7350_v8 = vmul.f32 %v10443_v22, %v7318_v55  ;;  %v7516_v3 = vmax.f32 %v7472_v56, %v7500_v26  ;;  %v7544_v21 = vld [vmem:[#allocation3] ss:$2 sm:$0xff]  ;;  %v7444_v47 = vmax.f32 %v7348_v24, %v7380_v37  ;;  %v7381_v53 = vld [vmem:[#allocation2 + $0x81] sm:$0xff]  ;;  %v12332_v22 = vmax.f32 %v11796_v16, 0.0 }
 0x6cc   : > { %v7443_v33 = vmax.f32 %v7315_v19, %v7411_v36  ;;  %v11909_v2 = vadd.f32 %v9444_v13, %v11746_v30  ;;  %v7122_v11 = vpop.f32.mrb[37].mxu0  ;;  %7531 = vst [vmem:[#allocation3 + $0x18] sm:$0xff] %v7515_v54  ;;  %7559 = vst [vmem:[%s11897_s13] sm:$0xff] %v7544_v21  ;;  %v12333_v24 = vmax.f32 %v11801_v57, 0.0  ;;  %v7413_v19 = vmul.f32 %v12313_v45, %v7381_v53 }
 0x6cd   : > { %v11913_v28 = vadd.f32 %v11746_v30, %v7122_v11  ;;  %v9445_v63 = vpop.f32.mrb[38].mxu0  ;;  %v7446_v61 = vmax.f32 %v7350_v8, %v7382_v40  ;;  %7532 = vst [vmem:[#allocation3 + $0x20] sm:$0xff] %v7516_v3  ;;  %v7476_v57 = vmax.f32 %v7252_v27, %v7444_v47  ;;  %v12335_v11 = vld [vmem:[#allocation6_spill] sm:$0xff] }
 0x6ce   : > { %v11917_v35 = vmax.f32 %v12332_v22, %v7443_v33  ;;  %v7262_v7 = vmax.f32 %v11909_v2, 0.0  ;;  %v11921_v56 = vadd.f32 %v9445_v63, %v11746_v30  ;;  %v7125_v20 = vpop.f32.mrb[39].mxu0  ;;  %v7473_v36 = vmax.f32 %v12333_v24, %v7441_v62  ;;  %v7317_v33 = vld [vmem:[#allocation2 + $0x7f] sm:$0xff] }
 0x6cf   : > { %v7260_v26 = vmax.f32 %v11913_v28, 0.0  ;;  %v11927_v23 = vadd.f32 %v11746_v30, %v7125_v20  ;;  %v11931_v16 = vmax.f32 %v7254_v52, %v7446_v61  ;;  %v12334_v52 = vld [vmem:[#allocation5_spill] sm:$0xff] }
 0x6d0   : > { %7294 = vst [vmem:[#allocation2 + $0xc8] sm:$0xff] %v7262_v7  ;;  %v7263_v55 = vmax.f32 %v11921_v56, 0.0  ;;  %v7320_v54 = vld [vmem:[#allocation2 + $0x97] sm:$0xff]  ;;  %v7501_v62 = vmax.f32 %v11917_v35, %v11866_v5 }
 0x6d1   : > { %v7383_v13 = vld [vmem:[#allocation2 + $0x91] sm:$0xff]  ;;  %7292 = vst [vmem:[#allocation2 + $0xb8] sm:$0xff] %v7260_v26  ;;  %v7261_v39 = vmax.f32 %v11927_v23, 0.0  ;;  %v7352_v45 = vmul.f32 %v12334_v52, %v7320_v54  ;;  %v7502_v37 = vmax.f32 %v11931_v16, %v11880_v29  ;;  %v7445_v29 = vmax.f32 %v7317_v33, %v7413_v19  ;;  %v7386_v20 = vld [vmem:[#allocation2 + $0xa9] sm:$0xff] }
 0x6d2   : > { %v7415_v8 = vmul.f32 %v12316_v10, %v7383_v13  ;;  %7295 = vst [vmem:[#allocation2 + $0xd0] sm:$0xff] %v7263_v55  ;;  %v7322_v27 = vld [vmem:[#allocation2 + $0xa7] sm:$0xff]  ;;  %v7517_v5 = vmax.f32 %v7473_v36, %v7501_v62  ;;  %v7384_v47 = vld [vmem:[#allocation2 + $0x99] sm:$0xff]  ;;  %v7323_v25 = vld [vmem:[#allocation2 + $0xaf] sm:$0xff] }
 0x6d3   : > { %v7385_v3 = vld [vmem:[#allocation2 + $0xa1] sm:$0xff]  ;;  %7293 = vst [vmem:[#allocation2 + $0xc0] sm:$0xff] %v7261_v39  ;;  %v9448_v21 = vpop.f32.mrb[40].mxu0  ;;  %v7354_v40 = vmul.f32 %v12335_v11, %v7322_v27  ;;  %v7518_v53 = vmax.f32 %v7476_v57, %v7502_v37  ;;  %v7448_v24 = vmax.f32 %v7352_v45, %v7384_v47  ;;  %v7477_v58 = vmax.f32 %v7253_v1, %v7445_v29 }
 0x6d4   : > { %v7447_v10 = vmax.f32 %v7319_v6, %v7415_v8  ;;  %v7546_v63 = vld [vmem:[#allocation3 + $0x10] ss:$2 sm:$0xff]  ;;  %v11954_v61 = vadd.f32 %v9448_v21, %v11746_v30  ;;  %v7138_v22 = vpop.f32.mrb[41].mxu0  ;;  %7533 = vst [vmem:[#allocation3 + $0x28] sm:$0xff] %v7517_v5  ;;  %v7417_v19 = vmul.f32 %v12317_v38, %v7385_v3 }
 0x6d5   : > { %7560 = vst [vmem:[%s11897_s13 + $0x8] sm:$0xff] %v7546_v63  ;;  %v11958_v36 = vadd.f32 %v11746_v30, %v7138_v22  ;;  %v9449_v54 = vpop.f32.mrb[42].mxu0  ;;  %v7450_v13 = vmax.f32 %v7354_v40, %v7386_v20  ;;  %7534 = vst [vmem:[#allocation3 + $0x30] sm:$0xff] %v7518_v53  ;;  %v7480_v27 = vmax.f32 %v7256_v15, %v7448_v24  ;;  %v7321_v3 = vld [vmem:[#allocation2 + $0x9f] sm:$0xff] }
 0x6d6   : > { %v11962_v62 = vmax.f32 %v7255_v48, %v7447_v10  ;;  %v7266_v57 = vmax.f32 %v11954_v61, 0.0  ;;  %v11967_v52 = vadd.f32 %v9449_v54, %v11746_v30  ;;  %v7141_v45 = vpop.f32.mrb[43].mxu0  ;;  %v7449_v21 = vmax.f32 %v7321_v3, %v7417_v19 }
 0x6d7   : > { %v7264_v8 = vmax.f32 %v11958_v36, 0.0  ;;  %v11971_v37 = vadd.f32 %v11746_v30, %v7141_v45  ;;  %v11975_v33 = vmax.f32 %v7258_v31, %v7450_v13 }
 0x6d8   : > { %7298 = vst [vmem:[#allocation2 + $0xe8] sm:$0xff] %v7266_v57  ;;  %v7267_v38 = vmax.f32 %v11967_v52, 0.0  ;;  %v7324_v48 = vld [vmem:[#allocation2 + $0xb7] sm:$0xff]  ;;  %v7503_v5 = vmax.f32 %v11962_v62, %v11917_v35  ;;  %v7481_v13 = vmax.f32 %v7257_v41, %v7449_v21 }
 0x6d9   : > { %v7387_v6 = vld [vmem:[#allocation2 + $0xb1] sm:$0xff]  ;;  %7296 = vst [vmem:[#allocation2 + $0xd8] sm:$0xff] %v7264_v8  ;;  %v7265_v49 = vmax.f32 %v11971_v37, 0.0  ;;  %v7356_v1 = vmul.f32 %v10476_v46, %v7324_v48  ;;  %v7504_v31 = vmax.f32 %v11975_v33, %v11931_v16  ;;  %v7390_v29 = vld [vmem:[#allocation2 + $0xc9] sm:$0xff] }
 0x6da   : > { %v7419_v34 = vmul.f32 %v12320_v9, %v7387_v6  ;;  %7299 = vst [vmem:[#allocation2 + $0xf0] sm:$0xff] %v7267_v38  ;;  %v7326_v15 = vld [vmem:[#allocation2 + $0xc7] sm:$0xff]  ;;  %v7519_v35 = vmax.f32 %v7477_v58, %v7503_v5  ;;  %v7388_v46 = vld [vmem:[#allocation2 + $0xb9] sm:$0xff] }
 0x6db   : > { %7297 = vst [vmem:[#allocation2 + $0xe0] sm:$0xff] %v7265_v49  ;;  %v9452_v11 = vpop.f32.mrb[44].mxu0  ;;  %v7358_v40 = vmul.f32 %v12290_v59, %v7326_v15  ;;  %v7520_v9 = vmax.f32 %v7480_v27, %v7504_v31  ;;  %v7548_v10 = vld [vmem:[#allocation3 + $0x20] ss:$2 sm:$0xff]  ;;  %v7389_v53 = vld [vmem:[#allocation2 + $0xc1] sm:$0xff]  ;;  %v7452_v22 = vmax.f32 %v7356_v1, %v7388_v46 }
 0x6dc   : > { %v7451_v47 = vmax.f32 %v7323_v25, %v7419_v34  ;;  %v11999_v16 = vadd.f32 %v9452_v11, %v11746_v30  ;;  %v7154_v63 = vpop.f32.mrb[45].mxu0  ;;  %7535 = vst [vmem:[#allocation3 + $0x38] sm:$0xff] %v7519_v35  ;;  %7561 = vst [vmem:[%s11897_s13 + $0x10] sm:$0xff] %v7548_v10  ;;  %v7421_v48 = vmul.f32 %v12321_v44, %v7389_v53  ;;  %v7325_v1 = vld [vmem:[#allocation2 + $0xbf] sm:$0xff]  ;;  %v7327_v34 = vld [vmem:[#allocation2 + $0xcf] sm:$0xff] }
 0x6dd   : > { %v12003_v20 = vadd.f32 %v11746_v30, %v7154_v63  ;;  %v9453_v24 = vpop.f32.mrb[46].mxu0  ;;  %v7454_v54 = vmax.f32 %v7358_v40, %v7390_v29  ;;  %7536 = vst [vmem:[#allocation3 + $0x40] sm:$0xff] %v7520_v9  ;;  %v7484_v5 = vmax.f32 %v7260_v26, %v7452_v22 }
 0x6de   : > { %v7483_v59 = vmax.f32 %v7259_v18, %v7451_v47  ;;  %v7270_v19 = vmax.f32 %v11999_v16, 0.0  ;;  %v12011_v45 = vadd.f32 %v9453_v24, %v11746_v30  ;;  %v7157_v58 = vpop.f32.mrb[47].mxu0  ;;  %v7453_v26 = vmax.f32 %v7325_v1, %v7421_v48 }
 0x6df   : > { %v7268_v6 = vmax.f32 %v12003_v20, 0.0  ;;  %v7486_v27 = vmax.f32 %v7262_v7, %v7454_v54  ;;  %v12024_v3 = vadd.f32 %v11746_v30, %v7157_v58 }
 0x6e0   : > { %v7505_v51 = vmax.f32 %v7483_v59, %v11962_v62  ;;  %7302 = vst [vmem:[#allocation2 + $0x108] sm:$0xff] %v7270_v19  ;;  %v7271_v14 = vmax.f32 %v12011_v45, 0.0  ;;  %v7328_v18 = vld [vmem:[#allocation2 + $0xd7] sm:$0xff]  ;;  %v7485_v46 = vmax.f32 %v7261_v39, %v7453_v26 }
 0x6e1   : > { %v7391_v41 = vld [vmem:[#allocation2 + $0xd1] sm:$0xff]  ;;  %7300 = vst [vmem:[#allocation2 + $0xf8] sm:$0xff] %v7268_v6  ;;  %v7360_v44 = vmul.f32 %v12292_v12, %v7328_v18  ;;  %v7506_v7 = vmax.f32 %v7486_v27, %v11975_v33  ;;  %v7269_v28 = vmax.f32 %v12024_v3, 0.0 }
 0x6e2   : > { %v7423_v2 = vmul.f32 %v12324_v60, %v7391_v41  ;;  %v7521_v62 = vmax.f32 %v7481_v13, %v7505_v51  ;;  %7303 = vst [vmem:[#allocation2 + $0x110] sm:$0xff] %v7271_v14  ;;  %v7330_v31 = vld [vmem:[#allocation2 + $0xe7] sm:$0xff]  ;;  %v7392_v21 = vld [vmem:[#allocation2 + $0xd9] sm:$0xff]  ;;  %v7331_v23 = vld [vmem:[#allocation2 + $0xef] sm:$0xff] }
 0x6e3   : > { %v7362_v30 = vmul.f32 %v12295_v4, %v7330_v31  ;;  %v7522_v15 = vmax.f32 %v7484_v5, %v7506_v7  ;;  %v7550_v12 = vld [vmem:[#allocation3 + $0x30] ss:$2 sm:$0xff]  ;;  %7301 = vst [vmem:[#allocation2 + $0x100] sm:$0xff] %v7269_v28  ;;  %v7456_v33 = vmax.f32 %v7360_v44, %v7392_v21 }
 0x6e4   : > { %v7455_v25 = vmax.f32 %v7327_v34, %v7423_v2  ;;  %7537 = vst [vmem:[#allocation3 + $0x48] sm:$0xff] %v7521_v62  ;;  %v7393_v35 = vld [vmem:[#allocation2 + $0xe1] sm:$0xff]  ;;  %v7394_v60 = vld [vmem:[#allocation2 + $0xe9] sm:$0xff]  ;;  %7562 = vst [vmem:[%s11897_s13 + $0x18] sm:$0xff] %v7550_v12 }
 0x6e5   : > { %v7458_v11 = vmax.f32 %v7362_v30, %v7394_v60  ;;  %7538 = vst [vmem:[#allocation3 + $0x50] sm:$0xff] %v7522_v15  ;;  %v7425_v4 = vmul.f32 %v12325_v42, %v7393_v35  ;;  %v7488_v56 = vmax.f32 %v7264_v8, %v7456_v33  ;;  %v7329_v24 = vld [vmem:[#allocation2 + $0xdf] sm:$0xff] }
 0x6e6   : > { %v7487_v40 = vmax.f32 %v7263_v55, %v7455_v25 }
 0x6e7   : > { %v7490_v47 = vmax.f32 %v7266_v57, %v7458_v11  ;;  %v7457_v57 = vmax.f32 %v7329_v24, %v7425_v4 }
 0x6e8   : > { %v7507_v9 = vmax.f32 %v7487_v40, %v7483_v59  ;;  %v7395_v10 = vld [vmem:[#allocation2 + $0xf1] sm:$0xff] }
 0x6e9   : > { %v7332_v53 = vld [vmem:[#allocation2 + $0xf7] sm:$0xff]  ;;  %v7427_v29 = vmul.f32 %v12327_v32, %v7395_v10  ;;  %v7508_v55 = vmax.f32 %v7490_v47, %v7486_v27  ;;  %v7335_v54 = vld [vmem:[#allocation2 + $0x10f] sm:$0xff]  ;;  %v7489_v5 = vmax.f32 %v7265_v49, %v7457_v57 }
 0x6ea   : > { %v7399_v63 = vld [vmem:[#allocation2 + $0x111] sm:$0xff]  ;;  %v7523_v22 = vmax.f32 %v7485_v46, %v7507_v9  ;;  %v7364_v61 = vmul.f32 %v12296_v50, %v7332_v53  ;;  %v7334_v45 = vld [vmem:[#allocation2 + $0x107] sm:$0xff]  ;;  %v7396_v32 = vld [vmem:[#allocation2 + $0xf9] sm:$0xff] }
 0x6eb   : > { %v7431_v39 = vmul.f32 %v10735_v17, %v7399_v63  ;;  %v7552_v42 = vld [vmem:[#allocation3 + $0x40] ss:$2 sm:$0xff]  ;;  %v7459_v59 = vmax.f32 %v7331_v23, %v7427_v29  ;;  %v7524_v13 = vmax.f32 %v7488_v56, %v7508_v55  ;;  %v7366_v36 = vmul.f32 %v12297_v43, %v7334_v45  ;;  %v7397_v8 = vld [vmem:[#allocation2 + $0x101] sm:$0xff] }
 0x6ec   : > { %7539 = vst [vmem:[#allocation3 + $0x58] sm:$0xff] %v7523_v22  ;;  %7563 = vst [vmem:[%s11897_s13 + $0x20] sm:$0xff] %v7552_v42  ;;  %v7398_v17 = vld [vmem:[#allocation2 + $0x109] sm:$0xff]  ;;  %v7429_v27 = vmul.f32 %v12328_v0, %v7397_v8  ;;  %v7333_v51 = vld [vmem:[#allocation2 + $0xff] sm:$0xff]  ;;  %v7460_v18 = vmax.f32 %v7364_v61, %v7396_v32 }
 0x6ed   : > { %v7463_v58 = vmax.f32 %v7335_v54, %v7431_v39  ;;  %v7491_v48 = vmax.f32 %v7267_v38, %v7459_v59  ;;  %7540 = vst [vmem:[#allocation3 + $0x60] sm:$0xff] %v7524_v13  ;;  %v7462_v41 = vmax.f32 %v7366_v36, %v7398_v17 }
 0x6ee   : > { %v7461_v44 = vmax.f32 %v7333_v51, %v7429_v27  ;;  %v7492_v0 = vmax.f32 %v7268_v6, %v7460_v18 }
 0x6ef   : > { %v7495_v50 = vmax.f32 %v7271_v14, %v7463_v58  ;;  %v7509_v3 = vmax.f32 %v7491_v48, %v7487_v40  ;;  %v7494_v52 = vmax.f32 %v7270_v19, %v7462_v41 }
 0x6f0   : > { %v7493_v2 = vmax.f32 %v7269_v28, %v7461_v44 }
 0x6f1   : > { %v7511_v43 = vmax.f32 %v7495_v50, %v7491_v48  ;;  %v7525_v38 = vmax.f32 %v7489_v5, %v7509_v3  ;;  %v7510_v14 = vmax.f32 %v7494_v52, %v7490_v47 }
 0x6f3   : > { %v7554_v7 = vld [vmem:[#allocation3 + $0x50] ss:$2 sm:$0xff]  ;;  %7541 = vst [vmem:[#allocation3 + $0x68] sm:$0xff] %v7525_v38  ;;  %v7527_v62 = vmax.f32 %v7493_v2, %v7511_v43  ;;  %v7526_v37 = vmax.f32 %v7492_v0, %v7510_v14 }
 0x6f4   : > { %7564 = vst [vmem:[%s11897_s13 + $0x28] sm:$0xff] %v7554_v7 }
 0x6f5   : > { %7543 = vst [vmem:[#allocation3 + $0x78] sm:$0xff] %v7527_v62  ;;  %7542 = vst [vmem:[#allocation3 + $0x70] sm:$0xff] %v7526_v37 }
 0x6fa   : > { %v7556_v49 = vld [vmem:[#allocation3 + $0x60] ss:$2 sm:$0xff] }
 0x6fb   : > { %7565 = vst [vmem:[%s11897_s13 + $0x30] sm:$0xff] %v7556_v49 }
 0x6fc   : > { %v7558_v1 = vld [vmem:[#allocation3 + $0x70] ss:$2 sm:$0xff] }
 0x6fd   : > { %7566 = vst [vmem:[%s11897_s13 + $0x38] sm:$0xff] %v7558_v1 }
 0x6fe PF: > { %s17_s24 = sadd.s32 1, %s10150_s24  }
 0x6ff   : > { %p14_p4 = scmp.ge.s32.totalorder %s17_s24, 4  }
 0x701   :  { %16 = sbr.rel (!%p14_p4) target bundleno = 1 (0x1), region = 101 }

</bundles_post_ra>
